<compile_context>
chip_gen: v5e
topology: v5e:2x2
jax: 0.10.0
libtpu: 0.0.40
codegen_flags: <defaults>
</compile_context>

<pallas_src>
import jax
import jax.numpy as jnp
from jax.experimental import pallas as pl
from jax.experimental.pallas import tpu as pltpu


IN_PAD = 64          # common padded input width for both views (20 -> 64, 59 -> 64)
LANE = 128           # lane-dense packed output width: [h | z | lobo | 0-pad]
MAX_TB = 512         # batch-tile cap (VMEM budget sized for v7x's 64 MiB)
_BN_EPS = 1e-5


def _round_up(x, m):
    return -(-x // m) * m


# ----------------------------------------------------------------------------
# Fused Pallas kernel: one grid point == (view, batch-tile)
# ----------------------------------------------------------------------------

def fused_view_kernel(x_ref, w1_ref, b1_ref, w2_ref, b2_ref, w3_ref, b3_ref,
                      g_ref, c_ref, out_ref):
    out_dim = w3_ref.shape[1]
    k = g_ref.shape[1]

    # ---- encoder: 3 x (Linear + folded BN + ReLU); bf16 weights, f32 accum ----
    x = x_ref[...]                                                   # (TB, 64) bf16
    h1 = jnp.dot(x, w1_ref[...], preferred_element_type=jnp.float32) + b1_ref[...]
    h1 = jnp.maximum(h1, 0.0)                                        # (TB, 1024) f32
    h2 = jnp.dot(h1.astype(jnp.bfloat16), w2_ref[...],
                 preferred_element_type=jnp.float32) + b2_ref[...]
    h2 = jnp.maximum(h2, 0.0)                                        # (TB, 1024) f32
    h = jnp.dot(h2.astype(jnp.bfloat16), w3_ref[...],
                preferred_element_type=jnp.float32) + b3_ref[...]
    h = jnp.maximum(h, 0.0)                                          # (TB, 64) f32

    # ---- DPGMM head: single fused matmul  logp = c + [h, h*h] @ G ----
    hh = jnp.concatenate([h, h * h], axis=-1)                        # (TB, 128) f32
    logp = c_ref[...] + jnp.dot(hh, g_ref[...],
                                preferred_element_type=jnp.float32)  # (TB, K)
    m = jnp.max(logp, axis=1, keepdims=True)                         # (TB, 1)
    e = jnp.exp(logp - m)                                            # (TB, K)
    s = jnp.sum(e, axis=1, keepdims=True)                            # (TB, 1)
    z = e * pl.reciprocal(s, approx=True)                            # EUP, not VALU
    lobo = m + jnp.log(s)                                            # (TB, 1)

    # ---- single lane-dense (TB, 128) writeback block ----
    out_ref[...] = jnp.zeros_like(out_ref)
    out_ref[:, :out_dim] = h
    out_ref[:, out_dim:out_dim + k] = z
    out_ref[:, out_dim + k:out_dim + k + 1] = lobo


# ----------------------------------------------------------------------------
# BlockSpec helpers
# ----------------------------------------------------------------------------

def _weight_spec(shape):
    # Per-view weight block; index independent of the batch axis -> the block
    # stays VMEM-resident across consecutive batch tiles (fetched once/view).
    return pl.BlockSpec((None,) + tuple(shape), lambda v, b: (v, 0, 0))


def _shared_spec(shape):
    # Same block for every grid step (shared, folded GMM parameters).
    return pl.BlockSpec(tuple(shape), lambda v, b: (0,) * len(shape))


# ----------------------------------------------------------------------------
# pallas_call wrapper
# ----------------------------------------------------------------------------

@jax.jit
def mvcln_fc_scene_forward(packed_enc, gmm_folded, x0, x1):
    W1, b1, W2, b2, W3, b3 = packed_enc
    G, c = gmm_folded

    B = x0.shape[0]
    H = W1.shape[2]           # 1024
    OUT = W3.shape[2]         # 64
    K = G.shape[1]            # n_components
    assert OUT + K + 1 <= LANE

    TB = min(MAX_TB, _round_up(max(B, 8), 8))
    B_pad = _round_up(B, TB)
    nbt = B_pad // TB

    # Pad/stack both views to a common (2, B_pad, 64) bf16 input.
    X = jnp.stack([
        jnp.pad(x0, ((0, B_pad - B), (0, IN_PAD - x0.shape[1]))),
        jnp.pad(x1, ((0, B_pad - B), (0, IN_PAD - x1.shape[1]))),
    ]).astype(jnp.bfloat16)

    weight_bytes = int((W1.size + W2.size + W3.size) * W1.dtype.itemsize)
    bias_bytes = int((b1.size + b2.size + b3.size) * 4)
    io_bytes = int(X.size * 2 + 2 * B_pad * LANE * 4 + (G.size + c.size) * 4)
    cost = pl.CostEstimate(
        flops=int(2 * 2 * B_pad * (IN_PAD * H + H * H + H * OUT + 2 * OUT * K)),
        transcendentals=int(2 * B_pad * (K + 2)),
        bytes_accessed=weight_bytes + bias_bytes + io_bytes)

    packed_out = pl.pallas_call(
        fused_view_kernel,
        out_shape=jax.ShapeDtypeStruct((2, B_pad, LANE), jnp.float32),
        grid=(2, nbt),                       # (view, batch-tile); batch fastest
        in_specs=[
            pl.BlockSpec((None, TB, IN_PAD), lambda v, b: (v, b, 0)),
            _weight_spec((IN_PAD, H)), _weight_spec((1, H)),
            _weight_spec((H, H)), _weight_spec((1, H)),
            _weight_spec((H, OUT)), _weight_spec((1, OUT)),
            _shared_spec((2 * OUT, K)), _shared_spec((1, K)),
        ],
        out_specs=pl.BlockSpec((None, TB, LANE), lambda v, b: (v, b, 0)),
        compiler_params=pltpu.CompilerParams(
            dimension_semantics=("parallel", "parallel"),
            vmem_limit_bytes=48 * 1024 * 1024),
        cost_estimate=cost,
    )(X, W1, b1, W2, b2, W3, b3, G, c)

    h0 = packed_out[0, :B, :OUT]
    h1 = packed_out[1, :B, :OUT]
    z0 = packed_out[0, :B, OUT:OUT + K]
    z1 = packed_out[1, :B, OUT:OUT + K]
    L0 = packed_out[0, :B, OUT + K:OUT + K + 1]
    L1 = packed_out[1, :B, OUT + K:OUT + K + 1]
    return h0, h1, L0, L1, z0, z1


# ----------------------------------------------------------------------------
# Parameter construction (deterministic, synthetic) + BN / GMM folding
# ----------------------------------------------------------------------------

def _make_linear_bn(key, in_dim, out_dim):
    """Linear + BatchNorm1d (eval mode) folded into effective W (in,out), b (out,)."""
    k = jax.random.split(key, 6)
    scale = 1.0 / jnp.sqrt(jnp.float32(in_dim))
    W = jax.random.uniform(k[0], (out_dim, in_dim), jnp.float32, -scale, scale)
    b = jax.random.uniform(k[1], (out_dim,), jnp.float32, -scale, scale)
    gamma = 1.0 + 0.1 * jax.random.normal(k[2], (out_dim,), jnp.float32)
    beta = 0.1 * jax.random.normal(k[3], (out_dim,), jnp.float32)
    run_mean = 0.1 * jax.random.normal(k[4], (out_dim,), jnp.float32)
    run_var = jnp.abs(1.0 + 0.1 * jax.random.normal(k[5], (out_dim,), jnp.float32))
    s = gamma / jnp.sqrt(run_var + _BN_EPS)      # fold in f32
    W_eff = (W * s[:, None]).T                   # (in_dim, out_dim)
    b_eff = (b - run_mean) * s + beta            # (out_dim,)
    return W_eff, b_eff


def make_encoder_params(key, in_dim, hidden=1024, out_dim=64):
    k1, k2, k3 = jax.random.split(key, 3)
    return [_make_linear_bn(k1, in_dim, hidden),
            _make_linear_bn(k2, hidden, hidden),
            _make_linear_bn(k3, hidden, out_dim)]


def _pad_rows(W, rows):
    return jnp.pad(W, ((0, rows - W.shape[0]), (0, 0)))


def pack_encoder_params(enc0, enc1):
    """Stack the two views' folded params; weights -> bf16, biases stay f32."""
    W1 = jnp.stack([_pad_rows(enc0[0][0], IN_PAD),
                    _pad_rows(enc1[0][0], IN_PAD)]).astype(jnp.bfloat16)   # (2,64,1024)
    b1 = jnp.stack([enc0[0][1], enc1[0][1]])[:, None, :]                   # (2,1,1024)
    W2 = jnp.stack([enc0[1][0], enc1[1][0]]).astype(jnp.bfloat16)          # (2,1024,1024)
    b2 = jnp.stack([enc0[1][1], enc1[1][1]])[:, None, :]
    W3 = jnp.stack([enc0[2][0], enc1[2][0]]).astype(jnp.bfloat16)          # (2,1024,64)
    b3 = jnp.stack([enc0[2][1], enc1[2][1]])[:, None, :]
    return W1, b1, W2, b2, W3, b3


def make_dpgmm_params(key, output_dim=64, n_components=8):
    k1, k2, k3 = jax.random.split(key, 3)
    mu = 0.5 * jax.random.normal(k1, (n_components, output_dim), jnp.float32)
    prec = jnp.exp(0.1 * jax.random.normal(k2, (n_components, output_dim), jnp.float32))
    logits = 0.1 * jax.random.normal(k3, (n_components,), jnp.float32)
    logpi = jax.nn.log_softmax(logits)
    return mu, prec, logpi


def fold_dpgmm_params(mu, prec, logpi):
    """Precompute all data-independent GMM constants (done once, outside kernel)."""
    D = mu.shape[1]
    prec_t = prec.T.astype(jnp.float32)                       # (D, K)
    pm = (prec * mu).T.astype(jnp.float32)                    # (D, K)
    G = jnp.concatenate([pm, -0.5 * prec_t], axis=0)          # (2D, K) = (128, K)
    const = jnp.sum(prec * mu * mu, axis=1)                   # (K,)
    logdet = jnp.sum(jnp.log(prec), axis=1)                   # (K,)
    c = logpi + 0.5 * logdet - 0.5 * D * jnp.log(2.0 * jnp.pi) - 0.5 * const
    return G.astype(jnp.float32), c.reshape(1, -1).astype(jnp.float32)


# ----------------------------------------------------------------------------
# Pure-JAX reference (same bf16 weights / folded GMM params) for verification
# ----------------------------------------------------------------------------

def reference_forward(packed_enc, gmm_folded, x0, x1):
    W1, b1, W2, b2, W3, b3 = packed_enc
    G, c = gmm_folded

    def enc(x, v):
        x = jnp.pad(x, ((0, 0), (0, IN_PAD - x.shape[1]))).astype(jnp.bfloat16)
        h = jnp.maximum(jnp.dot(x, W1[v],
                                preferred_element_type=jnp.float32) + b1[v], 0.0)
        h = jnp.maximum(jnp.dot(h.astype(jnp.bfloat16), W2[v],
                                preferred_element_type=jnp.float32) + b2[v], 0.0)
        h = jnp.maximum(jnp.dot(h.astype(jnp.bfloat16), W3[v],
                                preferred_element_type=jnp.float32) + b3[v], 0.0)
        return h

    def gmm(h):
        hh = jnp.concatenate([h, h * h], axis=-1)
        logp = c + hh @ G
        m = jnp.max(logp, axis=1, keepdims=True)
        e = jnp.exp(logp - m)
        s = jnp.sum(e, axis=1, keepdims=True)
        return m + jnp.log(s), e / s

    h0, h1 = enc(x0, 0), enc(x1, 1)
    L0, z0 = gmm(h0)
    L1, z1 = gmm(h1)
    return h0, h1, L0, L1, z0, z1


# ----------------------------------------------------------------------------
# Demo
# ----------------------------------------------------------------------------

if __name__ == "__main__":
    key = jax.random.PRNGKey(0)
    k_x0, k_x1, k_e0, k_e1, k_g = jax.random.split(key, 5)

    B = 8
    OUTPUT_DIM = 64
    N_COMPONENTS = 8

    x0 = jax.random.normal(k_x0, (B, 20), jnp.float32)
    x1 = jax.random.normal(k_x1, (B, 59), jnp.float32)

    enc0 = make_encoder_params(k_e0, 20, 1024, OUTPUT_DIM)
    enc1 = make_encoder_params(k_e1, 59, 1024, OUTPUT_DIM)
    packed_enc = pack_encoder_params(enc0, enc1)

    mu, prec, logpi = make_dpgmm_params(k_g, OUTPUT_DIM, N_COMPONENTS)
    gmm_folded = fold_dpgmm_params(mu, prec, logpi)

    outs = jax.block_until_ready(
        mvcln_fc_scene_forward(packed_enc, gmm_folded, x0, x1))
    h0, h1, LOBO0, LOBO1, z0, z1 = outs

    assert h0.shape == (B, OUTPUT_DIM) and h1.shape == (B, OUTPUT_DIM)
    assert LOBO0.shape == (B, 1) and LOBO1.shape == (B, 1)
    assert z0.shape == (B, N_COMPONENTS) and z1.shape == (B, N_COMPONENTS)
    allv = jnp.concatenate([h0.ravel(), h1.ravel(), LOBO0.ravel(),
                            LOBO1.ravel(), z0.ravel(), z1.ravel()])
    assert bool(jnp.all(jnp.isfinite(allv)))

    ref = jax.block_until_ready(reference_forward(packed_enc, gmm_folded, x0, x1))
    for got, want in zip(outs, ref):
        assert jnp.allclose(got, want, rtol=2e-2, atol=2e-2), (
            float(jnp.max(jnp.abs(got - want))))

    print("KERNEL_OK")
</pallas_src>

<mosaic_0001>
module attributes {stable_mosaic.version = 11 : i64} {
  func.func @fused_view_kernel(%arg0: i32, %arg1: i32, %arg2: memref<1x8x64xbf16, #tpu.memory_space<vmem>>, %arg3: memref<1x64x1024xbf16, #tpu.memory_space<vmem>>, %arg4: memref<1x1x1024xf32, #tpu.memory_space<vmem>>, %arg5: memref<1x1024x1024xbf16, #tpu.memory_space<vmem>>, %arg6: memref<1x1x1024xf32, #tpu.memory_space<vmem>>, %arg7: memref<1x1024x64xbf16, #tpu.memory_space<vmem>>, %arg8: memref<1x1x64xf32, #tpu.memory_space<vmem>>, %arg9: memref<128x8xf32, #tpu.memory_space<vmem>>, %arg10: memref<1x8xf32, #tpu.memory_space<vmem>>, %arg11: memref<1x8x128xf32, #tpu.memory_space<vmem>>) attributes {dimension_semantics = [#tpu.dimension_semantics<parallel>, #tpu.dimension_semantics<parallel>], iteration_bounds = array<i64: 2, 1>, scalar_prefetch = 0 : i64, scratch_operands = 0 : i64, tpu.core_type = #tpu.core_type<tc>, window_params = [{transform_indices = @transform_0, window_bounds = array<i64: 1, 8, 64>}, {transform_indices = @transform_1, window_bounds = array<i64: 1, 64, 1024>}, {transform_indices = @transform_2, window_bounds = array<i64: 1, 1, 1024>}, {transform_indices = @transform_3, window_bounds = array<i64: 1, 1024, 1024>}, {transform_indices = @transform_4, window_bounds = array<i64: 1, 1, 1024>}, {transform_indices = @transform_5, window_bounds = array<i64: 1, 1024, 64>}, {transform_indices = @transform_6, window_bounds = array<i64: 1, 1, 64>}, {pipeline_mode = #tpu.pipeline_mode<synchronous>, transform_indices = @transform_7, window_bounds = array<i64: 128, 8>}, {pipeline_mode = #tpu.pipeline_mode<synchronous>, transform_indices = @transform_8, window_bounds = array<i64: 1, 8>}, {transform_indices = @transform_9, window_bounds = array<i64: 1, 8, 128>}]} {
    %c0 = arith.constant 0 : index
    %c0_0 = arith.constant 0 : index
    %c0_1 = arith.constant 0 : index
    %0 = vector.load %arg2[%c0, %c0_0, %c0_1] : memref<1x8x64xbf16, #tpu.memory_space<vmem>>, vector<1x8x64xbf16>
    %1 = vector.shape_cast %0 : vector<1x8x64xbf16> to vector<8x64xbf16>
    %c0_2 = arith.constant 0 : index
    %c0_3 = arith.constant 0 : index
    %c0_4 = arith.constant 0 : index
    %2 = vector.load %arg3[%c0_2, %c0_3, %c0_4] : memref<1x64x1024xbf16, #tpu.memory_space<vmem>>, vector<1x64x1024xbf16>
    %3 = vector.shape_cast %2 : vector<1x64x1024xbf16> to vector<64x1024xbf16>
    %cst = arith.constant dense<0.000000e+00> : vector<8x1024xf32>
    %4 = tpu.matmul %1, %3, %cst {dimension_numbers = #tpu.dot_dimension_numbers<[1], [0], [0], [1], [0, 0, 1, 1], [], []>} : vector<8x64xbf16>, vector<64x1024xbf16>, vector<8x1024xf32> -> vector<8x1024xf32>
    %c0_5 = arith.constant 0 : index
    %c0_6 = arith.constant 0 : index
    %c0_7 = arith.constant 0 : index
    %5 = vector.load %arg4[%c0_5, %c0_6, %c0_7] : memref<1x1x1024xf32, #tpu.memory_space<vmem>>, vector<1x1x1024xf32>
    %6 = vector.shape_cast %5 : vector<1x1x1024xf32> to vector<1x1024xf32>
    %7 = vector.broadcast %6 : vector<1x1024xf32> to vector<8x1024xf32>
    %8 = arith.addf %4, %7 : vector<8x1024xf32>
    %cst_8 = arith.constant 0.000000e+00 : f32
    %9 = vector.broadcast %cst_8 : f32 to vector<8x1024xf32>
    %10 = arith.maximumf %8, %9 : vector<8x1024xf32>
    %11 = arith.truncf %10 : vector<8x1024xf32> to vector<8x1024xbf16>
    %c0_9 = arith.constant 0 : index
    %c0_10 = arith.constant 0 : index
    %c0_11 = arith.constant 0 : index
    %12 = vector.load %arg5[%c0_9, %c0_10, %c0_11] : memref<1x1024x1024xbf16, #tpu.memory_space<vmem>>, vector<1x1024x1024xbf16>
    %13 = vector.shape_cast %12 : vector<1x1024x1024xbf16> to vector<1024x1024xbf16>
    %cst_12 = arith.constant dense<0.000000e+00> : vector<8x1024xf32>
    %14 = tpu.matmul %11, %13, %cst_12 {dimension_numbers = #tpu.dot_dimension_numbers<[1], [0], [0], [1], [0, 0, 1, 1], [], []>} : vector<8x1024xbf16>, vector<1024x1024xbf16>, vector<8x1024xf32> -> vector<8x1024xf32>
    %c0_13 = arith.constant 0 : index
    %c0_14 = arith.constant 0 : index
    %c0_15 = arith.constant 0 : index
    %15 = vector.load %arg6[%c0_13, %c0_14, %c0_15] : memref<1x1x1024xf32, #tpu.memory_space<vmem>>, vector<1x1x1024xf32>
    %16 = vector.shape_cast %15 : vector<1x1x1024xf32> to vector<1x1024xf32>
    %17 = vector.broadcast %16 : vector<1x1024xf32> to vector<8x1024xf32>
    %18 = arith.addf %14, %17 : vector<8x1024xf32>
    %cst_16 = arith.constant 0.000000e+00 : f32
    %19 = vector.broadcast %cst_16 : f32 to vector<8x1024xf32>
    %20 = arith.maximumf %18, %19 : vector<8x1024xf32>
    %21 = arith.truncf %20 : vector<8x1024xf32> to vector<8x1024xbf16>
    %c0_17 = arith.constant 0 : index
    %c0_18 = arith.constant 0 : index
    %c0_19 = arith.constant 0 : index
    %22 = vector.load %arg7[%c0_17, %c0_18, %c0_19] : memref<1x1024x64xbf16, #tpu.memory_space<vmem>>, vector<1x1024x64xbf16>
    %23 = vector.shape_cast %22 : vector<1x1024x64xbf16> to vector<1024x64xbf16>
    %cst_20 = arith.constant dense<0.000000e+00> : vector<8x64xf32>
    %24 = tpu.matmul %21, %23, %cst_20 {dimension_numbers = #tpu.dot_dimension_numbers<[1], [0], [0], [1], [0, 0, 1, 1], [], []>} : vector<8x1024xbf16>, vector<1024x64xbf16>, vector<8x64xf32> -> vector<8x64xf32>
    %c0_21 = arith.constant 0 : index
    %c0_22 = arith.constant 0 : index
    %c0_23 = arith.constant 0 : index
    %25 = vector.load %arg8[%c0_21, %c0_22, %c0_23] : memref<1x1x64xf32, #tpu.memory_space<vmem>>, vector<1x1x64xf32>
    %26 = vector.shape_cast %25 : vector<1x1x64xf32> to vector<1x64xf32>
    %27 = vector.broadcast %26 : vector<1x64xf32> to vector<8x64xf32>
    %28 = arith.addf %24, %27 : vector<8x64xf32>
    %cst_24 = arith.constant 0.000000e+00 : f32
    %29 = vector.broadcast %cst_24 : f32 to vector<8x64xf32>
    %30 = arith.maximumf %28, %29 : vector<8x64xf32>
    %31 = arith.mulf %30, %30 : vector<8x64xf32>
    %32 = tpu.concatenate %30, %31 in 1 : vector<8x64xf32>, vector<8x64xf32> -> vector<8x128xf32>
    %c0_25 = arith.constant 0 : index
    %c0_26 = arith.constant 0 : index
    %33 = vector.load %arg10[%c0_25, %c0_26] : memref<1x8xf32, #tpu.memory_space<vmem>>, vector<1x8xf32>
    %c0_27 = arith.constant 0 : index
    %c0_28 = arith.constant 0 : index
    %34 = vector.load %arg9[%c0_27, %c0_28] : memref<128x8xf32, #tpu.memory_space<vmem>>, vector<128x8xf32>
    %cst_29 = arith.constant dense<0.000000e+00> : vector<8x8xf32>
    %35 = tpu.matmul %32, %34, %cst_29 {dimension_numbers = #tpu.dot_dimension_numbers<[1], [0], [0], [1], [0, 0, 1, 1], [], []>} : vector<8x128xf32>, vector<128x8xf32>, vector<8x8xf32> -> vector<8x8xf32>
    %36 = vector.broadcast %33 : vector<1x8xf32> to vector<8x8xf32>
    %37 = arith.addf %36, %35 : vector<8x8xf32>
    %cst_30 = arith.constant dense<0xFF800000> : vector<8xf32>
    %38 = vector.multi_reduction <maximumf>, %37, %cst_30 [1] : vector<8x8xf32> to vector<8xf32>
    %39 = vector.shape_cast %38 : vector<8xf32> to vector<8x1xf32>
    %40 = vector.broadcast %39 : vector<8x1xf32> to vector<8x8xf32>
    %41 = arith.subf %37, %40 : vector<8x8xf32>
    %42 = math.exp %41 : vector<8x8xf32>
    %cst_31 = arith.constant dense<0.000000e+00> : vector<8xf32>
    %43 = vector.multi_reduction <add>, %42, %cst_31 [1] : vector<8x8xf32> to vector<8xf32>
    %44 = vector.shape_cast %43 : vector<8xf32> to vector<8x1xf32>
    %45 = tpu.reciprocal %44 {approx = true} : vector<8x1xf32> -> vector<8x1xf32>
    %46 = vector.broadcast %45 : vector<8x1xf32> to vector<8x8xf32>
    %47 = arith.mulf %42, %46 : vector<8x8xf32>
    %48 = math.log %44 : vector<8x1xf32>
    %49 = arith.addf %39, %48 : vector<8x1xf32>
    %cst_32 = arith.constant 0.000000e+00 : f32
    %50 = vector.broadcast %cst_32 : f32 to vector<8x128xf32>
    %c0_33 = arith.constant 0 : index
    %c0_34 = arith.constant 0 : index
    %c0_35 = arith.constant 0 : index
    %51 = vector.load %arg11[%c0_33, %c0_34, %c0_35] : memref<1x8x128xf32, #tpu.memory_space<vmem>>, vector<1x8x128xf32>
    %52 = vector.shape_cast %51 : vector<1x8x128xf32> to vector<8x128xf32>
    %53 = vector.shape_cast %50 : vector<8x128xf32> to vector<1x8x128xf32>
    tpu.vector_store %arg11[%c0_33, %c0_34, %c0_35], %53 {strides = array<i32>} : memref<1x8x128xf32, #tpu.memory_space<vmem>>, vector<1x8x128xf32>,
    %c0_36 = arith.constant 0 : index
    %c0_37 = arith.constant 0 : index
    %c0_38 = arith.constant 0 : index
    %54 = vector.load %arg11[%c0_36, %c0_37, %c0_38] : memref<1x8x128xf32, #tpu.memory_space<vmem>>, vector<1x8x64xf32>
    %55 = vector.shape_cast %54 : vector<1x8x64xf32> to vector<8x64xf32>
    %56 = vector.shape_cast %30 : vector<8x64xf32> to vector<1x8x64xf32>
    tpu.vector_store %arg11[%c0_36, %c0_37, %c0_38], %56 {strides = array<i32>} : memref<1x8x128xf32, #tpu.memory_space<vmem>>, vector<1x8x64xf32>,
    %c0_39 = arith.constant 0 : index
    %c0_40 = arith.constant 0 : index
    %c64 = arith.constant 64 : index
    %57 = vector.load %arg11[%c0_39, %c0_40, %c64] : memref<1x8x128xf32, #tpu.memory_space<vmem>>, vector<1x8x8xf32>
    %58 = vector.shape_cast %57 : vector<1x8x8xf32> to vector<8x8xf32>
    %59 = vector.shape_cast %47 : vector<8x8xf32> to vector<1x8x8xf32>
    tpu.vector_store %arg11[%c0_39, %c0_40, %c64], %59 {strides = array<i32>} : memref<1x8x128xf32, #tpu.memory_space<vmem>>, vector<1x8x8xf32>,
    %c0_41 = arith.constant 0 : index
    %c0_42 = arith.constant 0 : index
    %c72 = arith.constant 72 : index
    %60 = vector.load %arg11[%c0_41, %c0_42, %c72] : memref<1x8x128xf32, #tpu.memory_space<vmem>>, vector<1x8x1xf32>
    %61 = vector.shape_cast %60 : vector<1x8x1xf32> to vector<8x1xf32>
    %62 = vector.shape_cast %49 : vector<8x1xf32> to vector<1x8x1xf32>
    tpu.vector_store %arg11[%c0_41, %c0_42, %c72], %62 {strides = array<i32>} : memref<1x8x128xf32, #tpu.memory_space<vmem>>, vector<1x8x1xf32>,
    return
  }
  func.func @transform_0(%arg0: i32, %arg1: i32) -> (i32, i32, i32) {
    %c0_i32 = arith.constant 0 : i32
    %c0_i32_0 = arith.constant 0 : i32
    return %arg0, %arg1, %c0_i32 : i32, i32, i32
  }
  func.func @transform_1(%arg0: i32, %arg1: i32) -> (i32, i32, i32) {
    %c0_i32 = arith.constant 0 : i32
    %c0_i32_0 = arith.constant 0 : i32
    %c0_i32_1 = arith.constant 0 : i32
    return %arg0, %c0_i32, %c0_i32_0 : i32, i32, i32
  }
  func.func @transform_2(%arg0: i32, %arg1: i32) -> (i32, i32, i32) {
    %c0_i32 = arith.constant 0 : i32
    %c0_i32_0 = arith.constant 0 : i32
    %c0_i32_1 = arith.constant 0 : i32
    return %arg0, %c0_i32, %c0_i32_0 : i32, i32, i32
  }
  func.func @transform_3(%arg0: i32, %arg1: i32) -> (i32, i32, i32) {
    %c0_i32 = arith.constant 0 : i32
    %c0_i32_0 = arith.constant 0 : i32
    %c0_i32_1 = arith.constant 0 : i32
    return %arg0, %c0_i32, %c0_i32_0 : i32, i32, i32
  }
  func.func @transform_4(%arg0: i32, %arg1: i32) -> (i32, i32, i32) {
    %c0_i32 = arith.constant 0 : i32
    %c0_i32_0 = arith.constant 0 : i32
    %c0_i32_1 = arith.constant 0 : i32
    return %arg0, %c0_i32, %c0_i32_0 : i32, i32, i32
  }
  func.func @transform_5(%arg0: i32, %arg1: i32) -> (i32, i32, i32) {
    %c0_i32 = arith.constant 0 : i32
    %c0_i32_0 = arith.constant 0 : i32
    %c0_i32_1 = arith.constant 0 : i32
    return %arg0, %c0_i32, %c0_i32_0 : i32, i32, i32
  }
  func.func @transform_6(%arg0: i32, %arg1: i32) -> (i32, i32, i32) {
    %c0_i32 = arith.constant 0 : i32
    %c0_i32_0 = arith.constant 0 : i32
    %c0_i32_1 = arith.constant 0 : i32
    return %arg0, %c0_i32, %c0_i32_0 : i32, i32, i32
  }
  func.func @transform_7(%arg0: i32, %arg1: i32) -> (i32, i32) {
    %c0_i32 = arith.constant 0 : i32
    %c0_i32_0 = arith.constant 0 : i32
    %c0_i32_1 = arith.constant 0 : i32
    return %c0_i32, %c0_i32_0 : i32, i32
  }
  func.func @transform_8(%arg0: i32, %arg1: i32) -> (i32, i32) {
    %c0_i32 = arith.constant 0 : i32
    %c0_i32_0 = arith.constant 0 : i32
    %c0_i32_1 = arith.constant 0 : i32
    return %c0_i32, %c0_i32_0 : i32, i32
  }
  func.func @transform_9(%arg0: i32, %arg1: i32) -> (i32, i32, i32) {
    %c0_i32 = arith.constant 0 : i32
    %c0_i32_0 = arith.constant 0 : i32
    return %arg0, %arg1, %c0_i32 : i32, i32, i32
  }
}

</mosaic_0001>

<bundles_post_ra>
// kernel: mvcln_fc_scene_forward.1
= control target key start
LH: loop header
LB: loop body
LE: loop exit
PB: predicated region body
PF: predicated region fallthrough
CT: control target
= control target key end

     0   :  { %s10820_s0 = inlined_call_operand.vmem [shape: bf16[2,8,64], index: 0, kind: input, shape index: {}]   ;;  %s10821_s1 = inlined_call_operand.hbm [shape: bf16[2,64,1024], index: 1, kind: input, shape index: {}]   ;;  %s10822_s2 = inlined_call_operand.hbm [shape: f32[2,1,1024], index: 2, kind: input, shape index: {}]   ;;  %s10823_s3 = inlined_call_operand.hbm [shape: bf16[2,1024,1024], index: 3, kind: input, shape index: {}]   ;;  %s10824_s4 = inlined_call_operand.hbm [shape: f32[2,1,1024], index: 4, kind: input, shape index: {}]   ;;  %s10825_s5 = inlined_call_operand.vmem [shape: bf16[2,1024,64], index: 5, kind: input, shape index: {}]   ;;  %s10826_s6 = inlined_call_operand.hbm [shape: f32[2,1,64], index: 6, kind: input, shape index: {}]   ;;  %s10827_s7 = inlined_call_operand.vmem [shape: f32[128,8], index: 7, kind: input, shape index: {}]   ;;  %s10828_s8 = inlined_call_operand.hbm [shape: f32[1,8], index: 8, kind: input, shape index: {}]   ;;  %s10829_s9 = inlined_call_operand.vmem [shape: f32[2,8,128], index: 9, kind: output, shape index: {}]  }
   0x1   :  { %10835 = sst [smem:[#allocation20_spill]] %s10820_s0 }
   0x2   :  { %10836 = sst [smem:[#allocation21_spill]] %s10821_s1 }
   0x3   :  { %10837 = sst [smem:[#allocation22_spill]] %s10822_s2 }
   0x4   :  { %10838 = sst [smem:[#allocation23_spill]] %s10824_s4 }
   0x5   :  { %10839 = sst [smem:[#allocation24_spill]] %s10825_s5 }
   0x6   :  { %10840 = sst [smem:[#allocation25_spill]] %s10827_s7 }
   0x7   :  { %10841 = sst [smem:[#allocation26_spill]] %s10828_s8 }
   0x8   :  { %10842 = sst [smem:[#allocation27_spill]] %s10829_s9 }
   0x9   :  { %14 = vsyncpa [#allocation3], 0 }
   0xa   :  { %16 = vsyncpa [#allocation3 + $0x1], 0 }
   0xb   :  { %17 = vsyncpa [#allocation5], 0 }
   0xc   :  { %19 = vsyncpa [#allocation5 + $0x1], 0 }
   0xd   :  { %20 = vsyncpa [#allocation8], 0 }
   0xe   :  { %22 = vsyncpa [#allocation8 + $0x1], 0 }
   0xf   :  { %23 = vsyncpa [#allocation11], 0  ;;  %s9231_s30 = smov 0   ;;  %s9233_s10 = smov 0  }
  0x10   :  { %s9235_s11 = smov 0   ;;  %s9237_s12 = smov 0  }
  0x11   :  { %s9239_s13 = smov 0   ;;  %s9241_s14 = smov 0  }
  0x12 LB: > { %10843 = sst [smem:[#allocation16_spill]] %s9162_s11  ;;  %s41_s15 = sadd.s32 1, %s9170_s13  ;;  %s9174_s14 = sphi %s9241_s14, %s29_s14   ;;  %s9170_s13 = sphi %s9239_s13, %s10867_s13   ;;  %s9166_s12 = sphi %s9237_s12, %s10866_s12   ;;  %s9162_s11 = sphi %s9235_s11, %s10862_s11   ;;  %s9158_s10 = sphi %s9233_s10, %s10865_s10   ;;  %s9154_s30 = sphi %s9231_s30, %s10864_s30  }
  0x13   : > { %10844 = sst [smem:[#allocation17_spill]] %s9166_s12  ;;  %s76_s16 = sadd.s32 1, %s9162_s11 }
  0x14   : > { %p43_p0 = scmp.ge.s32.totalorder %s41_s15, 2  ;;  %p83_p1 = scmp.ne.s32.totalorder %s9162_s11, %s9158_s10 }
  0x15   : > { %p84_p2 = scmp.eq.s32.totalorder %s9174_s14, 0  ;;  %p8867_p4 = scmp.lt.s32.totalorder %s9174_s14, 2 }
  0x16   : > { %s10869_s15 = smov (%p43_p0, %s41_s15), 0  ;;  %s9272_s18 = sand.u32 1, %s9162_s11  }
  0x17   : > { %10845 = sst [smem:[#allocation18_spill]] %s10869_s15  ;;  %p85_p3 = por %p84_p2, %p83_p1 }
  0x18   : > { %s73_s17 = ssub.s32 %s9170_s13, %s10869_s15  ;;  %s360_s20 = sand.u32 1, %s9174_s14  }
  0x19   : > { %p74_p5 = scmp.eq.s32.totalorder %s73_s17, 0  ;;  %p9274_p6 = pnand %p8867_p4, %p85_p3 }
  0x1a   : > { %s5762_s21 = sshll.u32 %s9272_s18, 3  ;;  %s5763_s23 = sshll.u32 %s9170_s13, 3 }
  0x1b   : > { %s9281_s22 = scalar_select %p74_p5, %s9162_s11, %s76_s16  }
  0x1c   : > { %s10848_s2 = sld [smem:[#allocation22_spill]]  ;;  %s364_s27 = scalar_lea.vmem [#allocation4], %s5762_s21 }
  0x1d   : > { %10847 = sst [smem:[#allocation19_spill]] %s9281_s22  ;;  %s372_s28 = sshll.u32 %s364_s27, 4  ;;  %s373_s28 = int_to_ptr.vmem [resolvable:$true] %s372_s28 }
  0x1e   : > { %s9287_s17 = scalar_lea.sflag [#allocation5], %s360_s20  ;;  %s10849_s4 = sld [smem:[#allocation23_spill]] }
  0x1f   : > { %s405_s15 = scalar_lea.vmem [#allocation7], %s5762_s21  ;;  %s10831_s27 = sadd.s32 4294967295, %s9174_s14  }
  0x20   : > { %s413_s22 = sshll.u32 %s405_s15, 4  ;;  %p89_p7 = scmp.ne.s32.totalorder %s9158_s10, %s9154_s30  ;;  %s414_s22 = int_to_ptr.vmem [resolvable:$true] %s413_s22 }
  0x21   : > { %p9305_p8 = scmp.eq.s32.totalorder %s10831_s27, 0  ;;  %p5756_p9 = scmp.ge.s32.totalorder %s9174_s14, 1 }
  0x22   : > { %s368_s26 = scalar_lea.hbm %s10848_s2, %s5763_s23  ;;  %p300_p10 = scmp.lt.s32.totalorder %s9174_s14, 3 }
  0x23   : > { %s370_s29 = sshll.u32 %s368_s26, 4  ;;  %s9295_s26 = scalar_lea.sflag [#allocation8], %s360_s20  ;;  %s371_s29 = int_to_ptr.hbm [resolvable:$true] %s370_s29 }
  0x24   : > { %8856 = dma.hbm_to_vmem [thread:$0]  (!%p9274_p6), %s371_s29, 128, %s373_s28, %s9287_s17  }
  0x25   : > { %s409_s25 = scalar_lea.hbm %s10849_s4, %s5763_s23  ;;  %p9313_p11 = por %p9305_p8, %p89_p7 }
  0x26   : > { %s411_s2 = sshll.u32 %s409_s25, 4  ;;  %s10852_s8 = sld [smem:[#allocation26_spill]]  ;;  %s412_s2 = int_to_ptr.hbm [resolvable:$true] %s411_s2 }
  0x27   : > { %8862 = dma.hbm_to_vmem [thread:$0]  (!%p9274_p6), %s412_s2, 128, %s414_s22, %s9295_s26  }
  0x28   : > { %p9320_p12 = pnand %p5756_p9, %p300_p10  ;;  %s9176_s22 = smov [#allocation10]  }
  0x29   : > { %s317_s23 = sshll.u32 %s9176_s22, 4  ;;  %s5759_s29 = sshll.u32 %s9272_s18, 8  ;;  %s318_s23 = int_to_ptr.vmem [resolvable:$true] %s317_s23 }
  0x2a   : > { %p8846_p13 = pneg %p9320_p12  ;;  %s8221_s16 = sshll.u32 %s9170_s13, 8 }
  0x2b   : > { %s342_s24 = scalar_lea.vmem [#allocation2], %s5759_s29  ;;  %s10854_s1 = sld [smem:[#allocation21_spill]] }
  0x2c   : > { %s315_s2 = sshll.u32 %s10852_s8, 4  ;;  %p8847_p0 = pnand %p8846_p13, %p9305_p8  ;;  %s316_s2 = int_to_ptr.hbm [resolvable:$true] %s315_s2 }
  0x2d   : > { %s350_s25 = sshll.u32 %s342_s24, 4  ;;  %s5764_s22 = sshll.u32 %s9272_s18, 12  ;;  %s351_s25 = int_to_ptr.vmem [resolvable:$true] %s350_s25 }
  0x2e   : > { %8849 = dma.hbm_to_vmem [thread:$0]  (!%p8847_p0), %s316_s2, 16, %s318_s23, [#allocation11]  }
  0x2f   : > { %s339_s8 = scalar_lea.sflag [#allocation3], %s9272_s18  ;;  %s9177_s11 = smov 512  }
  0x30   : > { %s9178_s7 = smov 32   ;;  %s8222_s29 = sshll.u32 %s9170_s13, 12 }
  0x31   : > { %s347_s27 = scalar_lea.hbm %s10854_s1, %s8221_s16  ;;  %s388_s2 = scalar_lea.hbm %s10823_s3, %s8222_s29 }
  0x32   : > { %s348_s4 = sshll.u32 %s347_s27, 4  ;;  %s383_s23 = scalar_lea.vmem [#allocation6], %s5764_s22  ;;  %s349_s4 = int_to_ptr.hbm [resolvable:$true] %s348_s4 }
  0x33   : > { %8853 = dma.hbm_to_vmem [thread:$0]  (!%p9274_p6), %s349_s4, 4096, %s351_s25, %s339_s8, %s9177_s11, %s9177_s11, %s9178_s7  }
  0x34   : > { %s391_s16 = sshll.u32 %s383_s23, 4  ;;  %s389_s27 = sshll.u32 %s388_s2, 4  ;;  %s392_s16 = int_to_ptr.vmem [resolvable:$true] %s391_s16  ;;  %s390_s27 = int_to_ptr.hbm [resolvable:$true] %s389_s27 }
  0x35   : > { %8859 = dma.hbm_to_vmem [thread:$0]  (!%p9274_p6), %s390_s27, 65536, %s392_s16, %s9287_s17, %s9177_s11, %s9177_s11, %s9178_s7  }
  0x36   : > { %s434_s9 = scalar_lea.hbm %s10826_s6, %s9170_s13  ;;  %s431_s5 = scalar_lea.vmem [#allocation9], %s9272_s18 }
  0x37   : > { %s438_s0 = sshll.u32 %s431_s5, 4  ;;  %s436_s12 = sshll.u32 %s434_s9, 4  ;;  %s439_s0 = int_to_ptr.vmem [resolvable:$true] %s438_s0  ;;  %s437_s12 = int_to_ptr.hbm [resolvable:$true] %s436_s12 }
  0x38   : > { %8865 = dma.hbm_to_vmem [thread:$0]  (!%p9274_p6), %s437_s12, 16, %s439_s0, %s9295_s26  }
  0x39   : > { %447 = sbr.rel (%p9320_p12) target bundleno = 1739 (0x6cb), region = 56  ;;  %s9355_s4 = sand.u32 (!%p9320_p12), 1, %s9158_s10  }
  0x3a   : > { %s5770_s7 = sshll.u32 (!%p9320_p12), %s9355_s4, 8  ;;  %s450_s8 = scalar_lea.sflag (!%p9320_p12), [#allocation3], %s9355_s4 }
  0x3b   : > { %s9359_s1 = scalar_lea.vmem (!%p9320_p12), [#allocation2], %s5770_s7 }
  0x3e   : > { %9137 = dma.done.wait (%p9313_p11), %s450_s8, 4096  }
  0x3f   : > { %9139 = vsyncadd (%p9313_p11), %s450_s8, 4294963200  ;;  %s10855_s0 = sadd.s32 4294967295, %s9174_s14   ;;  %s5771_s9 = sshll.u32 %s9355_s4, 3 }
  0x40   : > { %s459_s5 = sand.u32 1, %s10855_s0   ;;  %s9368_s12 = scalar_lea.vmem [#allocation4], %s5771_s9 }
  0x41   : > { %s460_s11 = scalar_lea.sflag [#allocation5], %s459_s5 }
  0x42   : > { %9141 = dma.done.wait (%p9313_p11), %s460_s11, 65664  }
  0x43   : > { %9143 = vsyncadd (%p9313_p11), %s460_s11, 4294901632  ;;  %s5772_s18 = sshll.u32 %s9355_s4, 12  ;;  %s480_s17 = scalar_lea.sflag [#allocation8], %s459_s5 }
  0x44   : > { %s9375_s19 = scalar_lea.vmem [#allocation6], %s5772_s18  ;;  %s9377_s26 = scalar_lea.vmem [#allocation7], %s5771_s9 }
  0x45   : > { %9145 = dma.done.wait (%p9313_p11), %s480_s17, 144  }
  0x46   : > { %9147 = vsyncadd (%p9313_p11), %s480_s17, 4294967152  ;;  %s492_s30 = scalar_lea.vmem [#allocation9], %s9355_s4 }
  0x47   : > { %9149 = dma.done.wait (%p9305_p8), [#allocation11], 16  }
  0x48   : > { %9151 = vsyncadd (%p9305_p8), [#allocation11], 4294967280  ;;  %s10856_s25 = sld [smem:[#allocation17_spill]]  ;;  %v5877_v0 = vld [vmem:[%s9359_s1 + $0xc0] sm:$0xf]  ;;  %vm797_vm0 = vcmask 523264  }
  0x49   : > { %v8252_v1 = vld [vmem:[%s9359_s1 + $0xdc] sm:$0xf0]  ;;  %v5885_v2 = vld [vmem:[%s9359_s1 + $0xc8] sm:$0xf]  ;;  %v8249_v5 = vld [vmem:[%s9359_s1 + $0xcc] sm:$0xf] }
  0x4a   : > { %v5878_v3 = vor.u32 %v8252_v1, %v5877_v0  ;;  %v8253_v4 = vld [vmem:[%s9359_s1 + $0xe4] sm:$0xf0]  ;;  %v5887_v6 = vld [vmem:[%s9359_s1 + $0xe8] sm:$0xf0]  ;;  %v5845_v9 = vld [vmem:[%s9359_s1 + $0x80] sm:$0xf] }
  0x4b   : > { %v5886_v7 = vor.u32 %v8253_v4, %v5885_v2  ;;  %v5890_v8 = vor.u32 %v8249_v5, %v5887_v6  ;;  %v8244_v10 = vld [vmem:[%s9359_s1 + $0x9c] sm:$0xf0]  ;;  %v5853_v11 = vld [vmem:[%s9359_s1 + $0x88] sm:$0xf]  ;;  %v8241_v14 = vld [vmem:[%s9359_s1 + $0x8c] sm:$0xf] }
  0x4c   : > { %805 = vmatpush.bf16.msra.mxu1 %v5878_v3  ;;  %v5846_v12 = vor.u32 %v8244_v10, %v5845_v9  ;;  %v8245_v13 = vld [vmem:[%s9359_s1 + $0xa4] sm:$0xf0]  ;;  %v5855_v15 = vld [vmem:[%s9359_s1 + $0xa8] sm:$0xf0]  ;;  %v5813_v18 = vld [vmem:[%s9359_s1 + $0x40] sm:$0xf] }
  0x4d   : > { %831 = vmatpush.bf16.msra.mxu2 %v5886_v7  ;;  %844 = vmatpush.bf16.msra.mxu3 %v5890_v8  ;;  %v5854_v16 = vor.u32 %v8245_v13, %v5853_v11  ;;  %v5858_v17 = vor.u32 %v8241_v14, %v5855_v15  ;;  %v8236_v19 = vld [vmem:[%s9359_s1 + $0x5c] sm:$0xf0]  ;;  %v5821_v20 = vld [vmem:[%s9359_s1 + $0x48] sm:$0xf]  ;;  %v8233_v22 = vld [vmem:[%s9359_s1 + $0x4c] sm:$0xf] }
  0x4e   : > { %p566_p1 = scmp.lt.s32.totalorder %s10856_s25, 1  ;;  %v8237_v21 = vld [vmem:[%s9359_s1 + $0x64] sm:$0xf0]  ;;  %v5823_v23 = vld [vmem:[%s9359_s1 + $0x68] sm:$0xf0]  ;;  %v5814_v24 = vor.u32 %v8236_v19, %v5813_v18  ;;  %s10857_s29 = sld [smem:[#allocation20_spill]] }
  0x4f   : > { %v5781_v25 = vld [vmem:[%s9359_s1] sm:$0xf]  ;;  %v5789_v27 = vld [vmem:[%s9359_s1 + $0x8] sm:$0xf]  ;;  %v5822_v28 = vor.u32 %v8237_v21, %v5821_v20  ;;  %v5826_v29 = vor.u32 %v8233_v22, %v5823_v23  ;;  %v8225_v31 = vld [vmem:[%s9359_s1 + $0xc] sm:$0xf] }
  0x50   : > { %s10871_s25 = smov (!%p566_p1, %s10856_s25), 1  ;;  %806 = vmatpush.bf16.msra.mxu1 %v5846_v12  ;;  %v8228_v26 = vld [vmem:[%s9359_s1 + $0x1c] sm:$0xf0]  ;;  %v8229_v30 = vld [vmem:[%s9359_s1 + $0x24] sm:$0xf0]  ;;  %s10858_s16 = sld [smem:[#allocation24_spill]] }
  0x51   : > { %s5775_s28 = sshll.u32 %s10871_s25, 2  ;;  %832 = vmatpush.bf16.msra.mxu2 %v5854_v16  ;;  %845 = vmatpush.bf16.msra.mxu3 %v5858_v17  ;;  %v5791_v32 = vld [vmem:[%s9359_s1 + $0x28] sm:$0xf0]  ;;  %v8248_v33 = vld [vmem:[%s9359_s1 + $0xc4] sm:$0xf]  ;;  %v5782_v40 = vor.u32 %v8228_v26, %v5781_v25  ;;  %v5790_v43 = vor.u32 %v8229_v30, %v5789_v27  ;;  %s8223_s20 = sshll.u32 %s10871_s25, 9 }
  0x52   : > { %v5893_v34 = vld [vmem:[%s9359_s1 + $0xd0] sm:$0xf]  ;;  %v5879_v36 = vld [vmem:[%s9359_s1 + $0xe0] sm:$0xf0]  ;;  %v5901_v38 = vld [vmem:[%s9359_s1 + $0xd8] sm:$0xf]  ;;  %v5794_v44 = vor.u32 %v8225_v31, %v5791_v32 }
  0x53   : > { %v8254_v35 = vld [vmem:[%s9359_s1 + $0xec] sm:$0xf0]  ;;  %v8255_v39 = vld [vmem:[%s9359_s1 + $0xf4] sm:$0xf0]  ;;  %v8251_v41 = vld [vmem:[%s9359_s1 + $0xdc] sm:$0xf]  ;;  %v5882_v45 = vor.u32 %v8248_v33, %v5879_v36 }
  0x54   : > { %v5894_v37 = vor.u32 %v8254_v35, %v5893_v34  ;;  %807 = vmatpush.bf16.msra.mxu1 %v5814_v24  ;;  %v5903_v42 = vld [vmem:[%s9359_s1 + $0xf8] sm:$0xf0]  ;;  %s572_s24 = scalar_lea.vmem %s10857_s29, %s5775_s28  ;;  %v5902_v46 = vor.u32 %v8255_v39, %v5901_v38  ;;  %v8240_v47 = vld [vmem:[%s9359_s1 + $0x84] sm:$0xf]  ;;  %v5861_v48 = vld [vmem:[%s9359_s1 + $0x90] sm:$0xf] }
  0x55   : > { %833 = vmatpush.bf16.msra.mxu2 %v5822_v28  ;;  %846 = vmatpush.bf16.msra.mxu3 %v5826_v29  ;;  %v8246_v49 = vld [vmem:[%s9359_s1 + $0xac] sm:$0xf0]  ;;  %v5906_v50 = vor.u32 %v8251_v41, %v5903_v42  ;;  %v5847_v51 = vld [vmem:[%s9359_s1 + $0xa0] sm:$0xf0]  ;;  %v5869_v52 = vld [vmem:[%s9359_s1 + $0x98] sm:$0xf] }
  0x56   : > { %857 = vmatpush.bf16.msra.mxu0 %v5894_v37  ;;  %v8247_v53 = vld [vmem:[%s9359_s1 + $0xb4] sm:$0xf0]  ;;  %v9434_v54 = vld [vmem:[%s572_s24] sm:$0xf]  ;;  %v8243_v55 = vld [vmem:[%s9359_s1 + $0x9c] sm:$0xf]  ;;  %v5862_v57 = vor.u32 %v8246_v49, %v5861_v48  ;;  %v5850_v58 = vor.u32 %v8240_v47, %v5847_v51  ;;  %s10631_s27 = scalar_lea.vmem %s10858_s16, %s8223_s20 }
  0x57   : > { %v5871_v56 = vld [vmem:[%s9359_s1 + $0xb8] sm:$0xf0]  ;;  %v5870_v59 = vor.u32 %v8247_v53, %v5869_v52  ;;  %v8232_v60 = vld [vmem:[%s9359_s1 + $0x44] sm:$0xf]  ;;  %v5829_v61 = vld [vmem:[%s9359_s1 + $0x50] sm:$0xf] }
  0x58   : > { %808 = vmatpush.bf16.msra.mxu1 %v5782_v40  ;;  %v8238_v62 = vld [vmem:[%s9359_s1 + $0x6c] sm:$0xf0]  ;;  %v5874_v63 = vor.u32 %v8243_v55, %v5871_v56  ;;  %v5815_v0 = vld [vmem:[%s9359_s1 + $0x60] sm:$0xf0]  ;;  %v5837_v1 = vld [vmem:[%s9359_s1 + $0x58] sm:$0xf] }
  0x59   : > { %834 = vmatpush.bf16.msra.mxu2 %v5790_v43  ;;  %847 = vmatpush.bf16.msra.mxu3 %v5794_v44  ;;  %v8239_v2 = vld [vmem:[%s9359_s1 + $0x74] sm:$0xf0]  ;;  %v8235_v3 = vld [vmem:[%s9359_s1 + $0x5c] sm:$0xf]  ;;  %v5830_v5 = vor.u32 %v8238_v62, %v5829_v61  ;;  %v8224_v6 = vld [vmem:[%s9359_s1 + $0x4] sm:$0xf]  ;;  %v5818_v7 = vor.u32 %v8232_v60, %v5815_v0 }
  0x5a   : > { %v5839_v4 = vld [vmem:[%s9359_s1 + $0x78] sm:$0xf0]  ;;  %858 = vmatpush.bf16.msra.mxu0 %v5862_v57  ;;  %v5838_v8 = vor.u32 %v8239_v2, %v5837_v1  ;;  %v5783_v9 = vld [vmem:[%s9359_s1 + $0x20] sm:$0xf0]  ;;  %v5797_v10 = vld [vmem:[%s9359_s1 + $0x10] sm:$0xf] }
  0x5b   : > { %5907 = vmatmul.msk.bf16.vlgmr.msra.gmra.mxu1 %vm797_vm0, %v9434_v54  ;;  %v8230_v11 = vld [vmem:[%s9359_s1 + $0x2c] sm:$0xf0]  ;;  %v5842_v12 = vor.u32 %v8235_v3, %v5839_v4  ;;  %v5805_v13 = vld [vmem:[%s9359_s1 + $0x18] sm:$0xf]  ;;  %v8227_v15 = vld [vmem:[%s9359_s1 + $0x1c] sm:$0xf]  ;;  %v5786_v23 = vor.u32 %v8224_v6, %v5783_v9 }
  0x5c   : > { %818 = vmatpush.bf16.msrb.mxu1 %v5882_v45  ;;  %5909 = vmatmul.msk.bf16.vlgmr.msra.gmra.mxu2 %vm797_vm0, %v9434_v54  ;;  %v8231_v14 = vld [vmem:[%s9359_s1 + $0x34] sm:$0xf0]  ;;  %v5807_v16 = vld [vmem:[%s9359_s1 + $0x38] sm:$0xf0]  ;;  %v8250_v17 = vld [vmem:[%s9359_s1 + $0xd4] sm:$0xf]  ;;  %v5798_v19 = vor.u32 %v8230_v11, %v5797_v10 }
  0x5d   : > { %883 = vmatpush.bf16.msrb.mxu2 %v5902_v46  ;;  %896 = vmatpush.bf16.msrb.mxu3 %v5906_v50  ;;  %v5895_v18 = vld [vmem:[%s9359_s1 + $0xf0] sm:$0xf0]  ;;  %v6141_v20 = vld [vmem:[%s9375_s19 + $0x1c0] sm:$0xf]  ;;  %v5806_v24 = vor.u32 %v8231_v14, %v5805_v13  ;;  %v5810_v28 = vor.u32 %v8227_v15, %v5807_v16  ;;  %s5778_s21 = sshll.u32 %s10871_s25, 3  ;;  %s10859_s8 = sld [smem:[#allocation27_spill]] }
  0x5e   : > { %5910 = vmatmul.msk.bf16.vlgmr.msra.gmra.mxu3 %vm797_vm0, %v9434_v54  ;;  %859 = vmatpush.bf16.msra.mxu0 %v5830_v5  ;;  %v6653_v21 = vld [vmem:[%s9375_s19 + $0x5c0] sm:$0xf]  ;;  %v5898_v29 = vor.u32 %v8250_v17, %v5895_v18  ;;  %v8242_v31 = vld [vmem:[%s9359_s1 + $0x94] sm:$0xf]  ;;  %s10860_s9 = sld [smem:[#allocation25_spill]]  ;;  %s9180_s17 = smov 64  }
  0x5f   : > { %v8444_v22 = vld [vmem:[%s9375_s19 + $0x5dc] sm:$0xf0]  ;;  %v5863_v32 = vld [vmem:[%s9359_s1 + $0xb0] sm:$0xf0]  ;;  %vm5527_vm1 = vcmask 64512   ;;  %vm5548_vm2 = vcmask 589312  }
  0x60   : > { %819 = vmatpush.bf16.msrb.mxu1 %v5850_v58  ;;  %v8316_v25 = vld [vmem:[%s9375_s19 + $0x1dc] sm:$0xf0]  ;;  %v6654_v30 = vor.u32 %v8444_v22, %v6653_v21  ;;  %v5866_v41 = vor.u32 %v8242_v31, %v5863_v32  ;;  %v8234_v42 = vld [vmem:[%s9359_s1 + $0x54] sm:$0xf]  ;;  %vm5550_vm3 = vcmask 597568  }
  0x61   : > { %884 = vmatpush.bf16.msrb.mxu2 %v5870_v59  ;;  %897 = vmatpush.bf16.msrb.mxu3 %v5874_v63  ;;  %v6909_v26 = vld [vmem:[%s9375_s19 + $0x7c0] sm:$0xf]  ;;  %v6142_v33 = vor.u32 %v8316_v25, %v6141_v20  ;;  %v5831_v43 = vld [vmem:[%s9359_s1 + $0x70] sm:$0xf0] }
  0x62   : > { %v8508_v27 = vld [vmem:[%s9375_s19 + $0x7dc] sm:$0xf0]  ;;  %860 = vmatpush.bf16.msra.mxu0 %v5798_v19  ;;  %v5834_v53 = vor.u32 %v8234_v42, %v5831_v43  ;;  %v8226_v55 = vld [vmem:[%s9359_s1 + $0x14] sm:$0xf] }
  0x63   : > { %v6910_v34 = vor.u32 %v8508_v27, %v6909_v26  ;;  %v6109_v35 = vld [vmem:[%s9375_s19 + $0x180] sm:$0xf]  ;;  %v5799_v56 = vld [vmem:[%s9359_s1 + $0x30] sm:$0xf0]  ;;  %s10746_s1 = scalar_lea.vmem %s10859_s8, %s5778_s21 }
  0x64   : > { %820 = vmatpush.bf16.msrb.mxu1 %v5818_v7  ;;  %v8308_v36 = vld [vmem:[%s9375_s19 + $0x19c] sm:$0xf0]  ;;  %v5802_v4 = vor.u32 %v8226_v55, %v5799_v56 }
  0x65   : > { %885 = vmatpush.bf16.msrb.mxu2 %v5838_v8  ;;  %898 = vmatpush.bf16.msrb.mxu3 %v5842_v12  ;;  %v6621_v37 = vld [vmem:[%s9375_s19 + $0x580] sm:$0xf]  ;;  %v6110_v44 = vor.u32 %v8308_v36, %v6109_v35 }
  0x66   : > { %v8436_v38 = vld [vmem:[%s9375_s19 + $0x59c] sm:$0xf0]  ;;  %5911 = vmatmul.msk.bf16.vlgmr.msra.gmra.mxu0 %vm797_vm0, %v9434_v54 }
  0x67   : > { %v6877_v39 = vld [vmem:[%s9375_s19 + $0x780] sm:$0xf]  ;;  %4011 = vmatpush.bf16.msrb.mxu0 %v6142_v33  ;;  %v6622_v47 = vor.u32 %v8436_v38, %v6621_v37 }
  0x68   : > { %821 = vmatpush.bf16.msrb.mxu1 %v5786_v23  ;;  %v8500_v40 = vld [vmem:[%s9375_s19 + $0x79c] sm:$0xf0] }
  0x69   : > { %886 = vmatpush.bf16.msrb.mxu2 %v5806_v24  ;;  %899 = vmatpush.bf16.msrb.mxu3 %v5810_v28  ;;  %v6077_v45 = vld [vmem:[%s9375_s19 + $0x140] sm:$0xf]  ;;  %v6878_v48 = vor.u32 %v8500_v40, %v6877_v39 }
  0x6a   : > { %v8300_v46 = vld [vmem:[%s9375_s19 + $0x15c] sm:$0xf0] }
  0x6b   : > { %v6589_v49 = vld [vmem:[%s9375_s19 + $0x540] sm:$0xf]  ;;  %5908 = vmatmul.msk.bf16.vlgmr.msrb.gmra.mxu1 %vm797_vm0, %v9434_v54  ;;  %4012 = vmatpush.bf16.msrb.mxu0 %v6110_v44  ;;  %v6078_v57 = vor.u32 %v8300_v46, %v6077_v45 }
  0x6c   : > { %870 = vmatpush.bf16.msra.mxu1 %v5898_v29  ;;  %v8428_v50 = vld [vmem:[%s9375_s19 + $0x55c] sm:$0xf0]  ;;  %5913 = vmatmul.msk.bf16.vlgmr.msrb.gmra.mxu2 %vm797_vm0, %v9434_v54 }
  0x6d   : > { %4037 = vmatpush.bf16.msra.mxu2 %v6654_v30  ;;  %4050 = vmatpush.bf16.msra.mxu3 %v6910_v34  ;;  %v6845_v51 = vld [vmem:[%s9375_s19 + $0x740] sm:$0xf]  ;;  %v6590_v60 = vor.u32 %v8428_v50, %v6589_v49 }
  0x6e   : > { %v8492_v52 = vld [vmem:[%s9375_s19 + $0x75c] sm:$0xf0]  ;;  %5914 = vmatmul.msk.bf16.vlgmr.msrb.gmra.mxu3 %vm797_vm0, %v9434_v54 }
  0x6f   : > { %v6045_v58 = vld [vmem:[%s9375_s19 + $0x100] sm:$0xf]  ;;  %v6846_v61 = vor.u32 %v8492_v52, %v6845_v51  ;;  %4013 = vmatpush.bf16.msrb.mxu0 %v6078_v57 }
  0x70   : > { %871 = vmatpush.bf16.msra.mxu1 %v5866_v41  ;;  %v8292_v59 = vld [vmem:[%s9375_s19 + $0x11c] sm:$0xf0] }
  0x71   : > { %4038 = vmatpush.bf16.msra.mxu2 %v6622_v47  ;;  %4051 = vmatpush.bf16.msra.mxu3 %v6878_v48  ;;  %v6397_v62 = vld [vmem:[%s9375_s19 + $0x3c0] sm:$0xf]  ;;  %v6046_v5 = vor.u32 %v8292_v59, %v6045_v58 }
  0x72   : > { %v8380_v63 = vld [vmem:[%s9375_s19 + $0x3dc] sm:$0xf0] }
  0x73   : > { %v6557_v0 = vld [vmem:[%s9375_s19 + $0x500] sm:$0xf]  ;;  %v6398_v8 = vor.u32 %v8380_v63, %v6397_v62  ;;  %4014 = vmatpush.bf16.msrb.mxu0 %v6046_v5 }
  0x74   : > { %v8420_v1 = vld [vmem:[%s9375_s19 + $0x51c] sm:$0xf0]  ;;  %872 = vmatpush.bf16.msra.mxu1 %v5834_v53 }
  0x75   : > { %v6813_v2 = vld [vmem:[%s9375_s19 + $0x700] sm:$0xf]  ;;  %4039 = vmatpush.bf16.msra.mxu2 %v6590_v60  ;;  %4052 = vmatpush.bf16.msra.mxu3 %v6846_v61  ;;  %v6558_v9 = vor.u32 %v8420_v1, %v6557_v0 }
  0x76   : > { %v8484_v3 = vld [vmem:[%s9375_s19 + $0x71c] sm:$0xf0] }
  0x77   : > { %v6013_v6 = vld [vmem:[%s9375_s19 + $0xc0] sm:$0xf]  ;;  %v6814_v11 = vor.u32 %v8484_v3, %v6813_v2 }
  0x78   : > { %v8284_v7 = vld [vmem:[%s9375_s19 + $0xdc] sm:$0xf0]  ;;  %873 = vmatpush.bf16.msra.mxu1 %v5802_v4 }
  0x79   : > { %v6365_v10 = vld [vmem:[%s9375_s19 + $0x380] sm:$0xf]  ;;  %v6014_v17 = vor.u32 %v8284_v7, %v6013_v6  ;;  %4040 = vmatpush.bf16.msra.mxu2 %v6558_v9  ;;  %4053 = vmatpush.bf16.msra.mxu3 %v6814_v11 }
  0x7a   : > { %v8372_v12 = vld [vmem:[%s9375_s19 + $0x39c] sm:$0xf0] }
  0x7b   : > { %v6525_v13 = vld [vmem:[%s9375_s19 + $0x4c0] sm:$0xf]  ;;  %v6366_v20 = vor.u32 %v8372_v12, %v6365_v10  ;;  %4015 = vmatpush.bf16.msrb.mxu0 %v6014_v17  ;;  %5912 = vmatmul.msk.bf16.vlgmr.msra.gmra.mxu1 %vm797_vm0, %v9434_v54 }
  0x7c   : > { %v8412_v14 = vld [vmem:[%s9375_s19 + $0x4dc] sm:$0xf0]  ;;  %4024 = vmatpush.bf16.msrb.mxu1 %v6398_v8 }
  0x7d   : > { %v6781_v15 = vld [vmem:[%s9375_s19 + $0x6c0] sm:$0xf]  ;;  %v6526_v21 = vor.u32 %v8412_v14, %v6525_v13 }
  0x7e   : > { %v8476_v16 = vld [vmem:[%s9375_s19 + $0x6dc] sm:$0xf0] }
  0x7f   : > { %v5981_v18 = vld [vmem:[%s9375_s19 + $0x80] sm:$0xf]  ;;  %v6782_v23 = vor.u32 %v8476_v16, %v6781_v15  ;;  %4041 = vmatpush.bf16.msra.mxu2 %v6526_v21 }
  0x80   : > { %v8276_v19 = vld [vmem:[%s9375_s19 + $0x9c] sm:$0xf0]  ;;  %4025 = vmatpush.bf16.msrb.mxu1 %v6366_v20 }
  0x81   : > { %v6333_v22 = vld [vmem:[%s9375_s19 + $0x340] sm:$0xf]  ;;  %v5982_v29 = vor.u32 %v8276_v19, %v5981_v18  ;;  %4054 = vmatpush.bf16.msra.mxu3 %v6782_v23 }
  0x82   : > { %v8364_v24 = vld [vmem:[%s9375_s19 + $0x35c] sm:$0xf0] }
  0x83   : > { %v6493_v25 = vld [vmem:[%s9375_s19 + $0x480] sm:$0xf]  ;;  %v6334_v32 = vor.u32 %v8364_v24, %v6333_v22  ;;  %4016 = vmatpush.bf16.msrb.mxu0 %v5982_v29 }
  0x84   : > { %v8404_v26 = vld [vmem:[%s9375_s19 + $0x49c] sm:$0xf0] }
  0x85   : > { %v6749_v27 = vld [vmem:[%s9375_s19 + $0x680] sm:$0xf]  ;;  %v6494_v33 = vor.u32 %v8404_v26, %v6493_v25  ;;  %4026 = vmatpush.bf16.msrb.mxu1 %v6334_v32 }
  0x86   : > { %v8468_v28 = vld [vmem:[%s9375_s19 + $0x69c] sm:$0xf0] }
  0x87   : > { %v5949_v30 = vld [vmem:[%s9375_s19 + $0x40] sm:$0xf]  ;;  %v6750_v35 = vor.u32 %v8468_v28, %v6749_v27  ;;  %4042 = vmatpush.bf16.msra.mxu2 %v6494_v33 }
  0x88   : > { %v8268_v31 = vld [vmem:[%s9375_s19 + $0x5c] sm:$0xf0] }
  0x89   : > { %v6301_v34 = vld [vmem:[%s9375_s19 + $0x300] sm:$0xf]  ;;  %v5950_v42 = vor.u32 %v8268_v31, %v5949_v30  ;;  %4055 = vmatpush.bf16.msra.mxu3 %v6750_v35 }
  0x8a   : > { %v8356_v36 = vld [vmem:[%s9375_s19 + $0x31c] sm:$0xf0] }
  0x8b   : > { %v6461_v37 = vld [vmem:[%s9375_s19 + $0x440] sm:$0xf]  ;;  %v6302_v45 = vor.u32 %v8356_v36, %v6301_v34  ;;  %4017 = vmatpush.bf16.msrb.mxu0 %v5950_v42 }
  0x8c   : > { %v8396_v38 = vld [vmem:[%s9375_s19 + $0x45c] sm:$0xf0] }
  0x8d   : > { %v5917_v39 = vld [vmem:[%s9375_s19] sm:$0xf]  ;;  %v6462_v46 = vor.u32 %v8396_v38, %v6461_v37  ;;  %4027 = vmatpush.bf16.msrb.mxu1 %v6302_v45 }
  0x8e   : > { %v6717_v40 = vld [vmem:[%s9375_s19 + $0x640] sm:$0xf] }
  0x8f   : > { %v8460_v41 = vld [vmem:[%s9375_s19 + $0x65c] sm:$0xf0]  ;;  %4043 = vmatpush.bf16.msra.mxu2 %v6462_v46 }
  0x90   : > { %v8260_v43 = vld [vmem:[%s9375_s19 + $0x1c] sm:$0xf0]  ;;  %v6718_v50 = vor.u32 %v8460_v41, %v6717_v40 }
  0x91   : > { %v7165_v44 = vld [vmem:[%s9375_s19 + $0x9c0] sm:$0xf]  ;;  %v5918_v56 = vor.u32 %v8260_v43, %v5917_v39 }
  0x92   : > { %v8572_v54 = vld [vmem:[%s9375_s19 + $0x9dc] sm:$0xf0]  ;;  %4056 = vmatpush.bf16.msra.mxu3 %v6718_v50 }
  0x93   : > { %v6269_v47 = vld [vmem:[%s9375_s19 + $0x2c0] sm:$0xf]  ;;  %v7166_v60 = vor.u32 %v8572_v54, %v7165_v44  ;;  %4018 = vmatpush.bf16.msrb.mxu0 %v5918_v56 }
  0x94   : > { %v8348_v48 = vld [vmem:[%s9375_s19 + $0x2dc] sm:$0xf0] }
  0x95   : > { %v6429_v49 = vld [vmem:[%s9375_s19 + $0x400] sm:$0xf]  ;;  %v6270_v61 = vor.u32 %v8348_v48, %v6269_v47 }
  0x96   : > { %v8388_v51 = vld [vmem:[%s9375_s19 + $0x41c] sm:$0xf0] }
  0x97   : > { %v6685_v52 = vld [vmem:[%s9375_s19 + $0x600] sm:$0xf]  ;;  %v6430_v0 = vor.u32 %v8388_v51, %v6429_v49  ;;  %4063 = vmatpush.bf16.msra.mxu0 %v7166_v60  ;;  %4028 = vmatpush.bf16.msrb.mxu1 %v6270_v61 }
  0x98   : > { %v8452_v53 = vld [vmem:[%s9375_s19 + $0x61c] sm:$0xf0] }
  0x99   : > { %v7677_v55 = vld [vmem:[%s9375_s19 + $0xdc0] sm:$0xf]  ;;  %v6686_v1 = vor.u32 %v8452_v53, %v6685_v52  ;;  %4044 = vmatpush.bf16.msra.mxu2 %v6430_v0 }
  0x9a   : > { %v8700_v57 = vld [vmem:[%s9375_s19 + $0xddc] sm:$0xf0] }
  0x9b   : > { %v7933_v58 = vld [vmem:[%s9375_s19 + $0xfc0] sm:$0xf]  ;;  %v7678_v4 = vor.u32 %v8700_v57, %v7677_v55  ;;  %4057 = vmatpush.bf16.msra.mxu3 %v6686_v1 }
  0x9c   : > { %v8764_v59 = vld [vmem:[%s9375_s19 + $0xfdc] sm:$0xf0] }
  0x9d   : > { %v7133_v62 = vld [vmem:[%s9375_s19 + $0x980] sm:$0xf]  ;;  %v7934_v5 = vor.u32 %v8764_v59, %v7933_v58  ;;  %4089 = vmatpush.bf16.msrb.mxu2 %v7678_v4 }
  0x9e   : > { %v8564_v63 = vld [vmem:[%s9375_s19 + $0x99c] sm:$0xf0] }
  0x9f   : > { %v6237_v2 = vld [vmem:[%s9375_s19 + $0x280] sm:$0xf]  ;;  %v7134_v10 = vor.u32 %v8564_v63, %v7133_v62  ;;  %4102 = vmatpush.bf16.msrb.mxu3 %v7934_v5 }
  0xa0   : > { %v8340_v3 = vld [vmem:[%s9375_s19 + $0x29c] sm:$0xf0] }
  0xa1   : > { %v7645_v6 = vld [vmem:[%s9375_s19 + $0xd80] sm:$0xf]  ;;  %v6238_v11 = vor.u32 %v8340_v3, %v6237_v2  ;;  %4064 = vmatpush.bf16.msra.mxu0 %v7134_v10 }
  0xa2   : > { %v8692_v7 = vld [vmem:[%s9375_s19 + $0xd9c] sm:$0xf0] }
  0xa3   : > { %v7901_v8 = vld [vmem:[%s9375_s19 + $0xf80] sm:$0xf]  ;;  %v7646_v16 = vor.u32 %v8692_v7, %v7645_v6  ;;  %4029 = vmatpush.bf16.msrb.mxu1 %v6238_v11 }
  0xa4   : > { %v8756_v9 = vld [vmem:[%s9375_s19 + $0xf9c] sm:$0xf0] }
  0xa5   : > { %v7101_v12 = vld [vmem:[%s9375_s19 + $0x940] sm:$0xf]  ;;  %v7902_v17 = vor.u32 %v8756_v9, %v7901_v8  ;;  %4090 = vmatpush.bf16.msrb.mxu2 %v7646_v16 }
  0xa6   : > { %v8556_v13 = vld [vmem:[%s9375_s19 + $0x95c] sm:$0xf0] }
  0xa7   : > { %v6205_v14 = vld [vmem:[%s9375_s19 + $0x240] sm:$0xf]  ;;  %v7102_v22 = vor.u32 %v8556_v13, %v7101_v12  ;;  %4103 = vmatpush.bf16.msrb.mxu3 %v7902_v17 }
  0xa8   : > { %v8332_v15 = vld [vmem:[%s9375_s19 + $0x25c] sm:$0xf0] }
  0xa9   : > { %v7613_v18 = vld [vmem:[%s9375_s19 + $0xd40] sm:$0xf]  ;;  %v6206_v23 = vor.u32 %v8332_v15, %v6205_v14  ;;  %4065 = vmatpush.bf16.msra.mxu0 %v7102_v22 }
  0xaa   : > { %v8684_v19 = vld [vmem:[%s9375_s19 + $0xd5c] sm:$0xf0] }
  0xab   : > { %v7869_v20 = vld [vmem:[%s9375_s19 + $0xf40] sm:$0xf]  ;;  %v7614_v28 = vor.u32 %v8684_v19, %v7613_v18  ;;  %4030 = vmatpush.bf16.msrb.mxu1 %v6206_v23 }
  0xac   : > { %v8748_v21 = vld [vmem:[%s9375_s19 + $0xf5c] sm:$0xf0] }
  0xad   : > { %v7069_v24 = vld [vmem:[%s9375_s19 + $0x900] sm:$0xf]  ;;  %v7870_v29 = vor.u32 %v8748_v21, %v7869_v20  ;;  %4091 = vmatpush.bf16.msrb.mxu2 %v7614_v28 }
  0xae   : > { %v8548_v25 = vld [vmem:[%s9375_s19 + $0x91c] sm:$0xf0] }
  0xaf   : > { %v6173_v26 = vld [vmem:[%s9375_s19 + $0x200] sm:$0xf]  ;;  %v7070_v36 = vor.u32 %v8548_v25, %v7069_v24  ;;  %4104 = vmatpush.bf16.msrb.mxu3 %v7870_v29 }
  0xb0   : > { %v8324_v27 = vld [vmem:[%s9375_s19 + $0x21c] sm:$0xf0] }
  0xb1   : > { %v7421_v30 = vld [vmem:[%s9375_s19 + $0xbc0] sm:$0xf]  ;;  %v6174_v37 = vor.u32 %v8324_v27, %v6173_v26  ;;  %4066 = vmatpush.bf16.msra.mxu0 %v7070_v36 }
  0xb2   : > { %v8636_v31 = vld [vmem:[%s9375_s19 + $0xbdc] sm:$0xf0] }
  0xb3   : > { %v7581_v32 = vld [vmem:[%s9375_s19 + $0xd00] sm:$0xf]  ;;  %v7422_v40 = vor.u32 %v8636_v31, %v7421_v30  ;;  %4031 = vmatpush.bf16.msrb.mxu1 %v6174_v37 }
  0xb4   : > { %v8676_v33 = vld [vmem:[%s9375_s19 + $0xd1c] sm:$0xf0] }
  0xb5   : > { %v7837_v34 = vld [vmem:[%s9375_s19 + $0xf00] sm:$0xf]  ;;  %v7582_v41 = vor.u32 %v8676_v33, %v7581_v32 }
  0xb6   : > { %v8740_v35 = vld [vmem:[%s9375_s19 + $0xf1c] sm:$0xf0] }
  0xb7   : > { %v7037_v38 = vld [vmem:[%s9375_s19 + $0x8c0] sm:$0xf]  ;;  %v7838_v42 = vor.u32 %v8740_v35, %v7837_v34  ;;  %4076 = vmatpush.bf16.msra.mxu1 %v7422_v40  ;;  %4092 = vmatpush.bf16.msrb.mxu2 %v7582_v41  ;;  %v9607_v34 = vld [vmem:[%s9368_s12] sm:$0xff] }
  0xb8   : > { %v8540_v39 = vld [vmem:[%s9375_s19 + $0x8dc] sm:$0xf0]  ;;  %v621_v35 = vperm.slane %v9607_v34, 0  ;;  %v623_v41 = vperm.slane %v9607_v34, 2 }
  0xb9   : > { %v7389_v43 = vld [vmem:[%s9375_s19 + $0xb80] sm:$0xf]  ;;  %v7038_v54 = vor.u32 %v8540_v39, %v7037_v38  ;;  %4105 = vmatpush.bf16.msrb.mxu3 %v7838_v42  ;;  %v8312_v38 = vld [vmem:[%s9375_s19 + $0x1c4] sm:$0xf]  ;;  %v624_v42 = vperm.slane %v9607_v34, 3 }
  0xba   : > { %v8628_v44 = vld [vmem:[%s9375_s19 + $0xb9c] sm:$0xf0]  ;;  %v6143_v39 = vld [vmem:[%s9375_s19 + $0x1e0] sm:$0xf0] }
  0xbb   : > { %v7005_v45 = vld [vmem:[%s9375_s19 + $0x880] sm:$0xf]  ;;  %v7390_v47 = vor.u32 %v8628_v44, %v7389_v43  ;;  %4067 = vmatpush.bf16.msra.mxu0 %v7038_v54  ;;  %v6146_v43 = vor.u32 %v8312_v38, %v6143_v39  ;;  %v8304_v54 = vld [vmem:[%s9375_s19 + $0x184] sm:$0xf] }
  0xbc   : > { %v8532_v46 = vld [vmem:[%s9375_s19 + $0x89c] sm:$0xf0]  ;;  %v6815_v38 = vld [vmem:[%s9375_s19 + $0x720] sm:$0xf0] }
  0xbd   : > { %v7006_v48 = vor.u32 %v8532_v46, %v7005_v45  ;;  %4077 = vmatpush.bf16.msra.mxu1 %v7390_v47  ;;  %v7549_v49 = vld [vmem:[%s9375_s19 + $0xcc0] sm:$0xf]  ;;  %v6111_v45 = vld [vmem:[%s9375_s19 + $0x1a0] sm:$0xf0] }
  0xbe   : > { %v8668_v50 = vld [vmem:[%s9375_s19 + $0xcdc] sm:$0xf0] }
  0xbf   : > { %4068 = vmatpush.bf16.msra.mxu0 %v7006_v48  ;;  %v7805_v51 = vld [vmem:[%s9375_s19 + $0xec0] sm:$0xf]  ;;  %v7550_v52 = vor.u32 %v8668_v50, %v7549_v49  ;;  %v8440_v48 = vld [vmem:[%s9375_s19 + $0x5c4] sm:$0xf] }
  0xc0   : > { %v8732_v53 = vld [vmem:[%s9375_s19 + $0xedc] sm:$0xf0] }
  0xc1   : > { %v7806_v55 = vor.u32 %v8732_v53, %v7805_v51  ;;  %v6973_v56 = vld [vmem:[%s9375_s19 + $0x840] sm:$0xf]  ;;  %4093 = vmatpush.bf16.msrb.mxu2 %v7550_v52  ;;  %v6114_v52 = vor.u32 %v8304_v54, %v6111_v45  ;;  %v6655_v53 = vld [vmem:[%s9375_s19 + $0x5e0] sm:$0xf0] }
  0xc2   : > { %v8524_v57 = vld [vmem:[%s9375_s19 + $0x85c] sm:$0xf0]  ;;  %v5983_v54 = vld [vmem:[%s9375_s19 + $0xa0] sm:$0xf0] }
  0xc3   : > { %v7357_v58 = vld [vmem:[%s9375_s19 + $0xb40] sm:$0xf]  ;;  %v6974_v59 = vor.u32 %v8524_v57, %v6973_v56  ;;  %4106 = vmatpush.bf16.msrb.mxu3 %v7806_v55  ;;  %v8504_v55 = vld [vmem:[%s9375_s19 + $0x7c4] sm:$0xf] }
  0xc4   : > { %v8620_v60 = vld [vmem:[%s9375_s19 + $0xb5c] sm:$0xf0]  ;;  %v6911_v56 = vld [vmem:[%s9375_s19 + $0x7e0] sm:$0xf0] }
  0xc5   : > { %v7358_v61 = vor.u32 %v8620_v60, %v7357_v58  ;;  %v7517_v62 = vld [vmem:[%s9375_s19 + $0xc80] sm:$0xf]  ;;  %4069 = vmatpush.bf16.msra.mxu0 %v6974_v59  ;;  %v8296_v57 = vld [vmem:[%s9375_s19 + $0x144] sm:$0xf] }
  0xc6   : > { %v8660_v63 = vld [vmem:[%s9375_s19 + $0xc9c] sm:$0xf0]  ;;  %v6079_v58 = vld [vmem:[%s9375_s19 + $0x160] sm:$0xf0] }
  0xc7   : > { %v7773_v0 = vld [vmem:[%s9375_s19 + $0xe80] sm:$0xf]  ;;  %v7518_v1 = vor.u32 %v8660_v63, %v7517_v62  ;;  %4078 = vmatpush.bf16.msra.mxu1 %v7358_v61  ;;  %v625_v61 = vperm.slane %v9607_v34, 4  ;;  %v6658_v62 = vor.u32 %v8440_v48, %v6655_v53  ;;  %v6914_v63 = vor.u32 %v8504_v55, %v6911_v56  ;;  %v8368_v45 = vld [vmem:[%s9375_s19 + $0x384] sm:$0xf] }
  0xc8   : > { %v8724_v2 = vld [vmem:[%s9375_s19 + $0xe9c] sm:$0xf0]  ;;  %v6527_v56 = vld [vmem:[%s9375_s19 + $0x4e0] sm:$0xf0] }
  0xc9   : > { %v7774_v3 = vor.u32 %v8724_v2, %v7773_v0  ;;  %v6941_v4 = vld [vmem:[%s9375_s19 + $0x800] sm:$0xf]  ;;  %4094 = vmatpush.bf16.msrb.mxu2 %v7518_v1  ;;  %v8432_v0 = vld [vmem:[%s9375_s19 + $0x584] sm:$0xf] }
  0xca   : > { %v8516_v5 = vld [vmem:[%s9375_s19 + $0x81c] sm:$0xf0] }
  0xcb   : > { %v7325_v6 = vld [vmem:[%s9375_s19 + $0xb00] sm:$0xf]  ;;  %v6942_v7 = vor.u32 %v8516_v5, %v6941_v4  ;;  %4107 = vmatpush.bf16.msrb.mxu3 %v7774_v3  ;;  %v6082_v3 = vor.u32 %v8296_v57, %v6079_v58  ;;  %v6623_v4 = vld [vmem:[%s9375_s19 + $0x5a0] sm:$0xf0] }
  0xcc   : > { %v8612_v8 = vld [vmem:[%s9375_s19 + $0xb1c] sm:$0xf0]  ;;  %v8496_v5 = vld [vmem:[%s9375_s19 + $0x784] sm:$0xf] }
  0xcd   : > { %v7326_v9 = vor.u32 %v8612_v8, %v7325_v6  ;;  %v7485_v10 = vld [vmem:[%s9375_s19 + $0xc40] sm:$0xf]  ;;  %4070 = vmatpush.bf16.msra.mxu0 %v6942_v7  ;;  %v6879_v6 = vld [vmem:[%s9375_s19 + $0x7a0] sm:$0xf0]  ;;  %v622_v7 = vperm.slane %v9607_v34, 1 }
  0xce   : > { %v8652_v11 = vld [vmem:[%s9375_s19 + $0xc5c] sm:$0xf0]  ;;  %v8472_v57 = vld [vmem:[%s9375_s19 + $0x6c4] sm:$0xf] }
  0xcf   : > { %v7741_v12 = vld [vmem:[%s9375_s19 + $0xe40] sm:$0xf]  ;;  %4079 = vmatpush.bf16.msra.mxu1 %v7326_v9  ;;  %v7486_v14 = vor.u32 %v8652_v11, %v7485_v10  ;;  %v8288_v9 = vld [vmem:[%s9375_s19 + $0x104] sm:$0xf] }
  0xd0   : > { %v8716_v13 = vld [vmem:[%s9375_s19 + $0xe5c] sm:$0xf0]  ;;  %v6047_v10 = vld [vmem:[%s9375_s19 + $0x120] sm:$0xf0] }
  0xd1   : > { %v7742_v15 = vor.u32 %v8716_v13, %v7741_v12  ;;  %v7293_v16 = vld [vmem:[%s9375_s19 + $0xac0] sm:$0xf]  ;;  %4095 = vmatpush.bf16.msrb.mxu2 %v7486_v14  ;;  %v6626_v14 = vor.u32 %v8432_v0, %v6623_v4  ;;  %v6783_v58 = vld [vmem:[%s9375_s19 + $0x6e0] sm:$0xf0] }
  0xd2   : > { %v8604_v17 = vld [vmem:[%s9375_s19 + $0xadc] sm:$0xf0]  ;;  %v6335_v4 = vld [vmem:[%s9375_s19 + $0x360] sm:$0xf0] }
  0xd3   : > { %v7294_v18 = vor.u32 %v8604_v17, %v7293_v16  ;;  %4108 = vmatpush.bf16.msrb.mxu3 %v7742_v15  ;;  %v7453_v19 = vld [vmem:[%s9375_s19 + $0xc00] sm:$0xf]  ;;  %v6882_v15 = vor.u32 %v8496_v5, %v6879_v6  ;;  %v8424_v16 = vld [vmem:[%s9375_s19 + $0x544] sm:$0xf]  ;;  %v6786_v6 = vor.u32 %v8472_v57, %v6783_v58 }
  0xd4   : > { %v8644_v20 = vld [vmem:[%s9375_s19 + $0xc1c] sm:$0xf0]  ;;  %v6591_v17 = vld [vmem:[%s9375_s19 + $0x560] sm:$0xf0] }
  0xd5   : > { %v7709_v21 = vld [vmem:[%s9375_s19 + $0xe00] sm:$0xf]  ;;  %v7454_v22 = vor.u32 %v8644_v20, %v7453_v19  ;;  %4080 = vmatpush.bf16.msra.mxu1 %v7294_v18  ;;  %v6050_v20 = vor.u32 %v8288_v9, %v6047_v10  ;;  %v6495_v10 = vld [vmem:[%s9375_s19 + $0x4a0] sm:$0xf0] }
  0xd6   : > { %v8708_v23 = vld [vmem:[%s9375_s19 + $0xe1c] sm:$0xf0]  ;;  %v6239_v57 = vld [vmem:[%s9375_s19 + $0x2a0] sm:$0xf0] }
  0xd7   : > { %v7710_v24 = vor.u32 %v8708_v23, %v7709_v21  ;;  %v7261_v25 = vld [vmem:[%s9375_s19 + $0xa80] sm:$0xf]  ;;  %4096 = vmatpush.bf16.msrb.mxu2 %v7454_v22  ;;  %v8488_v21 = vld [vmem:[%s9375_s19 + $0x744] sm:$0xf] }
  0xd8   : > { %v8596_v26 = vld [vmem:[%s9375_s19 + $0xa9c] sm:$0xf0]  ;;  %v810_v36 = vpop.f32.mrf.mxu1  ;;  %v6847_v22 = vld [vmem:[%s9375_s19 + $0x760] sm:$0xf0] }
  0xd9   : > { %4109 = vmatpush.bf16.msrb.mxu3 %v7710_v24  ;;  %v7262_v27 = vor.u32 %v8596_v26, %v7261_v25  ;;  %v7229_v28 = vld [vmem:[%s9375_s19 + $0xa40] sm:$0xf]  ;;  %v811_v37 = vadd.f32 %v810_v36, %v621_v35  ;;  %v8280_v24 = vld [vmem:[%s9375_s19 + $0xc4] sm:$0xf]  ;;  %v6594_v25 = vor.u32 %v8424_v16, %v6591_v17 }
  0xda   : > { %v8588_v29 = vld [vmem:[%s9375_s19 + $0xa5c] sm:$0xf0]  ;;  %v6015_v26 = vld [vmem:[%s9375_s19 + $0xe0] sm:$0xf0] }
  0xdb   : > { %4081 = vmatpush.bf16.msra.mxu1 %v7262_v27  ;;  %v7230_v30 = vor.u32 %v8588_v29, %v7229_v28  ;;  %v7197_v31 = vld [vmem:[%s9375_s19 + $0xa00] sm:$0xf]  ;;  %v905_v40 = vmax.f32 %v811_v37, 0.0  ;;  %v8376_v27 = vld [vmem:[%s9375_s19 + $0x3c4] sm:$0xf] }
  0xdc   : > { %v8580_v32 = vld [vmem:[%s9375_s19 + $0xa1c] sm:$0xf0]  ;;  %v6399_v28 = vld [vmem:[%s9375_s19 + $0x3e0] sm:$0xf0] }
  0xdd   : > { %v7198_v33 = vor.u32 %v8580_v32, %v7197_v31  ;;  %v9614_v44 = vpack.c.bf16 %v905_v40, %v905_v40  ;;  %v627_v31 = vperm.slane %v9607_v34, 6  ;;  %v628_v32 = vperm.slane %v9607_v34, 7  ;;  %v6559_v36 = vld [vmem:[%s9375_s19 + $0x520] sm:$0xf0] }
  0xde   : > { %v8480_v37 = vld [vmem:[%s9375_s19 + $0x704] sm:$0xf]  ;;  %v6018_v40 = vor.u32 %v8280_v24, %v6015_v26 }
  0xdf   : > { %4082 = vmatpush.bf16.msra.mxu1 %v7230_v30  ;;  %v836_v46 = vpop.f32.mrf.mxu2  ;;  %4019 = vmatmul.bf16.vlgmr.msrb.gmra.mxu0 %v9614_v44  ;;  %v6850_v30 = vor.u32 %v8488_v21, %v6847_v22  ;;  %v8256_v16 = vld [vmem:[%s9375_s19 + $0x4] sm:$0xf] }
  0xe0   : > { %v837_v49 = vadd.f32 %v836_v46, %v623_v41  ;;  %4115 = vmatpush.bf16.msrb.mxu0 %v6146_v43  ;;  %v812_v51 = vpop.f32.mrf.mxu1  ;;  %v6402_v41 = vor.u32 %v8376_v27, %v6399_v28  ;;  %v6367_v46 = vld [vmem:[%s9375_s19 + $0x3a0] sm:$0xf0] }
  0xe1   : > { %v849_v47 = vpop.f32.mrf.mxu3  ;;  %v8408_v51 = vld [vmem:[%s9375_s19 + $0x4c4] sm:$0xf] }
  0xe2   : > { %v850_v50 = vadd.f32 %v849_v47, %v624_v42  ;;  %v907_v59 = vmax.f32 %v837_v49, 0.0  ;;  %v8272_v42 = vld [vmem:[%s9375_s19 + $0x84] sm:$0xf]  ;;  %v6530_v5 = vor.u32 %v8408_v51, %v6527_v56 }
  0xe3   : > { %4083 = vmatpush.bf16.msra.mxu1 %v7198_v33  ;;  %v862_v8 = vpop.f32.mrf.mxu0  ;;  %v8416_v33 = vld [vmem:[%s9375_s19 + $0x504] sm:$0xf] }
  0xe4   : > { %v908_v60 = vmax.f32 %v850_v50, 0.0  ;;  %v9627_v1 = vpack.c.bf16 %v907_v59, %v907_v59  ;;  %4116 = vmatpush.bf16.msrb.mxu0 %v6114_v52  ;;  %v863_v11 = vadd.f32 %v862_v8, %v625_v61  ;;  %v6562_v49 = vor.u32 %v8416_v33, %v6559_v36  ;;  %v8264_v61 = vld [vmem:[%s9375_s19 + $0x44] sm:$0xf] }
  0xe5   : > { %v6818_v50 = vor.u32 %v8480_v37, %v6815_v38  ;;  %v5986_v59 = vor.u32 %v8272_v42, %v5983_v54  ;;  %v5919_v17 = vld [vmem:[%s9375_s19 + $0x20] sm:$0xf0] }
  0xe6   : > { %v9629_v2 = vpack.c.bf16 %v908_v60, %v908_v60  ;;  %4045 = vmatmul.bf16.vlgmr.msra.gmra.mxu2 %v9627_v1  ;;  %v909_v19 = vmax.f32 %v863_v11, 0.0  ;;  %v6370_v60 = vor.u32 %v8368_v45, %v6367_v46  ;;  %v8464_v11 = vld [vmem:[%s9375_s19 + $0x684] sm:$0xf] }
  0xe7   : > { %4141 = vmatpush.bf16.msra.mxu2 %v6658_v62  ;;  %v838_v12 = vpop.f32.mrf.mxu2  ;;  %v5951_v62 = vld [vmem:[%s9375_s19 + $0x60] sm:$0xf0] }
  0xe8   : > { %4058 = vmatmul.bf16.vlgmr.msra.gmra.mxu3 %v9629_v2  ;;  %4117 = vmatpush.bf16.msrb.mxu0 %v6082_v3  ;;  %v823_v18 = vpop.f32.mrf.mxu1  ;;  %v9650_v35 = vpack.c.bf16 %v909_v19, %v909_v19  ;;  %v8360_v3 = vld [vmem:[%s9375_s19 + $0x344] sm:$0xf] }
  0xe9   : > { %4154 = vmatpush.bf16.msra.mxu3 %v6914_v63  ;;  %v851_v13 = vpop.f32.mrf.mxu3  ;;  %v824_v23 = vadd.f32 %v823_v18, %v622_v7  ;;  %v8400_v7 = vld [vmem:[%s9375_s19 + $0x484] sm:$0xf] }
  0xea   : > { %v6751_v12 = vld [vmem:[%s9375_s19 + $0x6a0] sm:$0xf0]  ;;  %v5954_v13 = vor.u32 %v8264_v61, %v5951_v62 }
  0xeb   : > { %v906_v29 = vmax.f32 %v824_v23, 0.0  ;;  %4142 = vmatpush.bf16.msra.mxu2 %v6626_v14  ;;  %v864_v43 = vpop.f32.mrf.mxu0  ;;  %v6338_v14 = vor.u32 %v8360_v3, %v6335_v4  ;;  %v8352_v18 = vld [vmem:[%s9375_s19 + $0x304] sm:$0xf]  ;;  %v6754_v21 = vor.u32 %v8464_v11, %v6751_v12 }
  0xec   : > { %4118 = vmatpush.bf16.msrb.mxu0 %v6050_v20  ;;  %v6303_v19 = vld [vmem:[%s9375_s19 + $0x320] sm:$0xf0]  ;;  %v6498_v20 = vor.u32 %v8400_v7, %v6495_v10 }
  0xed   : > { %4155 = vmatpush.bf16.msra.mxu3 %v6882_v15  ;;  %v9655_v39 = vpack.c.bf16 %v906_v29, %v906_v29  ;;  %v626_v15 = vperm.slane %v9607_v34, 5  ;;  %v8568_v22 = vld [vmem:[%s9375_s19 + $0x9c4] sm:$0xf] }
  0xee   : > { %v7167_v23 = vld [vmem:[%s9375_s19 + $0x9e0] sm:$0xf0] }
  0xef   : > { %4143 = vmatpush.bf16.msra.mxu2 %v6594_v25  ;;  %v888_v47 = vpop.f32.mrf.mxu2  ;;  %4032 = vmatmul.bf16.vlgmr.msrb.gmra.mxu1 %v9655_v39  ;;  %v8392_v34 = vld [vmem:[%s9375_s19 + $0x444] sm:$0xf]  ;;  %v7170_v36 = vor.u32 %v8568_v22, %v7167_v23 }
  0xf0   : > { %v889_v52 = vadd.f32 %v888_v47, %v627_v31  ;;  %4071 = vmatmul.bf16.vlgmr.msra.gmra.mxu0 %v9650_v35  ;;  %v825_v55 = vpop.f32.mrf.mxu1  ;;  %4128 = vmatpush.bf16.msrb.mxu1 %v6402_v41  ;;  %v6463_v27 = vld [vmem:[%s9375_s19 + $0x460] sm:$0xf0]  ;;  %v5922_v31 = vor.u32 %v8256_v16, %v5919_v17 }
  0xf1   : > { %4156 = vmatpush.bf16.msra.mxu3 %v6850_v30  ;;  %v901_v48 = vpop.f32.mrf.mxu3  ;;  %4119 = vmatpush.bf16.msrb.mxu0 %v6018_v40  ;;  %v8456_v28 = vld [vmem:[%s9375_s19 + $0x644] sm:$0xf]  ;;  %v6466_v42 = vor.u32 %v8392_v34, %v6463_v27 }
  0xf2   : > { %v902_v53 = vadd.f32 %v901_v48, %v628_v32  ;;  %v911_v63 = vmax.f32 %v889_v52, 0.0  ;;  %v6719_v29 = vld [vmem:[%s9375_s19 + $0x660] sm:$0xf0]  ;;  %v6306_v32 = vor.u32 %v8352_v18, %v6303_v19 }
  0xf3   : > { %4144 = vmatpush.bf16.msra.mxu2 %v6562_v49  ;;  %v8344_v33 = vld [vmem:[%s9375_s19 + $0x2c4] sm:$0xf]  ;;  %v6722_v43 = vor.u32 %v8456_v28, %v6719_v29 }
  0xf4   : > { %v912_v0 = vmax.f32 %v902_v53, 0.0  ;;  %v9672_v8 = vpack.c.bf16 %v911_v63, %v911_v63  ;;  %4129 = vmatpush.bf16.msrb.mxu1 %v6370_v60  ;;  %v6271_v37 = vld [vmem:[%s9375_s19 + $0x2e0] sm:$0xf0] }
  0xf5   : > { %4157 = vmatpush.bf16.msra.mxu3 %v6818_v50  ;;  %4120 = vmatpush.bf16.msrb.mxu0 %v5986_v59  ;;  %v8560_v38 = vld [vmem:[%s9375_s19 + $0x984] sm:$0xf]  ;;  %v6274_v50 = vor.u32 %v8344_v33, %v6271_v37 }
  0xf6   : > { %v9674_v9 = vpack.c.bf16 %v912_v0, %v912_v0  ;;  %4097 = vmatmul.bf16.vlgmr.msrb.gmra.mxu2 %v9672_v8  ;;  %v7135_v40 = vld [vmem:[%s9375_s19 + $0x9a0] sm:$0xf0] }
  0xf7   : > { %4145 = vmatpush.bf16.msra.mxu2 %v6530_v5  ;;  %v890_v24 = vpop.f32.mrf.mxu2  ;;  %v8384_v54 = vld [vmem:[%s9375_s19 + $0x404] sm:$0xf]  ;;  %v7138_v55 = vor.u32 %v8560_v38, %v7135_v40 }
  0xf8   : > { %4110 = vmatmul.bf16.vlgmr.msrb.gmra.mxu3 %v9674_v9  ;;  %v875_v26 = vpop.f32.mrf.mxu1  ;;  %4130 = vmatpush.bf16.msrb.mxu1 %v6338_v14  ;;  %v6431_v45 = vld [vmem:[%s9375_s19 + $0x420] sm:$0xf0] }
  0xf9   : > { %4158 = vmatpush.bf16.msra.mxu3 %v6786_v6  ;;  %v903_v25 = vpop.f32.mrf.mxu3  ;;  %4121 = vmatpush.bf16.msrb.mxu0 %v5954_v13  ;;  %v876_v30 = vadd.f32 %v875_v26, %v626_v15  ;;  %v8448_v46 = vld [vmem:[%s9375_s19 + $0x604] sm:$0xf]  ;;  %v6434_v58 = vor.u32 %v8384_v54, %v6431_v45 }
  0xfa   : > { %v6687_v47 = vld [vmem:[%s9375_s19 + $0x620] sm:$0xf0] }
  0xfb   : > { %v910_v41 = vmax.f32 %v876_v30, 0.0  ;;  %4146 = vmatpush.bf16.msra.mxu2 %v6498_v20  ;;  %v8696_v48 = vld [vmem:[%s9375_s19 + $0xdc4] sm:$0xf]  ;;  %v6690_v59 = vor.u32 %v8448_v46, %v6687_v47 }
  0xfc   : > { %4131 = vmatpush.bf16.msrb.mxu1 %v6306_v32  ;;  %v7679_v51 = vld [vmem:[%s9375_s19 + $0xde0] sm:$0xf0] }
  0xfd   : > { %4159 = vmatpush.bf16.msra.mxu3 %v6754_v21  ;;  %v9701_v49 = vpack.c.bf16 %v910_v41, %v910_v41  ;;  %4122 = vmatpush.bf16.msrb.mxu0 %v5922_v31  ;;  %v8760_v52 = vld [vmem:[%s9375_s19 + $0xfc4] sm:$0xf]  ;;  %v7682_v62 = vor.u32 %v8696_v48, %v7679_v51 }
  0xfe   : > { %v7935_v53 = vld [vmem:[%s9375_s19 + $0xfe0] sm:$0xf0] }
  0xff   : > { %v8336_v56 = vld [vmem:[%s9375_s19 + $0x284] sm:$0xf]  ;;  %4147 = vmatpush.bf16.msra.mxu2 %v6466_v42  ;;  %4084 = vmatmul.bf16.vlgmr.msra.gmra.mxu1 %v9701_v49  ;;  %v7938_v63 = vor.u32 %v8760_v52, %v7935_v53 }
 0x100   : > { %v8552_v60 = vld [vmem:[%s9375_s19 + $0x944] sm:$0xf]  ;;  %4123 = vmatmul.bf16.vlgmr.msrb.gmra.mxu0 %v9614_v44  ;;  %v877_v0 = vpop.f32.mrf.mxu1  ;;  %4132 = vmatpush.bf16.msrb.mxu1 %v6274_v50  ;;  %v6242_v4 = vor.u32 %v8336_v56, %v6239_v57 }
 0x101   : > { %4167 = vmatpush.bf16.msra.mxu0 %v7170_v36  ;;  %4160 = vmatpush.bf16.msra.mxu3 %v6722_v43  ;;  %v7103_v61 = vld [vmem:[%s9375_s19 + $0x960] sm:$0xf0] }
 0x102   : > { %v8688_v3 = vld [vmem:[%s9375_s19 + $0xd84] sm:$0xf]  ;;  %v7106_v10 = vor.u32 %v8552_v60, %v7103_v61 }
 0x103   : > { %v7647_v5 = vld [vmem:[%s9375_s19 + $0xda0] sm:$0xf0]  ;;  %4148 = vmatpush.bf16.msra.mxu2 %v6434_v58 }
 0x104   : > { %v8752_v6 = vld [vmem:[%s9375_s19 + $0xf84] sm:$0xf]  ;;  %v7650_v15 = vor.u32 %v8688_v3, %v7647_v5  ;;  %4133 = vmatpush.bf16.msrb.mxu1 %v6242_v4 }
 0x105   : > { %v7903_v7 = vld [vmem:[%s9375_s19 + $0xfa0] sm:$0xf0]  ;;  %4168 = vmatpush.bf16.msra.mxu0 %v7138_v55  ;;  %4161 = vmatpush.bf16.msra.mxu3 %v6690_v59 }
 0x106   : > { %v8328_v11 = vld [vmem:[%s9375_s19 + $0x244] sm:$0xf]  ;;  %v7906_v16 = vor.u32 %v8752_v6, %v7903_v7  ;;  %4149 = vmatmul.bf16.vlgmr.msra.gmra.mxu2 %v9627_v1 }
 0x107   : > { %v6207_v12 = vld [vmem:[%s9375_s19 + $0x260] sm:$0xf0]  ;;  %4193 = vmatpush.bf16.msrb.mxu2 %v7682_v62 }
 0x108   : > { %v8544_v13 = vld [vmem:[%s9375_s19 + $0x904] sm:$0xf]  ;;  %v6210_v18 = vor.u32 %v8328_v11, %v6207_v12  ;;  %4162 = vmatmul.bf16.vlgmr.msra.gmra.mxu3 %v9629_v2  ;;  %v6149_v12 = vld [vmem:[%s9375_s19 + $0x1c8] sm:$0xf] }
 0x109   : > { %v7071_v14 = vld [vmem:[%s9375_s19 + $0x920] sm:$0xf0]  ;;  %4206 = vmatpush.bf16.msrb.mxu3 %v7938_v63  ;;  %4169 = vmatpush.bf16.msra.mxu0 %v7106_v10 }
 0x10a   : > { %v8680_v17 = vld [vmem:[%s9375_s19 + $0xd44] sm:$0xf]  ;;  %v7074_v22 = vor.u32 %v8544_v13, %v7071_v14  ;;  %4134 = vmatpush.bf16.msrb.mxu1 %v6210_v18  ;;  %v8317_v13 = vld [vmem:[%s9375_s19 + $0x1e4] sm:$0xf0] }
 0x10b   : > { %v7615_v19 = vld [vmem:[%s9375_s19 + $0xd60] sm:$0xf0]  ;;  %4194 = vmatpush.bf16.msrb.mxu2 %v7650_v15 }
 0x10c   : > { %v8744_v20 = vld [vmem:[%s9375_s19 + $0xf44] sm:$0xf]  ;;  %v7618_v28 = vor.u32 %v8680_v17, %v7615_v19 }
 0x10d   : > { %v7871_v21 = vld [vmem:[%s9375_s19 + $0xf60] sm:$0xf0]  ;;  %4207 = vmatpush.bf16.msrb.mxu3 %v7906_v16  ;;  %4170 = vmatpush.bf16.msra.mxu0 %v7074_v22 }
 0x10e   : > { %v8320_v23 = vld [vmem:[%s9375_s19 + $0x204] sm:$0xf]  ;;  %v7874_v29 = vor.u32 %v8744_v20, %v7871_v21  ;;  %v6150_v20 = vor.u32 %v8317_v13, %v6149_v12  ;;  %v6021_v13 = vld [vmem:[%s9375_s19 + $0xc8] sm:$0xf] }
 0x10f   : > { %v6175_v34 = vld [vmem:[%s9375_s19 + $0x220] sm:$0xf0]  ;;  %4195 = vmatpush.bf16.msrb.mxu2 %v7618_v28 }
 0x110   : > { %v8536_v24 = vld [vmem:[%s9375_s19 + $0x8c4] sm:$0xf]  ;;  %v6178_v31 = vor.u32 %v8320_v23, %v6175_v34  ;;  %v6117_v23 = vld [vmem:[%s9375_s19 + $0x188] sm:$0xf] }
 0x111   : > { %v7039_v25 = vld [vmem:[%s9375_s19 + $0x8e0] sm:$0xf0]  ;;  %4208 = vmatpush.bf16.msrb.mxu3 %v7874_v29 }
 0x112   : > { %v8632_v26 = vld [vmem:[%s9375_s19 + $0xbc4] sm:$0xf]  ;;  %v7042_v37 = vor.u32 %v8536_v24, %v7039_v25  ;;  %4135 = vmatpush.bf16.msrb.mxu1 %v6178_v31  ;;  %v8309_v25 = vld [vmem:[%s9375_s19 + $0x1a4] sm:$0xf0] }
 0x113   : > { %v7423_v27 = vld [vmem:[%s9375_s19 + $0xbe0] sm:$0xf0] }
 0x114   : > { %v8672_v30 = vld [vmem:[%s9375_s19 + $0xd04] sm:$0xf]  ;;  %v7426_v38 = vor.u32 %v8632_v26, %v7423_v27  ;;  %4171 = vmatpush.bf16.msra.mxu0 %v7042_v37  ;;  %v6118_v37 = vor.u32 %v8309_v25, %v6117_v23  ;;  %v8373_v23 = vld [vmem:[%s9375_s19 + $0x3a4] sm:$0xf0] }
 0x115   : > { %v7583_v32 = vld [vmem:[%s9375_s19 + $0xd20] sm:$0xf0]  ;;  %4136 = vmatmul.bf16.vlgmr.msrb.gmra.mxu1 %v9655_v39  ;;  %v8277_v25 = vld [vmem:[%s9375_s19 + $0xa4] sm:$0xf0] }
 0x116   : > { %v8736_v33 = vld [vmem:[%s9375_s19 + $0xf04] sm:$0xf]  ;;  %v7586_v54 = vor.u32 %v8672_v30, %v7583_v32  ;;  %4180 = vmatpush.bf16.msra.mxu1 %v7426_v38  ;;  %v6661_v30 = vld [vmem:[%s9375_s19 + $0x5c8] sm:$0xf] }
 0x117   : > { %v7839_v36 = vld [vmem:[%s9375_s19 + $0xf20] sm:$0xf0]  ;;  %v8445_v32 = vld [vmem:[%s9375_s19 + $0x5e4] sm:$0xf0] }
 0x118   : > { %v8528_v40 = vld [vmem:[%s9375_s19 + $0x884] sm:$0xf]  ;;  %v7842_v45 = vor.u32 %v8736_v33, %v7839_v36  ;;  %4196 = vmatpush.bf16.msrb.mxu2 %v7586_v54  ;;  %v6917_v33 = vld [vmem:[%s9375_s19 + $0x7c8] sm:$0xf] }
 0x119   : > { %v7007_v41 = vld [vmem:[%s9375_s19 + $0x8a0] sm:$0xf0]  ;;  %v8509_v36 = vld [vmem:[%s9375_s19 + $0x7e4] sm:$0xf0] }
 0x11a   : > { %v8624_v42 = vld [vmem:[%s9375_s19 + $0xb84] sm:$0xf]  ;;  %v7010_v51 = vor.u32 %v8528_v40, %v7007_v41  ;;  %4209 = vmatpush.bf16.msrb.mxu3 %v7842_v45  ;;  %v6918_v54 = vor.u32 %v8509_v36, %v6917_v33  ;;  %v6085_v45 = vld [vmem:[%s9375_s19 + $0x148] sm:$0xf] }
 0x11b   : > { %v7391_v43 = vld [vmem:[%s9375_s19 + $0xba0] sm:$0xf0]  ;;  %v6341_v33 = vld [vmem:[%s9375_s19 + $0x348] sm:$0xf] }
 0x11c   : > { %v8664_v46 = vld [vmem:[%s9375_s19 + $0xcc4] sm:$0xf]  ;;  %v7394_v52 = vor.u32 %v8624_v42, %v7391_v43  ;;  %4172 = vmatpush.bf16.msra.mxu0 %v7010_v51  ;;  %v6662_v43 = vor.u32 %v8445_v32, %v6661_v30  ;;  %v6885_v51 = vld [vmem:[%s9375_s19 + $0x788] sm:$0xf] }
 0x11d   : > { %v7551_v47 = vld [vmem:[%s9375_s19 + $0xce0] sm:$0xf0]  ;;  %v6789_v30 = vld [vmem:[%s9375_s19 + $0x6c8] sm:$0xf] }
 0x11e   : > { %v8728_v48 = vld [vmem:[%s9375_s19 + $0xec4] sm:$0xf]  ;;  %v7554_v58 = vor.u32 %v8664_v46, %v7551_v47  ;;  %4181 = vmatpush.bf16.msra.mxu1 %v7394_v52  ;;  %v8301_v46 = vld [vmem:[%s9375_s19 + $0x164] sm:$0xf0] }
 0x11f   : > { %v7807_v50 = vld [vmem:[%s9375_s19 + $0xee0] sm:$0xf0]  ;;  %v6629_v47 = vld [vmem:[%s9375_s19 + $0x588] sm:$0xf] }
 0x120   : > { %v8520_v53 = vld [vmem:[%s9375_s19 + $0x844] sm:$0xf]  ;;  %v7810_v59 = vor.u32 %v8728_v48, %v7807_v50  ;;  %4197 = vmatpush.bf16.msrb.mxu2 %v7554_v58  ;;  %v8437_v50 = vld [vmem:[%s9375_s19 + $0x5a4] sm:$0xf0] }
 0x121   : > { %v6975_v55 = vld [vmem:[%s9375_s19 + $0x860] sm:$0xf0]  ;;  %v8501_v52 = vld [vmem:[%s9375_s19 + $0x7a4] sm:$0xf0] }
 0x122   : > { %v8616_v56 = vld [vmem:[%s9375_s19 + $0xb44] sm:$0xf]  ;;  %v6978_v0 = vor.u32 %v8520_v53, %v6975_v55  ;;  %4210 = vmatpush.bf16.msrb.mxu3 %v7810_v59  ;;  %v6886_v58 = vor.u32 %v8501_v52, %v6885_v51  ;;  %v6053_v59 = vld [vmem:[%s9375_s19 + $0x108] sm:$0xf] }
 0x123   : > { %v7359_v57 = vld [vmem:[%s9375_s19 + $0xb60] sm:$0xf0]  ;;  %v8365_v36 = vld [vmem:[%s9375_s19 + $0x364] sm:$0xf0] }
 0x124   : > { %v8656_v60 = vld [vmem:[%s9375_s19 + $0xc84] sm:$0xf]  ;;  %v7362_v3 = vor.u32 %v8616_v56, %v7359_v57  ;;  %4173 = vmatpush.bf16.msra.mxu0 %v6978_v0  ;;  %v6086_v56 = vor.u32 %v8301_v46, %v6085_v45  ;;  %v6630_v57 = vor.u32 %v8437_v50, %v6629_v47  ;;  %v6853_v0 = vld [vmem:[%s9375_s19 + $0x748] sm:$0xf] }
 0x125   : > { %v7519_v61 = vld [vmem:[%s9375_s19 + $0xca0] sm:$0xf0]  ;;  %v6757_v45 = vld [vmem:[%s9375_s19 + $0x688] sm:$0xf] }
 0x126   : > { %v8720_v62 = vld [vmem:[%s9375_s19 + $0xe84] sm:$0xf]  ;;  %v7522_v10 = vor.u32 %v8656_v60, %v7519_v61  ;;  %4182 = vmatpush.bf16.msra.mxu1 %v7362_v3  ;;  %v8293_v60 = vld [vmem:[%s9375_s19 + $0x124] sm:$0xf0] }
 0x127   : > { %v7775_v63 = vld [vmem:[%s9375_s19 + $0xea0] sm:$0xf0]  ;;  %v6597_v61 = vld [vmem:[%s9375_s19 + $0x548] sm:$0xf] }
 0x128   : > { %v8512_v4 = vld [vmem:[%s9375_s19 + $0x804] sm:$0xf]  ;;  %v7778_v11 = vor.u32 %v8720_v62, %v7775_v63  ;;  %4198 = vmatpush.bf16.msrb.mxu2 %v7522_v10  ;;  %v8429_v63 = vld [vmem:[%s9375_s19 + $0x564] sm:$0xf0] }
 0x129   : > { %v6943_v5 = vld [vmem:[%s9375_s19 + $0x820] sm:$0xf0]  ;;  %v8493_v3 = vld [vmem:[%s9375_s19 + $0x764] sm:$0xf0] }
 0x12a   : > { %v8608_v6 = vld [vmem:[%s9375_s19 + $0xb04] sm:$0xf]  ;;  %v6946_v18 = vor.u32 %v8512_v4, %v6943_v5  ;;  %4211 = vmatpush.bf16.msrb.mxu3 %v7778_v11  ;;  %v8381_v10 = vld [vmem:[%s9375_s19 + $0x3e4] sm:$0xf0]  ;;  %v6598_v11 = vor.u32 %v8429_v63, %v6597_v61  ;;  %v6854_v12 = vor.u32 %v8493_v3, %v6853_v0 }
 0x12b   : > { %v7327_v7 = vld [vmem:[%s9375_s19 + $0xb20] sm:$0xf0]  ;;  %v8469_v46 = vld [vmem:[%s9375_s19 + $0x6a4] sm:$0xf0] }
 0x12c   : > { %v8648_v14 = vld [vmem:[%s9375_s19 + $0xc44] sm:$0xf]  ;;  %v7330_v19 = vor.u32 %v8608_v6, %v7327_v7  ;;  %4174 = vmatpush.bf16.msra.mxu0 %v6946_v18  ;;  %v6054_v6 = vor.u32 %v8293_v60, %v6053_v59  ;;  %v6405_v7 = vld [vmem:[%s9375_s19 + $0x3c8] sm:$0xf] }
 0x12d   : > { %v7487_v15 = vld [vmem:[%s9375_s19 + $0xc60] sm:$0xf0]  ;;  %v6406_v18 = vor.u32 %v8381_v10, %v6405_v7  ;;  %v8357_v50 = vld [vmem:[%s9375_s19 + $0x324] sm:$0xf0] }
 0x12e   : > { %v8712_v16 = vld [vmem:[%s9375_s19 + $0xe44] sm:$0xf]  ;;  %v7490_v34 = vor.u32 %v8648_v14, %v7487_v15  ;;  %4183 = vmatpush.bf16.msra.mxu1 %v7330_v19  ;;  %v8285_v14 = vld [vmem:[%s9375_s19 + $0xe4] sm:$0xf0] }
 0x12f   : > { %v7743_v17 = vld [vmem:[%s9375_s19 + $0xe60] sm:$0xf0]  ;;  %4175 = vmatmul.bf16.vlgmr.msra.gmra.mxu0 %v9650_v35  ;;  %v6821_v19 = vld [vmem:[%s9375_s19 + $0x708] sm:$0xf] }
 0x130   : > { %v8600_v21 = vld [vmem:[%s9375_s19 + $0xac4] sm:$0xf]  ;;  %v7746_v24 = vor.u32 %v8712_v16, %v7743_v17  ;;  %4219 = vmatpush.bf16.msrb.mxu0 %v6150_v20  ;;  %4199 = vmatpush.bf16.msrb.mxu2 %v7490_v34  ;;  %v6565_v16 = vld [vmem:[%s9375_s19 + $0x508] sm:$0xf] }
 0x131   : > { %v7295_v22 = vld [vmem:[%s9375_s19 + $0xae0] sm:$0xf0]  ;;  %v8421_v17 = vld [vmem:[%s9375_s19 + $0x524] sm:$0xf0] }
 0x132   : > { %v8640_v26 = vld [vmem:[%s9375_s19 + $0xc04] sm:$0xf]  ;;  %v7298_v31 = vor.u32 %v8600_v21, %v7295_v22  ;;  %4212 = vmatpush.bf16.msrb.mxu3 %v7746_v24  ;;  %v8485_v20 = vld [vmem:[%s9375_s19 + $0x724] sm:$0xf0]  ;;  %v6022_v21 = vor.u32 %v8285_v14, %v6021_v13  ;;  %v6566_v34 = vor.u32 %v8421_v17, %v6565_v16 }
 0x133   : > { %v7455_v27 = vld [vmem:[%s9375_s19 + $0xc20] sm:$0xf0]  ;;  %v6373_v22 = vld [vmem:[%s9375_s19 + $0x388] sm:$0xf] }
 0x134   : > { %v8704_v28 = vld [vmem:[%s9375_s19 + $0xe04] sm:$0xf]  ;;  %v7458_v41 = vor.u32 %v8640_v26, %v7455_v27  ;;  %4184 = vmatpush.bf16.msra.mxu1 %v7298_v31  ;;  %4220 = vmatpush.bf16.msrb.mxu0 %v6118_v37  ;;  %v5989_v24 = vld [vmem:[%s9375_s19 + $0x88] sm:$0xf]  ;;  %v6822_v26 = vor.u32 %v8485_v20, %v6821_v19 }
 0x135   : > { %v7711_v29 = vld [vmem:[%s9375_s19 + $0xe20] sm:$0xf0]  ;;  %v6533_v27 = vld [vmem:[%s9375_s19 + $0x4c8] sm:$0xf]  ;;  %v5990_v32 = vor.u32 %v8277_v25, %v5989_v24 }
 0x136   : > { %v8592_v38 = vld [vmem:[%s9375_s19 + $0xa84] sm:$0xf]  ;;  %v7714_v42 = vor.u32 %v8704_v28, %v7711_v29  ;;  %4200 = vmatpush.bf16.msrb.mxu2 %v7458_v41  ;;  %v8413_v28 = vld [vmem:[%s9375_s19 + $0x4e4] sm:$0xf0]  ;;  %v6374_v29 = vor.u32 %v8373_v23, %v6373_v22 }
 0x137   : > { %v7263_v40 = vld [vmem:[%s9375_s19 + $0xaa0] sm:$0xf0]  ;;  %v8477_v31 = vld [vmem:[%s9375_s19 + $0x6e4] sm:$0xf0]  ;;  %v6534_v37 = vor.u32 %v8413_v28, %v6533_v27 }
 0x138   : > { %v7266_v48 = vor.u32 %v8592_v38, %v7263_v40  ;;  %v8584_v53 = vld [vmem:[%s9375_s19 + $0xa44] sm:$0xf]  ;;  %4213 = vmatpush.bf16.msrb.mxu3 %v7714_v42  ;;  %4221 = vmatpush.bf16.msrb.mxu0 %v6086_v56  ;;  %v5957_v38 = vld [vmem:[%s9375_s19 + $0x48] sm:$0xf]  ;;  %v6790_v41 = vor.u32 %v8477_v31, %v6789_v30  ;;  %v6758_v56 = vor.u32 %v8469_v46, %v6757_v45 }
 0x139   : > { %v7231_v55 = vld [vmem:[%s9375_s19 + $0xa60] sm:$0xf0]  ;;  %4201 = vmatmul.bf16.vlgmr.msrb.gmra.mxu2 %v9672_v8  ;;  %v8269_v40 = vld [vmem:[%s9375_s19 + $0x64] sm:$0xf0] }
 0x13a   : > { %4245 = vmatpush.bf16.msra.mxu2 %v6662_v43  ;;  %4185 = vmatpush.bf16.msra.mxu1 %v7266_v48  ;;  %v7234_v62 = vor.u32 %v8584_v53, %v7231_v55  ;;  %v8576_v4 = vld [vmem:[%s9375_s19 + $0xa04] sm:$0xf]  ;;  %v6501_v42 = vld [vmem:[%s9375_s19 + $0x488] sm:$0xf]  ;;  %v5958_v47 = vor.u32 %v8269_v40, %v5957_v38 }
 0x13b   : > { %4214 = vmatmul.bf16.vlgmr.msrb.gmra.mxu3 %v9674_v9  ;;  %v7199_v5 = vld [vmem:[%s9375_s19 + $0xa20] sm:$0xf0]  ;;  %v8405_v43 = vld [vmem:[%s9375_s19 + $0x4a4] sm:$0xf0] }
 0x13c   : > { %4258 = vmatpush.bf16.msra.mxu3 %v6918_v54  ;;  %v7202_v15 = vor.u32 %v8576_v4, %v7199_v5  ;;  %4222 = vmatpush.bf16.msrb.mxu0 %v6054_v6  ;;  %v6342_v54 = vor.u32 %v8365_v36, %v6341_v33  ;;  %v6309_v48 = vld [vmem:[%s9375_s19 + $0x308] sm:$0xf]  ;;  %v6502_v51 = vor.u32 %v8405_v43, %v6501_v42 }
 0x13d   : > { %v5925_v52 = vld [vmem:[%s9375_s19 + $0x8] sm:$0xf]  ;;  %v6310_v60 = vor.u32 %v8357_v50, %v6309_v48 }
 0x13e   : > { %4246 = vmatpush.bf16.msra.mxu2 %v6630_v57  ;;  %4186 = vmatpush.bf16.msra.mxu1 %v7234_v62  ;;  %v8261_v53 = vld [vmem:[%s9375_s19 + $0x24] sm:$0xf0] }
 0x13f   : > { %v7173_v55 = vld [vmem:[%s9375_s19 + $0x9c8] sm:$0xf]  ;;  %v5926_v63 = vor.u32 %v8261_v53, %v5925_v52 }
 0x140   : > { %4259 = vmatpush.bf16.msra.mxu3 %v6886_v58  ;;  %4223 = vmatpush.bf16.msrb.mxu0 %v6022_v21  ;;  %v8573_v57 = vld [vmem:[%s9375_s19 + $0x9e4] sm:$0xf0] }
 0x141   : > { %v6469_v58 = vld [vmem:[%s9375_s19 + $0x448] sm:$0xf]  ;;  %v7174_v4 = vor.u32 %v8573_v57, %v7173_v55 }
 0x142   : > { %4247 = vmatpush.bf16.msra.mxu2 %v6598_v11  ;;  %4187 = vmatpush.bf16.msra.mxu1 %v7202_v15  ;;  %v8397_v59 = vld [vmem:[%s9375_s19 + $0x464] sm:$0xf0] }
 0x143   : > { %v6725_v61 = vld [vmem:[%s9375_s19 + $0x648] sm:$0xf]  ;;  %v6470_v5 = vor.u32 %v8397_v59, %v6469_v58 }
 0x144   : > { %4260 = vmatpush.bf16.msra.mxu3 %v6854_v12  ;;  %4224 = vmatpush.bf16.msrb.mxu0 %v5990_v32  ;;  %v8461_v62 = vld [vmem:[%s9375_s19 + $0x664] sm:$0xf0] }
 0x145   : > { %4188 = vmatmul.bf16.vlgmr.msra.gmra.mxu1 %v9701_v49  ;;  %v6277_v0 = vld [vmem:[%s9375_s19 + $0x2c8] sm:$0xf]  ;;  %v6726_v11 = vor.u32 %v8461_v62, %v6725_v61 }
 0x146   : > { %4232 = vmatpush.bf16.msrb.mxu1 %v6406_v18  ;;  %4248 = vmatpush.bf16.msra.mxu2 %v6566_v34  ;;  %v8349_v3 = vld [vmem:[%s9375_s19 + $0x2e4] sm:$0xf0] }
 0x147   : > { %v7141_v6 = vld [vmem:[%s9375_s19 + $0x988] sm:$0xf]  ;;  %v6278_v15 = vor.u32 %v8349_v3, %v6277_v0 }
 0x148   : > { %4261 = vmatpush.bf16.msra.mxu3 %v6822_v26  ;;  %4225 = vmatpush.bf16.msrb.mxu0 %v5958_v47  ;;  %v8565_v7 = vld [vmem:[%s9375_s19 + $0x9a4] sm:$0xf0] }
 0x149   : > { %v6437_v10 = vld [vmem:[%s9375_s19 + $0x408] sm:$0xf]  ;;  %v7142_v22 = vor.u32 %v8565_v7, %v7141_v6 }
 0x14a   : > { %4233 = vmatpush.bf16.msrb.mxu1 %v6374_v29  ;;  %4249 = vmatpush.bf16.msra.mxu2 %v6534_v37  ;;  %v8389_v12 = vld [vmem:[%s9375_s19 + $0x424] sm:$0xf0] }
 0x14b   : > { %v6693_v13 = vld [vmem:[%s9375_s19 + $0x608] sm:$0xf]  ;;  %v6438_v23 = vor.u32 %v8389_v12, %v6437_v10 }
 0x14c   : > { %4262 = vmatpush.bf16.msra.mxu3 %v6790_v41  ;;  %v8453_v14 = vld [vmem:[%s9375_s19 + $0x624] sm:$0xf0]  ;;  %4226 = vmatpush.bf16.msrb.mxu0 %v5926_v63 }
 0x14d   : > { %v7685_v16 = vld [vmem:[%s9375_s19 + $0xdc8] sm:$0xf]  ;;  %v6694_v34 = vor.u32 %v8453_v14, %v6693_v13 }
 0x14e   : > { %4234 = vmatpush.bf16.msrb.mxu1 %v6342_v54  ;;  %4250 = vmatpush.bf16.msra.mxu2 %v6502_v51  ;;  %v8701_v17 = vld [vmem:[%s9375_s19 + $0xde4] sm:$0xf0] }
 0x14f   : > { %v7941_v18 = vld [vmem:[%s9375_s19 + $0xfc8] sm:$0xf]  ;;  %v7686_v24 = vor.u32 %v8701_v17, %v7685_v16  ;;  %4227 = vmatmul.bf16.vlgmr.msrb.gmra.mxu0 %v9614_v44 }
 0x150   : > { %4263 = vmatpush.bf16.msra.mxu3 %v6758_v56  ;;  %v8765_v19 = vld [vmem:[%s9375_s19 + $0xfe4] sm:$0xf0]  ;;  %4271 = vmatpush.bf16.msra.mxu0 %v7174_v4 }
 0x151   : > { %v6245_v20 = vld [vmem:[%s9375_s19 + $0x288] sm:$0xf]  ;;  %v7942_v27 = vor.u32 %v8765_v19, %v7941_v18 }
 0x152   : > { %4235 = vmatpush.bf16.msrb.mxu1 %v6310_v60  ;;  %v8341_v21 = vld [vmem:[%s9375_s19 + $0x2a4] sm:$0xf0]  ;;  %4251 = vmatpush.bf16.msra.mxu2 %v6470_v5 }
 0x153   : > { %v7109_v25 = vld [vmem:[%s9375_s19 + $0x948] sm:$0xf]  ;;  %v6246_v28 = vor.u32 %v8341_v21, %v6245_v20 }
 0x154   : > { %4264 = vmatpush.bf16.msra.mxu3 %v6726_v11  ;;  %v8557_v26 = vld [vmem:[%s9375_s19 + $0x964] sm:$0xf0]  ;;  %4272 = vmatpush.bf16.msra.mxu0 %v7142_v22 }
 0x155   : > { %v7653_v29 = vld [vmem:[%s9375_s19 + $0xd88] sm:$0xf]  ;;  %v7110_v37 = vor.u32 %v8557_v26, %v7109_v25 }
 0x156   : > { %4236 = vmatpush.bf16.msrb.mxu1 %v6278_v15  ;;  %v8693_v30 = vld [vmem:[%s9375_s19 + $0xda4] sm:$0xf0]  ;;  %4252 = vmatpush.bf16.msra.mxu2 %v6438_v23 }
 0x157   : > { %v7909_v31 = vld [vmem:[%s9375_s19 + $0xf88] sm:$0xf]  ;;  %v7654_v38 = vor.u32 %v8693_v30, %v7653_v29 }
 0x158   : > { %v8757_v32 = vld [vmem:[%s9375_s19 + $0xfa4] sm:$0xf0]  ;;  %4265 = vmatpush.bf16.msra.mxu3 %v6694_v34  ;;  %4273 = vmatpush.bf16.msra.mxu0 %v7110_v37 }
 0x159   : > { %v6213_v33 = vld [vmem:[%s9375_s19 + $0x248] sm:$0xf]  ;;  %v7910_v42 = vor.u32 %v8757_v32, %v7909_v31  ;;  %4253 = vmatmul.bf16.vlgmr.msra.gmra.mxu2 %v9627_v1 }
 0x15a   : > { %v8333_v36 = vld [vmem:[%s9375_s19 + $0x264] sm:$0xf0]  ;;  %4297 = vmatpush.bf16.msrb.mxu2 %v7686_v24  ;;  %4237 = vmatpush.bf16.msrb.mxu1 %v6246_v28 }
 0x15b   : > { %v7077_v40 = vld [vmem:[%s9375_s19 + $0x908] sm:$0xf]  ;;  %v6214_v43 = vor.u32 %v8333_v36, %v6213_v33  ;;  %4266 = vmatmul.bf16.vlgmr.msra.gmra.mxu3 %v9629_v2  ;;  %v8313_v36 = vld [vmem:[%s9375_s19 + $0x1cc] sm:$0xf] }
 0x15c   : > { %v8549_v41 = vld [vmem:[%s9375_s19 + $0x924] sm:$0xf0]  ;;  %4310 = vmatpush.bf16.msrb.mxu3 %v7942_v27 }
 0x15d   : > { %v7621_v54 = vld [vmem:[%s9375_s19 + $0xd48] sm:$0xf]  ;;  %v7078_v51 = vor.u32 %v8549_v41, %v7077_v40 }
 0x15e   : > { %v8685_v45 = vld [vmem:[%s9375_s19 + $0xd64] sm:$0xf0]  ;;  %4298 = vmatpush.bf16.msrb.mxu2 %v7654_v38  ;;  %4238 = vmatpush.bf16.msrb.mxu1 %v6214_v43  ;;  %v6151_v38 = vld [vmem:[%s9375_s19 + $0x1e8] sm:$0xf0] }
 0x15f   : > { %v7877_v46 = vld [vmem:[%s9375_s19 + $0xf48] sm:$0xf]  ;;  %v7622_v55 = vor.u32 %v8685_v45, %v7621_v54  ;;  %4274 = vmatpush.bf16.msra.mxu0 %v7078_v51  ;;  %v8305_v51 = vld [vmem:[%s9375_s19 + $0x18c] sm:$0xf] }
 0x160   : > { %v8749_v47 = vld [vmem:[%s9375_s19 + $0xf64] sm:$0xf0]  ;;  %4311 = vmatpush.bf16.msrb.mxu3 %v7910_v42 }
 0x161   : > { %v6181_v48 = vld [vmem:[%s9375_s19 + $0x208] sm:$0xf]  ;;  %v7878_v58 = vor.u32 %v8749_v47, %v7877_v46 }
 0x162   : > { %v8325_v50 = vld [vmem:[%s9375_s19 + $0x224] sm:$0xf0]  ;;  %4299 = vmatpush.bf16.msrb.mxu2 %v7622_v55 }
 0x163   : > { %v7429_v52 = vld [vmem:[%s9375_s19 + $0xbc8] sm:$0xf]  ;;  %v6182_v59 = vor.u32 %v8325_v50, %v6181_v48  ;;  %v6154_v48 = vor.u32 %v8313_v36, %v6151_v38  ;;  %v6407_v36 = vld [vmem:[%s9375_s19 + $0x3e8] sm:$0xf0] }
 0x164   : > { %v8637_v53 = vld [vmem:[%s9375_s19 + $0xbe4] sm:$0xf0]  ;;  %4312 = vmatpush.bf16.msrb.mxu3 %v7878_v58  ;;  %v8281_v38 = vld [vmem:[%s9375_s19 + $0xcc] sm:$0xf] }
 0x165   : > { %v7045_v56 = vld [vmem:[%s9375_s19 + $0x8c8] sm:$0xf]  ;;  %v7430_v62 = vor.u32 %v8637_v53, %v7429_v52  ;;  %4239 = vmatpush.bf16.msrb.mxu1 %v6182_v59  ;;  %v6119_v52 = vld [vmem:[%s9375_s19 + $0x1a8] sm:$0xf0] }
 0x166   : > { %v8541_v57 = vld [vmem:[%s9375_s19 + $0x8e4] sm:$0xf0] }
 0x167   : > { %v7589_v60 = vld [vmem:[%s9375_s19 + $0xd08] sm:$0xf]  ;;  %v7046_v3 = vor.u32 %v8541_v57, %v7045_v56 }
 0x168   : > { %v8677_v61 = vld [vmem:[%s9375_s19 + $0xd24] sm:$0xf0]  ;;  %4240 = vmatmul.bf16.vlgmr.msrb.gmra.mxu1 %v9655_v39 }
 0x169   : > { %v7845_v63 = vld [vmem:[%s9375_s19 + $0xf08] sm:$0xf]  ;;  %v7590_v6 = vor.u32 %v8677_v61, %v7589_v60  ;;  %4284 = vmatpush.bf16.msra.mxu1 %v7430_v62  ;;  %4275 = vmatpush.bf16.msra.mxu0 %v7046_v3  ;;  %v8441_v60 = vld [vmem:[%s9375_s19 + $0x5cc] sm:$0xf] }
 0x16a   : > { %v8741_v0 = vld [vmem:[%s9375_s19 + $0xf24] sm:$0xf0]  ;;  %v6663_v61 = vld [vmem:[%s9375_s19 + $0x5e8] sm:$0xf0] }
 0x16b   : > { %v7397_v4 = vld [vmem:[%s9375_s19 + $0xb88] sm:$0xf]  ;;  %v7846_v11 = vor.u32 %v8741_v0, %v7845_v63  ;;  %4300 = vmatpush.bf16.msrb.mxu2 %v7590_v6  ;;  %v8505_v62 = vld [vmem:[%s9375_s19 + $0x7cc] sm:$0xf] }
 0x16c   : > { %v8629_v5 = vld [vmem:[%s9375_s19 + $0xba4] sm:$0xf0]  ;;  %v6919_v63 = vld [vmem:[%s9375_s19 + $0x7e8] sm:$0xf0] }
 0x16d   : > { %v7013_v7 = vld [vmem:[%s9375_s19 + $0x888] sm:$0xf]  ;;  %v7398_v14 = vor.u32 %v8629_v5, %v7397_v4  ;;  %4313 = vmatpush.bf16.msrb.mxu3 %v7846_v11  ;;  %v6122_v4 = vor.u32 %v8305_v51, %v6119_v52  ;;  %v6087_v11 = vld [vmem:[%s9375_s19 + $0x168] sm:$0xf0] }
 0x16e   : > { %v8533_v10 = vld [vmem:[%s9375_s19 + $0x8a4] sm:$0xf0]  ;;  %v6375_v51 = vld [vmem:[%s9375_s19 + $0x3a8] sm:$0xf0] }
 0x16f   : > { %v7557_v12 = vld [vmem:[%s9375_s19 + $0xcc8] sm:$0xf]  ;;  %v7014_v17 = vor.u32 %v8533_v10, %v7013_v7  ;;  %4285 = vmatpush.bf16.msra.mxu1 %v7398_v14  ;;  %v6666_v7 = vor.u32 %v8441_v60, %v6663_v61  ;;  %v8297_v10 = vld [vmem:[%s9375_s19 + $0x14c] sm:$0xf] }
 0x170   : > { %v8669_v13 = vld [vmem:[%s9375_s19 + $0xce4] sm:$0xf0]  ;;  %v8433_v14 = vld [vmem:[%s9375_s19 + $0x58c] sm:$0xf] }
 0x171   : > { %v7813_v15 = vld [vmem:[%s9375_s19 + $0xec8] sm:$0xf]  ;;  %v7558_v20 = vor.u32 %v8669_v13, %v7557_v12  ;;  %4276 = vmatpush.bf16.msra.mxu0 %v7014_v17  ;;  %v6922_v12 = vor.u32 %v8505_v62, %v6919_v63  ;;  %v6887_v17 = vld [vmem:[%s9375_s19 + $0x7a8] sm:$0xf0] }
 0x172   : > { %v8733_v16 = vld [vmem:[%s9375_s19 + $0xee4] sm:$0xf0]  ;;  %v8473_v62 = vld [vmem:[%s9375_s19 + $0x6cc] sm:$0xf] }
 0x173   : > { %v7365_v18 = vld [vmem:[%s9375_s19 + $0xb48] sm:$0xf]  ;;  %v7814_v23 = vor.u32 %v8733_v16, %v7813_v15  ;;  %4301 = vmatpush.bf16.msrb.mxu2 %v7558_v20  ;;  %v6631_v15 = vld [vmem:[%s9375_s19 + $0x5a8] sm:$0xf0]  ;;  %v6090_v20 = vor.u32 %v8297_v10, %v6087_v11 }
 0x174   : > { %v8621_v19 = vld [vmem:[%s9375_s19 + $0xb64] sm:$0xf0]  ;;  %v8497_v16 = vld [vmem:[%s9375_s19 + $0x78c] sm:$0xf] }
 0x175   : > { %v6981_v21 = vld [vmem:[%s9375_s19 + $0x848] sm:$0xf]  ;;  %v7366_v25 = vor.u32 %v8621_v19, %v7365_v18  ;;  %4314 = vmatpush.bf16.msrb.mxu3 %v7814_v23  ;;  %v6055_v23 = vld [vmem:[%s9375_s19 + $0x128] sm:$0xf0] }
 0x176   : > { %v8525_v22 = vld [vmem:[%s9375_s19 + $0x864] sm:$0xf0]  ;;  %v6791_v63 = vld [vmem:[%s9375_s19 + $0x6e8] sm:$0xf0] }
 0x177   : > { %v7525_v34 = vld [vmem:[%s9375_s19 + $0xc88] sm:$0xf]  ;;  %v6982_v28 = vor.u32 %v8525_v22, %v6981_v21  ;;  %4286 = vmatpush.bf16.msra.mxu1 %v7366_v25  ;;  %v6634_v21 = vor.u32 %v8433_v14, %v6631_v15  ;;  %v8289_v22 = vld [vmem:[%s9375_s19 + $0x10c] sm:$0xf]  ;;  %v6794_v11 = vor.u32 %v8473_v62, %v6791_v63  ;;  %v4046_v14 = vpop.f32.mrf.mxu2  ;;  %v4059_v15 = vpop.f32.mrf.mxu3 }
 0x178   : > { %v8661_v24 = vld [vmem:[%s9375_s19 + $0xca4] sm:$0xf0]  ;;  %v7943_v62 = vld [vmem:[%s9375_s19 + $0xfe8] sm:$0xf0] }
 0x179   : > { %v7781_v26 = vld [vmem:[%s9375_s19 + $0xe88] sm:$0xf]  ;;  %v7526_v31 = vor.u32 %v8661_v24, %v7525_v34  ;;  %4277 = vmatpush.bf16.msra.mxu0 %v6982_v28  ;;  %v9924_v34 = vpop.f32.mrf.mxu0  ;;  %v6890_v24 = vor.u32 %v8497_v16, %v6887_v17  ;;  %v8489_v28 = vld [vmem:[%s9375_s19 + $0x74c] sm:$0xf] }
 0x17a   : > { %v8725_v27 = vld [vmem:[%s9375_s19 + $0xea4] sm:$0xf0]  ;;  %v8465_v17 = vld [vmem:[%s9375_s19 + $0x68c] sm:$0xf] }
 0x17b   : > { %v7333_v29 = vld [vmem:[%s9375_s19 + $0xb08] sm:$0xf]  ;;  %v7782_v37 = vor.u32 %v8725_v27, %v7781_v26  ;;  %4302 = vmatpush.bf16.msrb.mxu2 %v7526_v31  ;;  %v8425_v26 = vld [vmem:[%s9375_s19 + $0x54c] sm:$0xf] }
 0x17c   : > { %v8613_v30 = vld [vmem:[%s9375_s19 + $0xb24] sm:$0xf0]  ;;  %v6599_v27 = vld [vmem:[%s9375_s19 + $0x568] sm:$0xf0] }
 0x17d   : > { %v6949_v32 = vld [vmem:[%s9375_s19 + $0x808] sm:$0xf]  ;;  %v7334_v42 = vor.u32 %v8613_v30, %v7333_v29  ;;  %4315 = vmatpush.bf16.msrb.mxu3 %v7782_v37  ;;  %v6855_v29 = vld [vmem:[%s9375_s19 + $0x768] sm:$0xf0]  ;;  %v6602_v37 = vor.u32 %v8425_v26, %v6599_v27 }
 0x17e   : > { %v8517_v33 = vld [vmem:[%s9375_s19 + $0x824] sm:$0xf0]  ;;  %v8337_v63 = vld [vmem:[%s9375_s19 + $0x28c] sm:$0xf] }
 0x17f   : > { %v7493_v40 = vld [vmem:[%s9375_s19 + $0xc48] sm:$0xf]  ;;  %v6950_v45 = vor.u32 %v8517_v33, %v6949_v32  ;;  %4287 = vmatpush.bf16.msra.mxu1 %v7334_v42  ;;  %v6058_v32 = vor.u32 %v8289_v22, %v6055_v23  ;;  %v8377_v33 = vld [vmem:[%s9375_s19 + $0x3cc] sm:$0xf] }
 0x180   : > { %v8653_v41 = vld [vmem:[%s9375_s19 + $0xc64] sm:$0xf0]  ;;  %v8257_v23 = vld [vmem:[%s9375_s19 + $0xc] sm:$0xf] }
 0x181   : > { %v7749_v43 = vld [vmem:[%s9375_s19 + $0xe48] sm:$0xf]  ;;  %v7494_v50 = vor.u32 %v8653_v41, %v7493_v40  ;;  %4278 = vmatpush.bf16.msra.mxu0 %v6950_v45  ;;  %v6023_v40 = vld [vmem:[%s9375_s19 + $0xe8] sm:$0xf0]  ;;  %v6858_v41 = vor.u32 %v8489_v28, %v6855_v29  ;;  %v6410_v45 = vor.u32 %v8377_v33, %v6407_v36 }
 0x182   : > { %v8717_v54 = vld [vmem:[%s9375_s19 + $0xe64] sm:$0xf0]  ;;  %v7175_v28 = vld [vmem:[%s9375_s19 + $0x9e8] sm:$0xf0] }
 0x183   : > { %v7301_v46 = vld [vmem:[%s9375_s19 + $0xac8] sm:$0xf]  ;;  %v7750_v55 = vor.u32 %v8717_v54, %v7749_v43  ;;  %4303 = vmatpush.bf16.msrb.mxu2 %v7494_v50  ;;  %v8417_v43 = vld [vmem:[%s9375_s19 + $0x50c] sm:$0xf] }
 0x184   : > { %v8605_v47 = vld [vmem:[%s9375_s19 + $0xae4] sm:$0xf0]  ;;  %4279 = vmatmul.bf16.vlgmr.msra.gmra.mxu0 %v9650_v35  ;;  %v6567_v54 = vld [vmem:[%s9375_s19 + $0x528] sm:$0xf0] }
 0x185   : > { %v7461_v53 = vld [vmem:[%s9375_s19 + $0xc08] sm:$0xf]  ;;  %v7302_v59 = vor.u32 %v8605_v47, %v7301_v46  ;;  %4323 = vmatpush.bf16.msrb.mxu0 %v6154_v48  ;;  %4316 = vmatpush.bf16.msrb.mxu3 %v7750_v55  ;;  %v8481_v46 = vld [vmem:[%s9375_s19 + $0x70c] sm:$0xf]  ;;  %v6026_v48 = vor.u32 %v8281_v38, %v6023_v40  ;;  %v6570_v52 = vor.u32 %v8417_v43, %v6567_v54 }
 0x186   : > { %v8645_v56 = vld [vmem:[%s9375_s19 + $0xc24] sm:$0xf0]  ;;  %v6823_v47 = vld [vmem:[%s9375_s19 + $0x728] sm:$0xf0] }
 0x187   : > { %v7717_v57 = vld [vmem:[%s9375_s19 + $0xe08] sm:$0xf]  ;;  %v7462_v5 = vor.u32 %v8645_v56, %v7461_v53  ;;  %4288 = vmatpush.bf16.msra.mxu1 %v7302_v59  ;;  %v8369_v50 = vld [vmem:[%s9375_s19 + $0x38c] sm:$0xf]  ;;  %v4022_v56 = vpop.f32.mrf.mxu0 }
 0x188   : > { %v8709_v58 = vld [vmem:[%s9375_s19 + $0xe24] sm:$0xf0]  ;;  %v8273_v53 = vld [vmem:[%s9375_s19 + $0x8c] sm:$0xf]  ;;  %v6378_v61 = vor.u32 %v8369_v50, %v6375_v51 }
 0x189   : > { %v7269_v0 = vld [vmem:[%s9375_s19 + $0xa88] sm:$0xf]  ;;  %v7718_v6 = vor.u32 %v8709_v58, %v7717_v57  ;;  %4324 = vmatpush.bf16.msrb.mxu0 %v6122_v4  ;;  %4304 = vmatpush.bf16.msrb.mxu2 %v7462_v5  ;;  %v5991_v55 = vld [vmem:[%s9375_s19 + $0xa8] sm:$0xf0]  ;;  %v6826_v57 = vor.u32 %v8481_v46, %v6823_v47 }
 0x18a   : > { %v8597_v3 = vld [vmem:[%s9375_s19 + $0xaa4] sm:$0xf0]  ;;  %v8409_v58 = vld [vmem:[%s9375_s19 + $0x4cc] sm:$0xf] }
 0x18b   : > { %v7270_v13 = vor.u32 %v8597_v3, %v7269_v0  ;;  %v7237_v18 = vld [vmem:[%s9375_s19 + $0xa48] sm:$0xf]  ;;  %4317 = vmatpush.bf16.msrb.mxu3 %v7718_v6  ;;  %v6535_v59 = vld [vmem:[%s9375_s19 + $0x4e8] sm:$0xf0]  ;;  %v5994_v0 = vor.u32 %v8273_v53, %v5991_v55  ;;  %v4048_v53 = vpop.f32.mrf.mxu2  ;;  %v4061_v55 = vpop.f32.mrf.mxu3 }
 0x18c   : > { %v8589_v19 = vld [vmem:[%s9375_s19 + $0xa64] sm:$0xf0]  ;;  %4305 = vmatmul.bf16.vlgmr.msrb.gmra.mxu2 %v9672_v8  ;;  %v8361_v3 = vld [vmem:[%s9375_s19 + $0x34c] sm:$0xf]  ;;  %v6538_v5 = vor.u32 %v8409_v58, %v6535_v59 }
 0x18d   : > { %4349 = vmatpush.bf16.msra.mxu2 %v6666_v7  ;;  %4289 = vmatpush.bf16.msra.mxu1 %v7270_v13  ;;  %v7238_v25 = vor.u32 %v8589_v19, %v7237_v18  ;;  %v7205_v30 = vld [vmem:[%s9375_s19 + $0xa08] sm:$0xf]  ;;  %v6343_v4 = vld [vmem:[%s9375_s19 + $0x368] sm:$0xf0] }
 0x18e   : > { %v8581_v31 = vld [vmem:[%s9375_s19 + $0xa24] sm:$0xf0]  ;;  %4318 = vmatmul.bf16.vlgmr.msrb.gmra.mxu3 %v9674_v9  ;;  %4325 = vmatpush.bf16.msrb.mxu0 %v6090_v20  ;;  %v8265_v6 = vld [vmem:[%s9375_s19 + $0x4c] sm:$0xf]  ;;  %v6346_v16 = vor.u32 %v8361_v3, %v6343_v4 }
 0x18f   : > { %4362 = vmatpush.bf16.msra.mxu3 %v6922_v12  ;;  %v7206_v42 = vor.u32 %v8581_v31, %v7205_v30  ;;  %v9949_v60 = vld [vmem:[%s9377_s26] sm:$0xff]  ;;  %v4033_v31 = vpop.f32.mrf.mxu1 }
 0x190   : > { %v5959_v7 = vld [vmem:[%s9375_s19 + $0x68] sm:$0xf0]  ;;  %v1435_v10 = vperm.slane %v9949_v60, 0 }
 0x191   : > { %4350 = vmatpush.bf16.msra.mxu2 %v6634_v21  ;;  %4290 = vmatpush.bf16.msra.mxu1 %v7238_v25  ;;  %v8401_v12 = vld [vmem:[%s9375_s19 + $0x48c] sm:$0xf]  ;;  %v5962_v19 = vor.u32 %v8265_v6, %v5959_v7 }
 0x192   : > { %4326 = vmatpush.bf16.msrb.mxu0 %v6058_v32  ;;  %v6503_v13 = vld [vmem:[%s9375_s19 + $0x4a8] sm:$0xf0]  ;;  %v4021_v26 = vadd.f32 %v9924_v34, %v1435_v10  ;;  %v4072_v32 = vpop.f32.mrf.mxu0 }
 0x193   : > { %4363 = vmatpush.bf16.msra.mxu3 %v6890_v24  ;;  %v6759_v18 = vld [vmem:[%s9375_s19 + $0x6a8] sm:$0xf0]  ;;  %v6506_v22 = vor.u32 %v8401_v12, %v6503_v13 }
 0x194   : > { %v8353_v20 = vld [vmem:[%s9375_s19 + $0x30c] sm:$0xf]  ;;  %v6762_v27 = vor.u32 %v8465_v17, %v6759_v18  ;;  %v4034_v34 = vadd.f32 %v4033_v31, %v4021_v26  ;;  %v4098_v26 = vpop.f32.mrf.mxu2 }
 0x195   : > { %4351 = vmatpush.bf16.msra.mxu2 %v6602_v37  ;;  %4291 = vmatpush.bf16.msra.mxu1 %v7206_v42  ;;  %v6311_v21 = vld [vmem:[%s9375_s19 + $0x328] sm:$0xf0] }
 0x196   : > { %4327 = vmatpush.bf16.msrb.mxu0 %v6026_v48  ;;  %v5927_v24 = vld [vmem:[%s9375_s19 + $0x28] sm:$0xf0]  ;;  %v6314_v33 = vor.u32 %v8353_v20, %v6311_v21  ;;  %v4047_v47 = vadd.f32 %v4046_v14, %v4034_v34 }
 0x197   : > { %4364 = vmatpush.bf16.msra.mxu3 %v6858_v41  ;;  %v8569_v25 = vld [vmem:[%s9375_s19 + $0x9cc] sm:$0xf]  ;;  %v5930_v38 = vor.u32 %v8257_v23, %v5927_v24  ;;  %v4035_v12 = vpop.f32.mrf.mxu1 }
 0x198   : > { %4292 = vmatmul.bf16.vlgmr.msra.gmra.mxu1 %v9701_v49  ;;  %v8393_v29 = vld [vmem:[%s9375_s19 + $0x44c] sm:$0xf]  ;;  %v7178_v42 = vor.u32 %v8569_v25, %v7175_v28 }
 0x199   : > { %4336 = vmatpush.bf16.msrb.mxu1 %v6410_v45  ;;  %4352 = vmatpush.bf16.msra.mxu2 %v6570_v52  ;;  %v6471_v30 = vld [vmem:[%s9375_s19 + $0x468] sm:$0xf0] }
 0x19a   : > { %4328 = vmatpush.bf16.msrb.mxu0 %v5994_v0  ;;  %v8457_v36 = vld [vmem:[%s9375_s19 + $0x64c] sm:$0xf]  ;;  %v6474_v43 = vor.u32 %v8393_v29, %v6471_v30  ;;  %v4074_v13 = vpop.f32.mrf.mxu0 }
 0x19b   : > { %4365 = vmatpush.bf16.msra.mxu3 %v6826_v57  ;;  %v6727_v37 = vld [vmem:[%s9375_s19 + $0x668] sm:$0xf0] }
 0x19c   : > { %v8345_v40 = vld [vmem:[%s9375_s19 + $0x2cc] sm:$0xf]  ;;  %v6730_v48 = vor.u32 %v8457_v36, %v6727_v37 }
 0x19d   : > { %4337 = vmatpush.bf16.msrb.mxu1 %v6378_v61  ;;  %4353 = vmatpush.bf16.msra.mxu2 %v6538_v5  ;;  %v6279_v41 = vld [vmem:[%s9375_s19 + $0x2e8] sm:$0xf0]  ;;  %v4060_v61 = vadd.f32 %v4059_v15, %v4047_v47 }
 0x19e   : > { %4329 = vmatpush.bf16.msrb.mxu0 %v5962_v19  ;;  %v8561_v54 = vld [vmem:[%s9375_s19 + $0x98c] sm:$0xf]  ;;  %v6282_v56 = vor.u32 %v8345_v40, %v6279_v41 }
 0x19f   : > { %4366 = vmatpush.bf16.msra.mxu3 %v6794_v11  ;;  %v7143_v45 = vld [vmem:[%s9375_s19 + $0x9a8] sm:$0xf0]  ;;  %v4073_v5 = vadd.f32 %v4072_v32, %v4060_v61 }
 0x1a0   : > { %v8385_v46 = vld [vmem:[%s9375_s19 + $0x40c] sm:$0xf]  ;;  %v7146_v3 = vor.u32 %v8561_v54, %v7143_v45  ;;  %v4085_v54 = vpop.f32.mrf.mxu1 }
 0x1a1   : > { %4338 = vmatpush.bf16.msrb.mxu1 %v6346_v16  ;;  %4354 = vmatpush.bf16.msra.mxu2 %v6506_v22  ;;  %v6439_v50 = vld [vmem:[%s9375_s19 + $0x428] sm:$0xf0] }
 0x1a2   : > { %v8449_v51 = vld [vmem:[%s9375_s19 + $0x60c] sm:$0xf]  ;;  %4330 = vmatpush.bf16.msrb.mxu0 %v5930_v38  ;;  %v6442_v4 = vor.u32 %v8385_v46, %v6439_v50  ;;  %v10011_v45 = vpop.f32.mrf.mxu0 }
 0x1a3   : > { %4367 = vmatpush.bf16.msra.mxu3 %v6762_v27  ;;  %v6695_v52 = vld [vmem:[%s9375_s19 + $0x628] sm:$0xf0]  ;;  %v4111_v27 = vpop.f32.mrf.mxu3 }
 0x1a4   : > { %v8697_v57 = vld [vmem:[%s9375_s19 + $0xdcc] sm:$0xf]  ;;  %v6698_v6 = vor.u32 %v8449_v51, %v6695_v52  ;;  %v4086_v51 = vadd.f32 %v4085_v54, %v4073_v5 }
 0x1a5   : > { %4339 = vmatpush.bf16.msrb.mxu1 %v6314_v33  ;;  %v7687_v58 = vld [vmem:[%s9375_s19 + $0xde8] sm:$0xf0]  ;;  %4355 = vmatpush.bf16.msra.mxu2 %v6474_v43 }
 0x1a6   : > { %v8761_v59 = vld [vmem:[%s9375_s19 + $0xfcc] sm:$0xf]  ;;  %4375 = vmatpush.bf16.msra.mxu0 %v7178_v42  ;;  %v7690_v7 = vor.u32 %v8697_v57, %v7687_v58 }
 0x1a7   : > { %v6247_v0 = vld [vmem:[%s9375_s19 + $0x2a8] sm:$0xf0]  ;;  %4368 = vmatpush.bf16.msra.mxu3 %v6730_v48  ;;  %4331 = vmatmul.bf16.vlgmr.msrb.gmra.mxu0 %v9614_v44  ;;  %v7946_v14 = vor.u32 %v8761_v59, %v7943_v62  ;;  %v4099_v59 = vadd.f32 %v4098_v26, %v4086_v51 }
 0x1a8   : > { %v8553_v10 = vld [vmem:[%s9375_s19 + $0x94c] sm:$0xf]  ;;  %v6250_v15 = vor.u32 %v8337_v63, %v6247_v0  ;;  %v4100_v0 = vpop.f32.mrf.mxu2 }
 0x1a9   : > { %v7111_v11 = vld [vmem:[%s9375_s19 + $0x968] sm:$0xf0]  ;;  %4340 = vmatpush.bf16.msrb.mxu1 %v6282_v56  ;;  %4356 = vmatpush.bf16.msra.mxu2 %v6442_v4 }
 0x1aa   : > { %v8689_v16 = vld [vmem:[%s9375_s19 + $0xd8c] sm:$0xf]  ;;  %4376 = vmatpush.bf16.msra.mxu0 %v7146_v3  ;;  %v7114_v22 = vor.u32 %v8553_v10, %v7111_v11 }
 0x1ab   : > { %v7655_v17 = vld [vmem:[%s9375_s19 + $0xda8] sm:$0xf0]  ;;  %4369 = vmatpush.bf16.msra.mxu3 %v6698_v6  ;;  %v4113_v3 = vpop.f32.mrf.mxu3 }
 0x1ac   : > { %v8753_v18 = vld [vmem:[%s9375_s19 + $0xf8c] sm:$0xf]  ;;  %v7658_v23 = vor.u32 %v8689_v16, %v7655_v17  ;;  %4357 = vmatmul.bf16.vlgmr.msra.gmra.mxu2 %v9627_v1  ;;  %v6669_v3 = vld [vmem:[%s9375_s19 + $0x5d0] sm:$0xf] }
 0x1ad   : > { %v7911_v19 = vld [vmem:[%s9375_s19 + $0xfa8] sm:$0xf0]  ;;  %4401 = vmatpush.bf16.msrb.mxu2 %v7690_v7  ;;  %4341 = vmatpush.bf16.msrb.mxu1 %v6250_v15  ;;  %v10023_v7 = vadd.f32 %v4111_v27, %v4099_v59  ;;  %v1436_v27 = vperm.slane %v9949_v60, 1 }
 0x1ae   : > { %v8329_v20 = vld [vmem:[%s9375_s19 + $0x24c] sm:$0xf]  ;;  %v7914_v28 = vor.u32 %v8753_v18, %v7911_v19  ;;  %4370 = vmatmul.bf16.vlgmr.msra.gmra.mxu3 %v9629_v2  ;;  %4377 = vmatpush.bf16.msra.mxu0 %v7114_v22  ;;  %v4087_v19 = vpop.f32.mrf.mxu1 }
 0x1af   : > { %v6215_v21 = vld [vmem:[%s9375_s19 + $0x268] sm:$0xf0]  ;;  %4414 = vmatpush.bf16.msrb.mxu3 %v7946_v14  ;;  %v8302_v19 = vld [vmem:[%s9375_s19 + $0x16c] sm:$0xf0] }
 0x1b0   : > { %v8545_v24 = vld [vmem:[%s9375_s19 + $0x90c] sm:$0xf]  ;;  %v6218_v29 = vor.u32 %v8329_v20, %v6215_v21  ;;  %v4126_v20 = vpop.f32.mrf.mxu0 }
 0x1b1   : > { %v7079_v25 = vld [vmem:[%s9375_s19 + $0x928] sm:$0xf0]  ;;  %4402 = vmatpush.bf16.msrb.mxu2 %v7658_v23 }
 0x1b2   : > { %v8681_v30 = vld [vmem:[%s9375_s19 + $0xd4c] sm:$0xf]  ;;  %v7082_v34 = vor.u32 %v8545_v24, %v7079_v25  ;;  %4342 = vmatpush.bf16.msrb.mxu1 %v6218_v29 }
 0x1b3   : > { %v7623_v31 = vld [vmem:[%s9375_s19 + $0xd68] sm:$0xf0]  ;;  %4415 = vmatpush.bf16.msrb.mxu3 %v7914_v28 }
 0x1b4   : > { %v8745_v32 = vld [vmem:[%s9375_s19 + $0xf4c] sm:$0xf]  ;;  %v7626_v41 = vor.u32 %v8681_v30, %v7623_v31  ;;  %4378 = vmatpush.bf16.msra.mxu0 %v7082_v34 }
 0x1b5   : > { %v7879_v33 = vld [vmem:[%s9375_s19 + $0xf68] sm:$0xf0] }
 0x1b6   : > { %v8321_v36 = vld [vmem:[%s9375_s19 + $0x20c] sm:$0xf]  ;;  %v7882_v46 = vor.u32 %v8745_v32, %v7879_v33  ;;  %4403 = vmatpush.bf16.msrb.mxu2 %v7626_v41 }
 0x1b7   : > { %v6183_v37 = vld [vmem:[%s9375_s19 + $0x228] sm:$0xf0] }
 0x1b8   : > { %v8633_v38 = vld [vmem:[%s9375_s19 + $0xbcc] sm:$0xf]  ;;  %v6186_v47 = vor.u32 %v8321_v36, %v6183_v37  ;;  %4416 = vmatpush.bf16.msrb.mxu3 %v7882_v46  ;;  %v6157_v36 = vld [vmem:[%s9375_s19 + $0x1d0] sm:$0xf]  ;;  %v4150_v37 = vpop.f32.mrf.mxu2 }
 0x1b9   : > { %v7431_v40 = vld [vmem:[%s9375_s19 + $0xbe8] sm:$0xf0] }
 0x1ba   : > { %v8537_v42 = vld [vmem:[%s9375_s19 + $0x8cc] sm:$0xf]  ;;  %v7434_v52 = vor.u32 %v8633_v38, %v7431_v40  ;;  %4343 = vmatpush.bf16.msrb.mxu1 %v6186_v47  ;;  %v8318_v38 = vld [vmem:[%s9375_s19 + $0x1ec] sm:$0xf0] }
 0x1bb   : > { %v7047_v43 = vld [vmem:[%s9375_s19 + $0x8e8] sm:$0xf0]  ;;  %v6158_v51 = vor.u32 %v8318_v38, %v6157_v36  ;;  %v6605_v38 = vld [vmem:[%s9375_s19 + $0x550] sm:$0xf] }
 0x1bc   : > { %v8673_v48 = vld [vmem:[%s9375_s19 + $0xd0c] sm:$0xf]  ;;  %v7050_v56 = vor.u32 %v8537_v42, %v7047_v43  ;;  %v4163_v42 = vpop.f32.mrf.mxu3 }
 0x1bd   : > { %v7591_v50 = vld [vmem:[%s9375_s19 + $0xd28] sm:$0xf0]  ;;  %4344 = vmatmul.bf16.vlgmr.msrb.gmra.mxu1 %v9655_v39 }
 0x1be   : > { %v8737_v53 = vld [vmem:[%s9375_s19 + $0xf0c] sm:$0xf]  ;;  %v7594_v61 = vor.u32 %v8673_v48, %v7591_v50  ;;  %4388 = vmatpush.bf16.msra.mxu1 %v7434_v52  ;;  %4379 = vmatpush.bf16.msra.mxu0 %v7050_v56 }
 0x1bf   : > { %v7847_v55 = vld [vmem:[%s9375_s19 + $0xf28] sm:$0xf0] }
 0x1c0   : > { %v8625_v57 = vld [vmem:[%s9375_s19 + $0xb8c] sm:$0xf]  ;;  %v7850_v4 = vor.u32 %v8737_v53, %v7847_v55  ;;  %4404 = vmatpush.bf16.msrb.mxu2 %v7594_v61  ;;  %v6125_v53 = vld [vmem:[%s9375_s19 + $0x190] sm:$0xf] }
 0x1c1   : > { %v7399_v58 = vld [vmem:[%s9375_s19 + $0xba8] sm:$0xf0]  ;;  %v8310_v55 = vld [vmem:[%s9375_s19 + $0x1ac] sm:$0xf0] }
 0x1c2   : > { %v8529_v62 = vld [vmem:[%s9375_s19 + $0x88c] sm:$0xf]  ;;  %v7402_v10 = vor.u32 %v8625_v57, %v7399_v58  ;;  %4417 = vmatpush.bf16.msrb.mxu3 %v7850_v4  ;;  %v4125_v57 = vadd.f32 %v10011_v45, %v1436_v27  ;;  %v8446_v4 = vld [vmem:[%s9375_s19 + $0x5ec] sm:$0xf0]  ;;  %v6126_v45 = vor.u32 %v8310_v55, %v6125_v53  ;;  %v4176_v53 = vpop.f32.mrf.mxu0 }
 0x1c3   : > { %v7015_v63 = vld [vmem:[%s9375_s19 + $0x8a8] sm:$0xf0] }
 0x1c4   : > { %v8665_v5 = vld [vmem:[%s9375_s19 + $0xccc] sm:$0xf]  ;;  %v7018_v13 = vor.u32 %v8529_v62, %v7015_v63  ;;  %4389 = vmatpush.bf16.msra.mxu1 %v7402_v10  ;;  %v4137_v63 = vpop.f32.mrf.mxu1  ;;  %v8510_v10 = vld [vmem:[%s9375_s19 + $0x7ec] sm:$0xf0]  ;;  %v4165_v20 = vpop.f32.mrf.mxu3 }
 0x1c5   : > { %v7559_v6 = vld [vmem:[%s9375_s19 + $0xce8] sm:$0xf0]  ;;  %v5965_v20 = vld [vmem:[%s9375_s19 + $0x50] sm:$0xf] }
 0x1c6   : > { %v8729_v11 = vld [vmem:[%s9375_s19 + $0xecc] sm:$0xf]  ;;  %v7562_v16 = vor.u32 %v8665_v5, %v7559_v6  ;;  %4380 = vmatpush.bf16.msra.mxu0 %v7018_v13  ;;  %v6925_v5 = vld [vmem:[%s9375_s19 + $0x7d0] sm:$0xf]  ;;  %v4138_v6 = vadd.f32 %v4137_v63, %v4125_v57 }
 0x1c7   : > { %v7815_v12 = vld [vmem:[%s9375_s19 + $0xee8] sm:$0xf0]  ;;  %v6573_v57 = vld [vmem:[%s9375_s19 + $0x510] sm:$0xf] }
 0x1c8   : > { %v8617_v14 = vld [vmem:[%s9375_s19 + $0xb4c] sm:$0xf]  ;;  %v7818_v21 = vor.u32 %v8729_v11, %v7815_v12  ;;  %4405 = vmatpush.bf16.msrb.mxu2 %v7562_v16  ;;  %v8486_v63 = vld [vmem:[%s9375_s19 + $0x72c] sm:$0xf0] }
 0x1c9   : > { %v7367_v15 = vld [vmem:[%s9375_s19 + $0xb68] sm:$0xf0] }
 0x1ca   : > { %v8521_v17 = vld [vmem:[%s9375_s19 + $0x84c] sm:$0xf]  ;;  %v7370_v24 = vor.u32 %v8617_v14, %v7367_v15  ;;  %4418 = vmatpush.bf16.msrb.mxu3 %v7818_v21  ;;  %v4151_v14 = vadd.f32 %v4150_v37, %v4138_v6  ;;  %v4152_v15 = vpop.f32.mrf.mxu2  ;;  %v6926_v21 = vor.u32 %v8510_v10, %v6925_v5  ;;  %v5997_v6 = vld [vmem:[%s9375_s19 + $0x90] sm:$0xf] }
 0x1cb   : > { %v6983_v18 = vld [vmem:[%s9375_s19 + $0x868] sm:$0xf0]  ;;  %v8278_v10 = vld [vmem:[%s9375_s19 + $0xac] sm:$0xf0] }
 0x1cc   : > { %v8657_v22 = vld [vmem:[%s9375_s19 + $0xc8c] sm:$0xf]  ;;  %v6986_v28 = vor.u32 %v8521_v17, %v6983_v18  ;;  %4390 = vmatpush.bf16.msra.mxu1 %v7370_v24  ;;  %v6670_v17 = vor.u32 %v8446_v4, %v6669_v3  ;;  %v6093_v18 = vld [vmem:[%s9375_s19 + $0x150] sm:$0xf]  ;;  %v4164_v27 = vadd.f32 %v4163_v42, %v4151_v14  ;;  %v4139_v36 = vpop.f32.mrf.mxu1 }
 0x1cd   : > { %v7527_v23 = vld [vmem:[%s9375_s19 + $0xca8] sm:$0xf0]  ;;  %v8438_v24 = vld [vmem:[%s9375_s19 + $0x5ac] sm:$0xf0] }
 0x1ce   : > { %v8721_v25 = vld [vmem:[%s9375_s19 + $0xe8c] sm:$0xf]  ;;  %v7530_v31 = vor.u32 %v8657_v22, %v7527_v23  ;;  %4381 = vmatpush.bf16.msra.mxu0 %v6986_v28  ;;  %v6637_v23 = vld [vmem:[%s9375_s19 + $0x590] sm:$0xf] }
 0x1cf   : > { %v7783_v26 = vld [vmem:[%s9375_s19 + $0xea8] sm:$0xf0]  ;;  %v8494_v42 = vld [vmem:[%s9375_s19 + $0x76c] sm:$0xf0] }
 0x1d0   : > { %v8609_v29 = vld [vmem:[%s9375_s19 + $0xb0c] sm:$0xf]  ;;  %v7786_v34 = vor.u32 %v8721_v25, %v7783_v26  ;;  %4406 = vmatpush.bf16.msrb.mxu2 %v7530_v31  ;;  %v6893_v25 = vld [vmem:[%s9375_s19 + $0x790] sm:$0xf]  ;;  %v6638_v31 = vor.u32 %v8438_v24, %v6637_v23 }
 0x1d1   : > { %v7335_v30 = vld [vmem:[%s9375_s19 + $0xb28] sm:$0xf0]  ;;  %v8502_v26 = vld [vmem:[%s9375_s19 + $0x7ac] sm:$0xf0] }
 0x1d2   : > { %v8513_v32 = vld [vmem:[%s9375_s19 + $0x80c] sm:$0xf]  ;;  %v7338_v43 = vor.u32 %v8609_v29, %v7335_v30  ;;  %4419 = vmatpush.bf16.msrb.mxu3 %v7786_v34  ;;  %v6094_v30 = vor.u32 %v8302_v19, %v6093_v18  ;;  %v6894_v37 = vor.u32 %v8502_v26, %v6893_v25  ;;  %v6381_v3 = vld [vmem:[%s9375_s19 + $0x390] sm:$0xf] }
 0x1d3   : > { %v6951_v33 = vld [vmem:[%s9375_s19 + $0x828] sm:$0xf0]  ;;  %v8374_v4 = vld [vmem:[%s9375_s19 + $0x3ac] sm:$0xf0] }
 0x1d4   : > { %v8649_v40 = vld [vmem:[%s9375_s19 + $0xc4c] sm:$0xf]  ;;  %v6954_v47 = vor.u32 %v8513_v32, %v6951_v33  ;;  %4391 = vmatpush.bf16.msra.mxu1 %v7338_v43  ;;  %v6061_v32 = vld [vmem:[%s9375_s19 + $0x110] sm:$0xf] }
 0x1d5   : > { %v7495_v41 = vld [vmem:[%s9375_s19 + $0xc68] sm:$0xf0]  ;;  %v8294_v33 = vld [vmem:[%s9375_s19 + $0x12c] sm:$0xf0] }
 0x1d6   : > { %v8713_v54 = vld [vmem:[%s9375_s19 + $0xe4c] sm:$0xf]  ;;  %v7498_v52 = vor.u32 %v8649_v40, %v7495_v41  ;;  %4382 = vmatpush.bf16.msra.mxu0 %v6954_v47  ;;  %v8430_v40 = vld [vmem:[%s9375_s19 + $0x56c] sm:$0xf0] }
 0x1d7   : > { %v7751_v46 = vld [vmem:[%s9375_s19 + $0xe68] sm:$0xf0]  ;;  %v6861_v41 = vld [vmem:[%s9375_s19 + $0x750] sm:$0xf] }
 0x1d8   : > { %v8601_v48 = vld [vmem:[%s9375_s19 + $0xacc] sm:$0xf]  ;;  %v7754_v58 = vor.u32 %v8713_v54, %v7751_v46  ;;  %4407 = vmatpush.bf16.msrb.mxu2 %v7498_v52  ;;  %v6062_v46 = vor.u32 %v8294_v33, %v6061_v32  ;;  %v6413_v47 = vld [vmem:[%s9375_s19 + $0x3d0] sm:$0xf]  ;;  %v6862_v55 = vor.u32 %v8494_v42, %v6861_v41 }
 0x1d9   : > { %v7303_v50 = vld [vmem:[%s9375_s19 + $0xae8] sm:$0xf0]  ;;  %4383 = vmatmul.bf16.vlgmr.msra.gmra.mxu0 %v9650_v35  ;;  %v8286_v52 = vld [vmem:[%s9375_s19 + $0xec] sm:$0xf0] }
 0x1da   : > { %v8641_v56 = vld [vmem:[%s9375_s19 + $0xc0c] sm:$0xf]  ;;  %v7306_v0 = vor.u32 %v8601_v48, %v7303_v50  ;;  %4427 = vmatpush.bf16.msrb.mxu0 %v6158_v51  ;;  %4420 = vmatpush.bf16.msrb.mxu3 %v7754_v58  ;;  %v8382_v48 = vld [vmem:[%s9375_s19 + $0x3ec] sm:$0xf0]  ;;  %v6606_v50 = vor.u32 %v8430_v40, %v6605_v38  ;;  %v4215_v38 = vpop.f32.mrf.mxu3 }
 0x1db   : > { %v7463_v59 = vld [vmem:[%s9375_s19 + $0xc28] sm:$0xf0]  ;;  %v6029_v51 = vld [vmem:[%s9375_s19 + $0xd0] sm:$0xf] }
 0x1dc   : > { %v8705_v61 = vld [vmem:[%s9375_s19 + $0xe0c] sm:$0xf]  ;;  %v7466_v13 = vor.u32 %v8641_v56, %v7463_v59  ;;  %4392 = vmatpush.bf16.msra.mxu1 %v7306_v0  ;;  %v8422_v58 = vld [vmem:[%s9375_s19 + $0x52c] sm:$0xf0]  ;;  %v10087_v59 = vadd.f32 %v4176_v53, %v4164_v27  ;;  %v6030_v0 = vor.u32 %v8286_v52, %v6029_v51 }
 0x1dd   : > { %v7719_v62 = vld [vmem:[%s9375_s19 + $0xe28] sm:$0xf0]  ;;  %v6574_v5 = vor.u32 %v8422_v58, %v6573_v57  ;;  %v6797_v14 = vld [vmem:[%s9375_s19 + $0x6d0] sm:$0xf]  ;;  %v4189_v58 = vpop.f32.mrf.mxu1 }
 0x1de   : > { %v8593_v11 = vld [vmem:[%s9375_s19 + $0xa8c] sm:$0xf]  ;;  %v7722_v16 = vor.u32 %v8705_v61, %v7719_v62  ;;  %4428 = vmatpush.bf16.msrb.mxu0 %v6126_v45  ;;  %4408 = vmatpush.bf16.msrb.mxu2 %v7466_v13  ;;  %v6414_v61 = vor.u32 %v8382_v48, %v6413_v47  ;;  %v6829_v62 = vld [vmem:[%s9375_s19 + $0x710] sm:$0xf]  ;;  %v6382_v13 = vor.u32 %v8374_v4, %v6381_v3 }
 0x1df   : > { %v7271_v12 = vld [vmem:[%s9375_s19 + $0xaa8] sm:$0xf0]  ;;  %v8414_v45 = vld [vmem:[%s9375_s19 + $0x4ec] sm:$0xf0]  ;;  %v4190_v3 = vadd.f32 %v4189_v58, %v10087_v59 }
 0x1e0   : > { %v7274_v22 = vor.u32 %v8593_v11, %v7271_v12  ;;  %v8585_v28 = vld [vmem:[%s9375_s19 + $0xa4c] sm:$0xf]  ;;  %4421 = vmatpush.bf16.msrb.mxu3 %v7722_v16  ;;  %v6830_v11 = vor.u32 %v8486_v63, %v6829_v62  ;;  %v6541_v12 = vld [vmem:[%s9375_s19 + $0x4d0] sm:$0xf]  ;;  %v5998_v16 = vor.u32 %v8278_v10, %v5997_v6 }
 0x1e1   : > { %v7239_v29 = vld [vmem:[%s9375_s19 + $0xa68] sm:$0xf0]  ;;  %4409 = vmatmul.bf16.vlgmr.msrb.gmra.mxu2 %v9672_v8  ;;  %v8478_v15 = vld [vmem:[%s9375_s19 + $0x6ec] sm:$0xf0]  ;;  %v6542_v19 = vor.u32 %v8414_v45, %v6541_v12 }
 0x1e2   : > { %4453 = vmatpush.bf16.msra.mxu2 %v6670_v17  ;;  %4393 = vmatpush.bf16.msra.mxu1 %v7274_v22  ;;  %v7242_v34 = vor.u32 %v8585_v28, %v7239_v29  ;;  %v8577_v43 = vld [vmem:[%s9375_s19 + $0xa0c] sm:$0xf]  ;;  %v6349_v17 = vld [vmem:[%s9375_s19 + $0x350] sm:$0xf]  ;;  %v4178_v22 = vpop.f32.mrf.mxu0  ;;  %v6798_v23 = vor.u32 %v8478_v15, %v6797_v14 }
 0x1e3   : > { %v7207_v54 = vld [vmem:[%s9375_s19 + $0xa28] sm:$0xf0]  ;;  %4422 = vmatmul.bf16.vlgmr.msrb.gmra.mxu3 %v9674_v9  ;;  %4429 = vmatpush.bf16.msrb.mxu0 %v6094_v30  ;;  %v8366_v18 = vld [vmem:[%s9375_s19 + $0x36c] sm:$0xf0] }
 0x1e4   : > { %4466 = vmatpush.bf16.msra.mxu3 %v6926_v21  ;;  %v7210_v56 = vor.u32 %v8577_v43, %v7207_v54  ;;  %v8270_v21 = vld [vmem:[%s9375_s19 + $0x6c] sm:$0xf0]  ;;  %v6350_v26 = vor.u32 %v8366_v18, %v6349_v17 }
 0x1e5   : > { %v6509_v24 = vld [vmem:[%s9375_s19 + $0x490] sm:$0xf]  ;;  %v5966_v29 = vor.u32 %v8270_v21, %v5965_v20 }
 0x1e6   : > { %4454 = vmatpush.bf16.msra.mxu2 %v6638_v31  ;;  %4394 = vmatpush.bf16.msra.mxu1 %v7242_v34  ;;  %v8406_v25 = vld [vmem:[%s9375_s19 + $0x4ac] sm:$0xf0]  ;;  %v4202_v34 = vpop.f32.mrf.mxu2 }
 0x1e7   : > { %4430 = vmatpush.bf16.msrb.mxu0 %v6062_v46  ;;  %v6765_v27 = vld [vmem:[%s9375_s19 + $0x690] sm:$0xf]  ;;  %v6510_v32 = vor.u32 %v8406_v25, %v6509_v24 }
 0x1e8   : > { %4467 = vmatpush.bf16.msra.mxu3 %v6894_v37  ;;  %v8470_v28 = vld [vmem:[%s9375_s19 + $0x6ac] sm:$0xf0] }
 0x1e9   : > { %v6317_v30 = vld [vmem:[%s9375_s19 + $0x310] sm:$0xf]  ;;  %v6766_v40 = vor.u32 %v8470_v28, %v6765_v27 }
 0x1ea   : > { %4455 = vmatpush.bf16.msra.mxu2 %v6606_v50  ;;  %4395 = vmatpush.bf16.msra.mxu1 %v7210_v56  ;;  %v8358_v31 = vld [vmem:[%s9375_s19 + $0x32c] sm:$0xf0]  ;;  %v10160_v58 = vpop.f32.mrf.mxu0 }
 0x1eb   : > { %4431 = vmatpush.bf16.msrb.mxu0 %v6030_v0  ;;  %v5933_v33 = vld [vmem:[%s9375_s19 + $0x10] sm:$0xf]  ;;  %v6318_v54 = vor.u32 %v8358_v31, %v6317_v30  ;;  %v4191_v31 = vpop.f32.mrf.mxu1 }
 0x1ec   : > { %4468 = vmatpush.bf16.msra.mxu3 %v6862_v55  ;;  %v8262_v36 = vld [vmem:[%s9375_s19 + $0x2c] sm:$0xf0] }
 0x1ed   : > { %4396 = vmatmul.bf16.vlgmr.msra.gmra.mxu1 %v9701_v49  ;;  %v7181_v37 = vld [vmem:[%s9375_s19 + $0x9d0] sm:$0xf]  ;;  %v5934_v48 = vor.u32 %v8262_v36, %v5933_v33 }
 0x1ee   : > { %4440 = vmatpush.bf16.msrb.mxu1 %v6414_v61  ;;  %4456 = vmatpush.bf16.msra.mxu2 %v6574_v5  ;;  %v8574_v41 = vld [vmem:[%s9375_s19 + $0x9ec] sm:$0xf0]  ;;  %v4204_v59 = vpop.f32.mrf.mxu2 }
 0x1ef   : > { %4432 = vmatpush.bf16.msrb.mxu0 %v5998_v16  ;;  %v6477_v42 = vld [vmem:[%s9375_s19 + $0x450] sm:$0xf]  ;;  %v7182_v52 = vor.u32 %v8574_v41, %v7181_v37  ;;  %v4217_v16 = vpop.f32.mrf.mxu3 }
 0x1f0   : > { %4469 = vmatpush.bf16.msra.mxu3 %v6830_v11  ;;  %v8398_v43 = vld [vmem:[%s9375_s19 + $0x46c] sm:$0xf0] }
 0x1f1   : > { %v6733_v46 = vld [vmem:[%s9375_s19 + $0x650] sm:$0xf]  ;;  %v6478_v53 = vor.u32 %v8398_v43, %v6477_v42 }
 0x1f2   : > { %4441 = vmatpush.bf16.msrb.mxu1 %v6382_v13  ;;  %4457 = vmatpush.bf16.msra.mxu2 %v6542_v19  ;;  %v8462_v47 = vld [vmem:[%s9375_s19 + $0x66c] sm:$0xf0]  ;;  %v4203_v13 = vadd.f32 %v4202_v34, %v4190_v3 }
 0x1f3   : > { %4433 = vmatpush.bf16.msrb.mxu0 %v5966_v29  ;;  %v6285_v50 = vld [vmem:[%s9375_s19 + $0x2d0] sm:$0xf]  ;;  %v6734_v61 = vor.u32 %v8462_v47, %v6733_v46 }
 0x1f4   : > { %4470 = vmatpush.bf16.msra.mxu3 %v6798_v23  ;;  %v8350_v51 = vld [vmem:[%s9375_s19 + $0x2ec] sm:$0xf0]  ;;  %v10135_v21 = vadd.f32 %v4215_v38, %v4203_v13 }
 0x1f5   : > { %v7149_v55 = vld [vmem:[%s9375_s19 + $0x990] sm:$0xf]  ;;  %v6286_v4 = vor.u32 %v8350_v51, %v6285_v50 }
 0x1f6   : > { %4442 = vmatpush.bf16.msrb.mxu1 %v6350_v26  ;;  %4458 = vmatpush.bf16.msra.mxu2 %v6510_v32  ;;  %v8566_v56 = vld [vmem:[%s9375_s19 + $0x9ac] sm:$0xf0] }
 0x1f7   : > { %v6445_v57 = vld [vmem:[%s9375_s19 + $0x410] sm:$0xf]  ;;  %4434 = vmatpush.bf16.msrb.mxu0 %v5934_v48  ;;  %v7150_v14 = vor.u32 %v8566_v56, %v7149_v55 }
 0x1f8   : > { %4471 = vmatpush.bf16.msra.mxu3 %v6766_v40  ;;  %v8390_v62 = vld [vmem:[%s9375_s19 + $0x42c] sm:$0xf0] }
 0x1f9   : > { %v6701_v63 = vld [vmem:[%s9375_s19 + $0x610] sm:$0xf]  ;;  %v6446_v15 = vor.u32 %v8390_v62, %v6445_v57 }
 0x1fa   : > { %v8454_v0 = vld [vmem:[%s9375_s19 + $0x62c] sm:$0xf0]  ;;  %4443 = vmatpush.bf16.msrb.mxu1 %v6318_v54  ;;  %4459 = vmatpush.bf16.msra.mxu2 %v6478_v53 }
 0x1fb   : > { %v7693_v5 = vld [vmem:[%s9375_s19 + $0xdd0] sm:$0xf]  ;;  %4479 = vmatpush.bf16.msra.mxu0 %v7182_v52  ;;  %v6702_v17 = vor.u32 %v8454_v0, %v6701_v63 }
 0x1fc   : > { %v8702_v6 = vld [vmem:[%s9375_s19 + $0xdec] sm:$0xf0]  ;;  %4472 = vmatpush.bf16.msra.mxu3 %v6734_v61  ;;  %4435 = vmatmul.bf16.vlgmr.msrb.gmra.mxu0 %v9614_v44 }
 0x1fd   : > { %v7949_v10 = vld [vmem:[%s9375_s19 + $0xfd0] sm:$0xf]  ;;  %v7694_v18 = vor.u32 %v8702_v6, %v7693_v5 }
 0x1fe   : > { %v8766_v11 = vld [vmem:[%s9375_s19 + $0xfec] sm:$0xf0]  ;;  %4444 = vmatpush.bf16.msrb.mxu1 %v6286_v4  ;;  %4460 = vmatpush.bf16.msra.mxu2 %v6446_v15 }
 0x1ff   : > { %v6253_v12 = vld [vmem:[%s9375_s19 + $0x290] sm:$0xf]  ;;  %v7950_v22 = vor.u32 %v8766_v11, %v7949_v10  ;;  %4480 = vmatpush.bf16.msra.mxu0 %v7150_v14 }
 0x200   : > { %v8342_v45 = vld [vmem:[%s9375_s19 + $0x2ac] sm:$0xf0]  ;;  %4473 = vmatpush.bf16.msra.mxu3 %v6702_v17 }
 0x201   : > { %v7117_v19 = vld [vmem:[%s9375_s19 + $0x950] sm:$0xf]  ;;  %v6254_v23 = vor.u32 %v8342_v45, %v6253_v12  ;;  %4461 = vmatmul.bf16.vlgmr.msra.gmra.mxu2 %v9627_v1 }
 0x202   : > { %v8558_v20 = vld [vmem:[%s9375_s19 + $0x96c] sm:$0xf0]  ;;  %4505 = vmatpush.bf16.msrb.mxu2 %v7694_v18 }
 0x203   : > { %v7661_v24 = vld [vmem:[%s9375_s19 + $0xd90] sm:$0xf]  ;;  %v7118_v30 = vor.u32 %v8558_v20, %v7117_v19  ;;  %4445 = vmatpush.bf16.msrb.mxu1 %v6254_v23  ;;  %4474 = vmatmul.bf16.vlgmr.msra.gmra.mxu3 %v9629_v2 }
 0x204   : > { %v8694_v25 = vld [vmem:[%s9375_s19 + $0xdac] sm:$0xf0]  ;;  %4518 = vmatpush.bf16.msrb.mxu3 %v7950_v22 }
 0x205   : > { %v7917_v26 = vld [vmem:[%s9375_s19 + $0xf90] sm:$0xf]  ;;  %v7662_v32 = vor.u32 %v8694_v25, %v7661_v24  ;;  %4481 = vmatpush.bf16.msra.mxu0 %v7118_v30  ;;  %v4230_v25 = vpop.f32.mrf.mxu0 }
 0x206   : > { %v8758_v27 = vld [vmem:[%s9375_s19 + $0xfac] sm:$0xf0]  ;;  %v8434_v25 = vld [vmem:[%s9375_s19 + $0x594] sm:$0xf] }
 0x207   : > { %v6221_v28 = vld [vmem:[%s9375_s19 + $0x250] sm:$0xf]  ;;  %v7918_v37 = vor.u32 %v8758_v27, %v7917_v26  ;;  %4506 = vmatpush.bf16.msrb.mxu2 %v7662_v32 }
 0x208   : > { %v8334_v29 = vld [vmem:[%s9375_s19 + $0x26c] sm:$0xf0] }
 0x209   : > { %v7085_v33 = vld [vmem:[%s9375_s19 + $0x910] sm:$0xf]  ;;  %v6222_v34 = vor.u32 %v8334_v29, %v6221_v28  ;;  %4519 = vmatpush.bf16.msrb.mxu3 %v7918_v37  ;;  %v1437_v29 = vperm.slane %v9949_v60, 2 }
 0x20a   : > { %v8550_v36 = vld [vmem:[%s9375_s19 + $0x92c] sm:$0xf0] }
 0x20b   : > { %v7629_v38 = vld [vmem:[%s9375_s19 + $0xd50] sm:$0xf]  ;;  %v7086_v46 = vor.u32 %v8550_v36, %v7085_v33  ;;  %4446 = vmatpush.bf16.msrb.mxu1 %v6222_v34  ;;  %v8314_v34 = vld [vmem:[%s9375_s19 + $0x1d4] sm:$0xf] }
 0x20c   : > { %v8686_v40 = vld [vmem:[%s9375_s19 + $0xd6c] sm:$0xf0] }
 0x20d   : > { %v7885_v41 = vld [vmem:[%s9375_s19 + $0xf50] sm:$0xf]  ;;  %v7630_v50 = vor.u32 %v8686_v40, %v7629_v38  ;;  %4482 = vmatpush.bf16.msra.mxu0 %v7086_v46  ;;  %v4254_v38 = vpop.f32.mrf.mxu2 }
 0x20e   : > { %v8750_v42 = vld [vmem:[%s9375_s19 + $0xf6c] sm:$0xf0] }
 0x20f   : > { %v6189_v43 = vld [vmem:[%s9375_s19 + $0x210] sm:$0xf]  ;;  %v7886_v53 = vor.u32 %v8750_v42, %v7885_v41  ;;  %4507 = vmatpush.bf16.msrb.mxu2 %v7630_v50  ;;  %v6159_v41 = vld [vmem:[%s9375_s19 + $0x1f0] sm:$0xf0] }
 0x210   : > { %v8326_v54 = vld [vmem:[%s9375_s19 + $0x22c] sm:$0xf0] }
 0x211   : > { %v7437_v47 = vld [vmem:[%s9375_s19 + $0xbd0] sm:$0xf]  ;;  %v6190_v55 = vor.u32 %v8326_v54, %v6189_v43  ;;  %4520 = vmatpush.bf16.msrb.mxu3 %v7886_v53  ;;  %v4267_v43 = vpop.f32.mrf.mxu3  ;;  %v6162_v53 = vor.u32 %v8314_v34, %v6159_v41  ;;  %v6063_v34 = vld [vmem:[%s9375_s19 + $0x130] sm:$0xf0] }
 0x212   : > { %v8638_v48 = vld [vmem:[%s9375_s19 + $0xbec] sm:$0xf0]  ;;  %v8426_v41 = vld [vmem:[%s9375_s19 + $0x554] sm:$0xf] }
 0x213   : > { %v7053_v51 = vld [vmem:[%s9375_s19 + $0x8d0] sm:$0xf]  ;;  %v7438_v61 = vor.u32 %v8638_v48, %v7437_v47  ;;  %4447 = vmatpush.bf16.msrb.mxu1 %v6190_v55 }
 0x214   : > { %v8542_v52 = vld [vmem:[%s9375_s19 + $0x8ec] sm:$0xf0] }
 0x215   : > { %v7597_v56 = vld [vmem:[%s9375_s19 + $0xd10] sm:$0xf]  ;;  %v7054_v0 = vor.u32 %v8542_v52, %v7053_v51  ;;  %v4229_v52 = vadd.f32 %v10160_v58, %v1437_v29  ;;  %v6895_v29 = vld [vmem:[%s9375_s19 + $0x7b0] sm:$0xf0] }
 0x216   : > { %v8678_v57 = vld [vmem:[%s9375_s19 + $0xd2c] sm:$0xf0]  ;;  %4448 = vmatmul.bf16.vlgmr.msrb.gmra.mxu1 %v9655_v39 }
 0x217   : > { %v7853_v62 = vld [vmem:[%s9375_s19 + $0xf10] sm:$0xf]  ;;  %v7598_v5 = vor.u32 %v8678_v57, %v7597_v56  ;;  %4492 = vmatpush.bf16.msra.mxu1 %v7438_v61  ;;  %4483 = vmatpush.bf16.msra.mxu0 %v7054_v0  ;;  %v8306_v56 = vld [vmem:[%s9375_s19 + $0x194] sm:$0xf] }
 0x218   : > { %v8742_v63 = vld [vmem:[%s9375_s19 + $0xf2c] sm:$0xf0]  ;;  %v6127_v57 = vld [vmem:[%s9375_s19 + $0x1b0] sm:$0xf0] }
 0x219   : > { %v7405_v3 = vld [vmem:[%s9375_s19 + $0xb90] sm:$0xf]  ;;  %v7854_v11 = vor.u32 %v8742_v63, %v7853_v62  ;;  %4508 = vmatpush.bf16.msrb.mxu2 %v7598_v5  ;;  %v4241_v62 = vpop.f32.mrf.mxu1 }
 0x21a   : > { %v8630_v4 = vld [vmem:[%s9375_s19 + $0xbac] sm:$0xf0]  ;;  %v4242_v5 = vadd.f32 %v4241_v62, %v4229_v52  ;;  %v8282_v52 = vld [vmem:[%s9375_s19 + $0xd4] sm:$0xf]  ;;  %v4280_v62 = vpop.f32.mrf.mxu0 }
 0x21b   : > { %v7021_v6 = vld [vmem:[%s9375_s19 + $0x890] sm:$0xf]  ;;  %v7406_v13 = vor.u32 %v8630_v4, %v7405_v3  ;;  %4521 = vmatpush.bf16.msrb.mxu3 %v7854_v11  ;;  %v8506_v11 = vld [vmem:[%s9375_s19 + $0x7d4] sm:$0xf] }
 0x21c   : > { %v8534_v10 = vld [vmem:[%s9375_s19 + $0x8ac] sm:$0xf0] }
 0x21d   : > { %v7565_v12 = vld [vmem:[%s9375_s19 + $0xcd0] sm:$0xf]  ;;  %v7022_v59 = vor.u32 %v8534_v10, %v7021_v6  ;;  %4493 = vmatpush.bf16.msra.mxu1 %v7406_v13  ;;  %v8442_v6 = vld [vmem:[%s9375_s19 + $0x5d4] sm:$0xf] }
 0x21e   : > { %v8670_v45 = vld [vmem:[%s9375_s19 + $0xcec] sm:$0xf0]  ;;  %v6671_v10 = vld [vmem:[%s9375_s19 + $0x5f0] sm:$0xf0] }
 0x21f   : > { %v7821_v14 = vld [vmem:[%s9375_s19 + $0xed0] sm:$0xf]  ;;  %v7566_v18 = vor.u32 %v8670_v45, %v7565_v12  ;;  %4484 = vmatpush.bf16.msra.mxu0 %v7022_v59  ;;  %v6927_v12 = vld [vmem:[%s9375_s19 + $0x7f0] sm:$0xf0] }
 0x220   : > { %v8734_v15 = vld [vmem:[%s9375_s19 + $0xeec] sm:$0xf0] }
 0x221   : > { %v7373_v16 = vld [vmem:[%s9375_s19 + $0xb50] sm:$0xf]  ;;  %v7822_v22 = vor.u32 %v8734_v15, %v7821_v14  ;;  %4509 = vmatpush.bf16.msrb.mxu2 %v7566_v18  ;;  %v4255_v14 = vadd.f32 %v4254_v38, %v4242_v5  ;;  %v6130_v15 = vor.u32 %v8306_v56, %v6127_v57  ;;  %v6674_v18 = vor.u32 %v8442_v6, %v6671_v10  ;;  %v8418_v57 = vld [vmem:[%s9375_s19 + $0x514] sm:$0xf] }
 0x222   : > { %v8622_v17 = vld [vmem:[%s9375_s19 + $0xb6c] sm:$0xf0]  ;;  %v6383_v6 = vld [vmem:[%s9375_s19 + $0x3b0] sm:$0xf0] }
 0x223   : > { %v6989_v19 = vld [vmem:[%s9375_s19 + $0x850] sm:$0xf]  ;;  %v7374_v26 = vor.u32 %v8622_v17, %v7373_v16  ;;  %4522 = vmatpush.bf16.msrb.mxu3 %v7822_v22  ;;  %v4256_v16 = vpop.f32.mrf.mxu2  ;;  %v4269_v22 = vpop.f32.mrf.mxu3 }
 0x224   : > { %v8526_v20 = vld [vmem:[%s9375_s19 + $0x86c] sm:$0xf0]  ;;  %v6799_v16 = vld [vmem:[%s9375_s19 + $0x6f0] sm:$0xf0] }
 0x225   : > { %v7533_v23 = vld [vmem:[%s9375_s19 + $0xc90] sm:$0xf]  ;;  %v6990_v30 = vor.u32 %v8526_v20, %v6989_v19  ;;  %4494 = vmatpush.bf16.msra.mxu1 %v7374_v26  ;;  %v8298_v19 = vld [vmem:[%s9375_s19 + $0x154] sm:$0xf] }
 0x226   : > { %v8662_v24 = vld [vmem:[%s9375_s19 + $0xcac] sm:$0xf0]  ;;  %v6095_v20 = vld [vmem:[%s9375_s19 + $0x170] sm:$0xf0] }
 0x227   : > { %v7789_v27 = vld [vmem:[%s9375_s19 + $0xe90] sm:$0xf]  ;;  %v7534_v33 = vor.u32 %v8662_v24, %v7533_v23  ;;  %4485 = vmatpush.bf16.msra.mxu0 %v6990_v30  ;;  %v6930_v23 = vor.u32 %v8506_v11, %v6927_v12  ;;  %v6639_v26 = vld [vmem:[%s9375_s19 + $0x5b0] sm:$0xf0] }
 0x228   : > { %v8726_v28 = vld [vmem:[%s9375_s19 + $0xeac] sm:$0xf0]  ;;  %v8274_v11 = vld [vmem:[%s9375_s19 + $0x94] sm:$0xf] }
 0x229   : > { %v7341_v31 = vld [vmem:[%s9375_s19 + $0xb10] sm:$0xf]  ;;  %v7790_v40 = vor.u32 %v8726_v28, %v7789_v27  ;;  %4510 = vmatpush.bf16.msrb.mxu2 %v7534_v33  ;;  %v8498_v27 = vld [vmem:[%s9375_s19 + $0x794] sm:$0xf]  ;;  %v4268_v28 = vadd.f32 %v4267_v43, %v4255_v14  ;;  %v4243_v33 = vpop.f32.mrf.mxu1 }
 0x22a   : > { %v8614_v32 = vld [vmem:[%s9375_s19 + $0xb2c] sm:$0xf0]  ;;  %v6898_v38 = vor.u32 %v8498_v27, %v6895_v29  ;;  %v6863_v43 = vld [vmem:[%s9375_s19 + $0x770] sm:$0xf0]  ;;  %v4282_v27 = vpop.f32.mrf.mxu0 }
 0x22b   : > { %v6957_v36 = vld [vmem:[%s9375_s19 + $0x810] sm:$0xf]  ;;  %v7342_v54 = vor.u32 %v8614_v32, %v7341_v31  ;;  %4523 = vmatpush.bf16.msrb.mxu3 %v7790_v40  ;;  %v6098_v32 = vor.u32 %v8298_v19, %v6095_v20  ;;  %v5999_v12 = vld [vmem:[%s9375_s19 + $0xb0] sm:$0xf0] }
 0x22c   : > { %v8518_v37 = vld [vmem:[%s9375_s19 + $0x82c] sm:$0xf0]  ;;  %v6543_v14 = vld [vmem:[%s9375_s19 + $0x4f0] sm:$0xf0] }
 0x22d   : > { %v7501_v42 = vld [vmem:[%s9375_s19 + $0xc50] sm:$0xf]  ;;  %v6958_v48 = vor.u32 %v8518_v37, %v6957_v36  ;;  %4495 = vmatpush.bf16.msra.mxu1 %v7342_v54  ;;  %v6642_v36 = vor.u32 %v8434_v25, %v6639_v26  ;;  %v8290_v37 = vld [vmem:[%s9375_s19 + $0x114] sm:$0xf] }
 0x22e   : > { %v8654_v60 = vld [vmem:[%s9375_s19 + $0xc6c] sm:$0xf0]  ;;  %v6351_v19 = vld [vmem:[%s9375_s19 + $0x370] sm:$0xf0] }
 0x22f   : > { %v7757_v46 = vld [vmem:[%s9375_s19 + $0xe50] sm:$0xf]  ;;  %v7502_v55 = vor.u32 %v8654_v60, %v7501_v42  ;;  %4486 = vmatpush.bf16.msra.mxu0 %v6958_v48  ;;  %v6607_v42 = vld [vmem:[%s9375_s19 + $0x570] sm:$0xf0] }
 0x230   : > { %v8718_v47 = vld [vmem:[%s9375_s19 + $0xe6c] sm:$0xf0]  ;;  %v8490_v60 = vld [vmem:[%s9375_s19 + $0x754] sm:$0xf] }
 0x231   : > { %v7309_v50 = vld [vmem:[%s9375_s19 + $0xad0] sm:$0xf]  ;;  %v7758_v63 = vor.u32 %v8718_v47, %v7757_v46  ;;  %4511 = vmatpush.bf16.msrb.mxu2 %v7502_v55  ;;  %v6066_v47 = vor.u32 %v8290_v37, %v6063_v34  ;;  %v8378_v48 = vld [vmem:[%s9375_s19 + $0x3d4] sm:$0xf]  ;;  %v6866_v55 = vor.u32 %v8490_v60, %v6863_v43 }
 0x232   : > { %v8606_v51 = vld [vmem:[%s9375_s19 + $0xaec] sm:$0xf0]  ;;  %4487 = vmatmul.bf16.vlgmr.msra.gmra.mxu0 %v9650_v35  ;;  %v8266_v22 = vld [vmem:[%s9375_s19 + $0x54] sm:$0xf] }
 0x233   : > { %v7469_v61 = vld [vmem:[%s9375_s19 + $0xc10] sm:$0xf]  ;;  %v7310_v58 = vor.u32 %v8606_v51, %v7309_v50  ;;  %4531 = vmatpush.bf16.msrb.mxu0 %v6162_v53  ;;  %4524 = vmatpush.bf16.msrb.mxu3 %v7758_v63  ;;  %v6415_v50 = vld [vmem:[%s9375_s19 + $0x3f0] sm:$0xf0]  ;;  %v6610_v51 = vor.u32 %v8426_v41, %v6607_v42 }
 0x234   : > { %v8646_v0 = vld [vmem:[%s9375_s19 + $0xc2c] sm:$0xf0]  ;;  %v6031_v53 = vld [vmem:[%s9375_s19 + $0xf0] sm:$0xf0]  ;;  %v6418_v63 = vor.u32 %v8378_v48, %v6415_v50 }
 0x235   : > { %v7725_v3 = vld [vmem:[%s9375_s19 + $0xe10] sm:$0xf]  ;;  %v7470_v59 = vor.u32 %v8646_v0, %v7469_v61  ;;  %4496 = vmatpush.bf16.msra.mxu1 %v7310_v58  ;;  %v6575_v61 = vld [vmem:[%s9375_s19 + $0x530] sm:$0xf0]  ;;  %v6034_v5 = vor.u32 %v8282_v52, %v6031_v53 }
 0x236   : > { %v8710_v4 = vld [vmem:[%s9375_s19 + $0xe2c] sm:$0xf0]  ;;  %v8482_v0 = vld [vmem:[%s9375_s19 + $0x714] sm:$0xf]  ;;  %v6578_v10 = vor.u32 %v8418_v57, %v6575_v61 }
 0x237   : > { %v7277_v45 = vld [vmem:[%s9375_s19 + $0xa90] sm:$0xf]  ;;  %v7726_v17 = vor.u32 %v8710_v4, %v7725_v3  ;;  %4532 = vmatpush.bf16.msrb.mxu0 %v6130_v15  ;;  %4512 = vmatpush.bf16.msrb.mxu2 %v7470_v59  ;;  %v6831_v3 = vld [vmem:[%s9375_s19 + $0x730] sm:$0xf0]  ;;  %v10234_v4 = vadd.f32 %v4280_v62, %v4268_v28  ;;  %v4293_v62 = vpop.f32.mrf.mxu1 }
 0x238   : > { %v8598_v13 = vld [vmem:[%s9375_s19 + $0xaac] sm:$0xf0]  ;;  %v8370_v58 = vld [vmem:[%s9375_s19 + $0x394] sm:$0xf] }
 0x239   : > { %v7278_v24 = vor.u32 %v8598_v13, %v7277_v45  ;;  %v7245_v30 = vld [vmem:[%s9375_s19 + $0xa50] sm:$0xf]  ;;  %4525 = vmatpush.bf16.msrb.mxu3 %v7726_v17  ;;  %v6834_v45 = vor.u32 %v8482_v0, %v6831_v3  ;;  %v8410_v13 = vld [vmem:[%s9375_s19 + $0x4d4] sm:$0xf]  ;;  %v6386_v15 = vor.u32 %v8370_v58, %v6383_v6  ;;  %v6002_v17 = vor.u32 %v8274_v11, %v5999_v12 }
 0x23a   : > { %v8590_v31 = vld [vmem:[%s9375_s19 + $0xa6c] sm:$0xf0]  ;;  %4513 = vmatmul.bf16.vlgmr.msrb.gmra.mxu2 %v9672_v8  ;;  %v8474_v59 = vld [vmem:[%s9375_s19 + $0x6d4] sm:$0xf]  ;;  %v6546_v20 = vor.u32 %v8410_v13, %v6543_v14  ;;  %v4294_v58 = vadd.f32 %v4293_v62, %v10234_v4  ;;  %v10305_v62 = vpop.f32.mrf.mxu0 }
 0x23b   : > { %4557 = vmatpush.bf16.msra.mxu2 %v6674_v18  ;;  %4497 = vmatpush.bf16.msra.mxu1 %v7278_v24  ;;  %v7246_v40 = vor.u32 %v8590_v31, %v7245_v30  ;;  %v7213_v54 = vld [vmem:[%s9375_s19 + $0xa10] sm:$0xf]  ;;  %v8362_v18 = vld [vmem:[%s9375_s19 + $0x354] sm:$0xf]  ;;  %v6802_v24 = vor.u32 %v8474_v59, %v6799_v16 }
 0x23c   : > { %v8582_v46 = vld [vmem:[%s9375_s19 + $0xa2c] sm:$0xf0]  ;;  %4526 = vmatmul.bf16.vlgmr.msrb.gmra.mxu3 %v9674_v9  ;;  %4533 = vmatpush.bf16.msrb.mxu0 %v6098_v32  ;;  %v8402_v25 = vld [vmem:[%s9375_s19 + $0x494] sm:$0xf]  ;;  %v6354_v28 = vor.u32 %v8362_v18, %v6351_v19 }
 0x23d   : > { %4570 = vmatpush.bf16.msra.mxu3 %v6930_v23  ;;  %v7214_v56 = vor.u32 %v8582_v46, %v7213_v54  ;;  %v5967_v23 = vld [vmem:[%s9375_s19 + $0x70] sm:$0xf0]  ;;  %v4319_v54 = vpop.f32.mrf.mxu3 }
 0x23e   : > { %v6511_v26 = vld [vmem:[%s9375_s19 + $0x4b0] sm:$0xf0]  ;;  %v5970_v31 = vor.u32 %v8266_v22, %v5967_v23 }
 0x23f   : > { %4558 = vmatpush.bf16.msra.mxu2 %v6642_v36  ;;  %4498 = vmatpush.bf16.msra.mxu1 %v7246_v40  ;;  %v8466_v29 = vld [vmem:[%s9375_s19 + $0x694] sm:$0xf]  ;;  %v6514_v36 = vor.u32 %v8402_v25, %v6511_v26  ;;  %v4306_v40 = vpop.f32.mrf.mxu2 }
 0x240   : > { %4534 = vmatpush.bf16.msrb.mxu0 %v6066_v47  ;;  %v6767_v30 = vld [vmem:[%s9375_s19 + $0x6b0] sm:$0xf0] }
 0x241   : > { %4571 = vmatpush.bf16.msra.mxu3 %v6898_v38  ;;  %v8354_v32 = vld [vmem:[%s9375_s19 + $0x314] sm:$0xf]  ;;  %v6770_v41 = vor.u32 %v8466_v29, %v6767_v30 }
 0x242   : > { %v6319_v33 = vld [vmem:[%s9375_s19 + $0x330] sm:$0xf0] }
 0x243   : > { %4559 = vmatpush.bf16.msra.mxu2 %v6610_v51  ;;  %4499 = vmatpush.bf16.msra.mxu1 %v7214_v56  ;;  %v8258_v37 = vld [vmem:[%s9375_s19 + $0x14] sm:$0xf]  ;;  %v6322_v46 = vor.u32 %v8354_v32, %v6319_v33  ;;  %v4295_v33 = vpop.f32.mrf.mxu1 }
 0x244   : > { %4535 = vmatpush.bf16.msrb.mxu0 %v6034_v5  ;;  %v5935_v34 = vld [vmem:[%s9375_s19 + $0x30] sm:$0xf0] }
 0x245   : > { %4572 = vmatpush.bf16.msra.mxu3 %v6866_v55  ;;  %v8570_v38 = vld [vmem:[%s9375_s19 + $0x9d4] sm:$0xf]  ;;  %v5938_v50 = vor.u32 %v8258_v37, %v5935_v34  ;;  %v4321_v23 = vpop.f32.mrf.mxu3 }
 0x246   : > { %4500 = vmatmul.bf16.vlgmr.msra.gmra.mxu1 %v9701_v49  ;;  %v7183_v42 = vld [vmem:[%s9375_s19 + $0x9f0] sm:$0xf0] }
 0x247   : > { %4544 = vmatpush.bf16.msrb.mxu1 %v6418_v63  ;;  %4560 = vmatpush.bf16.msra.mxu2 %v6578_v10  ;;  %v8394_v60 = vld [vmem:[%s9375_s19 + $0x454] sm:$0xf]  ;;  %v7186_v53 = vor.u32 %v8570_v38, %v7183_v42  ;;  %v4308_v4 = vpop.f32.mrf.mxu2 }
 0x248   : > { %4536 = vmatpush.bf16.msrb.mxu0 %v6002_v17  ;;  %v6479_v43 = vld [vmem:[%s9375_s19 + $0x470] sm:$0xf0] }
 0x249   : > { %4573 = vmatpush.bf16.msra.mxu3 %v6834_v45  ;;  %v8458_v47 = vld [vmem:[%s9375_s19 + $0x654] sm:$0xf]  ;;  %v6482_v55 = vor.u32 %v8394_v60, %v6479_v43 }
 0x24a   : > { %v6735_v48 = vld [vmem:[%s9375_s19 + $0x670] sm:$0xf0] }
 0x24b   : > { %4545 = vmatpush.bf16.msrb.mxu1 %v6386_v15  ;;  %4561 = vmatpush.bf16.msra.mxu2 %v6546_v20  ;;  %v8346_v51 = vld [vmem:[%s9375_s19 + $0x2d4] sm:$0xf]  ;;  %v6738_v63 = vor.u32 %v8458_v47, %v6735_v48  ;;  %v4307_v15 = vadd.f32 %v4306_v40, %v4294_v58 }
 0x24c   : > { %4537 = vmatpush.bf16.msrb.mxu0 %v5970_v31  ;;  %v6287_v52 = vld [vmem:[%s9375_s19 + $0x2f0] sm:$0xf0] }
 0x24d   : > { %4574 = vmatpush.bf16.msra.mxu3 %v6802_v24  ;;  %v8562_v56 = vld [vmem:[%s9375_s19 + $0x994] sm:$0xf]  ;;  %v6290_v6 = vor.u32 %v8346_v51, %v6287_v52  ;;  %v10280_v22 = vadd.f32 %v4319_v54, %v4307_v15 }
 0x24e   : > { %v7151_v57 = vld [vmem:[%s9375_s19 + $0x9b0] sm:$0xf0] }
 0x24f   : > { %4546 = vmatpush.bf16.msrb.mxu1 %v6354_v28  ;;  %4562 = vmatpush.bf16.msra.mxu2 %v6514_v36  ;;  %v8386_v61 = vld [vmem:[%s9375_s19 + $0x414] sm:$0xf]  ;;  %v7154_v59 = vor.u32 %v8562_v56, %v7151_v57 }
 0x250   : > { %v6447_v0 = vld [vmem:[%s9375_s19 + $0x430] sm:$0xf0]  ;;  %4538 = vmatpush.bf16.msrb.mxu0 %v5938_v50 }
 0x251   : > { %4575 = vmatpush.bf16.msra.mxu3 %v6770_v41  ;;  %v8450_v3 = vld [vmem:[%s9375_s19 + $0x614] sm:$0xf]  ;;  %v6450_v16 = vor.u32 %v8386_v61, %v6447_v0 }
 0x252   : > { %v6703_v5 = vld [vmem:[%s9375_s19 + $0x630] sm:$0xf0] }
 0x253   : > { %4547 = vmatpush.bf16.msrb.mxu1 %v6322_v46  ;;  %v8698_v10 = vld [vmem:[%s9375_s19 + $0xdd4] sm:$0xf]  ;;  %4563 = vmatpush.bf16.msra.mxu2 %v6482_v55  ;;  %v6706_v17 = vor.u32 %v8450_v3, %v6703_v5 }
 0x254   : > { %v7695_v11 = vld [vmem:[%s9375_s19 + $0xdf0] sm:$0xf0]  ;;  %4583 = vmatpush.bf16.msra.mxu0 %v7186_v53 }
 0x255   : > { %v8762_v12 = vld [vmem:[%s9375_s19 + $0xfd4] sm:$0xf]  ;;  %4576 = vmatpush.bf16.msra.mxu3 %v6738_v63  ;;  %v7698_v18 = vor.u32 %v8698_v10, %v7695_v11  ;;  %4539 = vmatmul.bf16.vlgmr.msrb.gmra.mxu0 %v9614_v44 }
 0x256   : > { %v7951_v45 = vld [vmem:[%s9375_s19 + $0xff0] sm:$0xf0] }
 0x257   : > { %v8338_v13 = vld [vmem:[%s9375_s19 + $0x294] sm:$0xf]  ;;  %4548 = vmatpush.bf16.msrb.mxu1 %v6290_v6  ;;  %v7954_v24 = vor.u32 %v8762_v12, %v7951_v45  ;;  %4564 = vmatpush.bf16.msra.mxu2 %v6450_v16 }
 0x258   : > { %v6255_v14 = vld [vmem:[%s9375_s19 + $0x2b0] sm:$0xf0]  ;;  %4584 = vmatpush.bf16.msra.mxu0 %v7154_v59 }
 0x259   : > { %v8554_v19 = vld [vmem:[%s9375_s19 + $0x954] sm:$0xf]  ;;  %v6258_v25 = vor.u32 %v8338_v13, %v6255_v14  ;;  %4577 = vmatpush.bf16.msra.mxu3 %v6706_v17 }
 0x25a   : > { %v7119_v20 = vld [vmem:[%s9375_s19 + $0x970] sm:$0xf0]  ;;  %4565 = vmatmul.bf16.vlgmr.msra.gmra.mxu2 %v9627_v1 }
 0x25b   : > { %v8690_v26 = vld [vmem:[%s9375_s19 + $0xd94] sm:$0xf]  ;;  %v7122_v32 = vor.u32 %v8554_v19, %v7119_v20  ;;  %4609 = vmatpush.bf16.msrb.mxu2 %v7698_v18  ;;  %4549 = vmatpush.bf16.msrb.mxu1 %v6258_v25 }
 0x25c   : > { %v7663_v27 = vld [vmem:[%s9375_s19 + $0xdb0] sm:$0xf0]  ;;  %4578 = vmatmul.bf16.vlgmr.msra.gmra.mxu3 %v9629_v2 }
 0x25d   : > { %v8754_v28 = vld [vmem:[%s9375_s19 + $0xf94] sm:$0xf]  ;;  %v7666_v36 = vor.u32 %v8690_v26, %v7663_v27  ;;  %4622 = vmatpush.bf16.msrb.mxu3 %v7954_v24  ;;  %4585 = vmatpush.bf16.msra.mxu0 %v7122_v32  ;;  %v4334_v27 = vpop.f32.mrf.mxu0 }
 0x25e   : > { %v7919_v29 = vld [vmem:[%s9375_s19 + $0xfb0] sm:$0xf0] }
 0x25f   : > { %v8330_v30 = vld [vmem:[%s9375_s19 + $0x254] sm:$0xf]  ;;  %v7922_v38 = vor.u32 %v8754_v28, %v7919_v29  ;;  %4610 = vmatpush.bf16.msrb.mxu2 %v7666_v36 }
 0x260   : > { %v6223_v31 = vld [vmem:[%s9375_s19 + $0x270] sm:$0xf0] }
 0x261   : > { %v8546_v37 = vld [vmem:[%s9375_s19 + $0x914] sm:$0xf]  ;;  %v6226_v40 = vor.u32 %v8330_v30, %v6223_v31  ;;  %4623 = vmatpush.bf16.msrb.mxu3 %v7922_v38  ;;  %v10327_v31 = vld [vmem:[%s9377_s26] sm:$0xff] }
 0x262   : > { %v7087_v34 = vld [vmem:[%s9375_s19 + $0x930] sm:$0xf0]  ;;  %v1438_v32 = vperm.slane %v10327_v31, 3 }
 0x263   : > { %v8682_v41 = vld [vmem:[%s9375_s19 + $0xd54] sm:$0xf]  ;;  %v7090_v47 = vor.u32 %v8546_v37, %v7087_v34  ;;  %4550 = vmatpush.bf16.msrb.mxu1 %v6226_v40 }
 0x264   : > { %v7631_v42 = vld [vmem:[%s9375_s19 + $0xd70] sm:$0xf0] }
 0x265   : > { %v8746_v60 = vld [vmem:[%s9375_s19 + $0xf54] sm:$0xf]  ;;  %v7634_v51 = vor.u32 %v8682_v41, %v7631_v42  ;;  %4586 = vmatpush.bf16.msra.mxu0 %v7090_v47  ;;  %v6165_v41 = vld [vmem:[%s9375_s19 + $0x1d8] sm:$0xf]  ;;  %v4358_v42 = vpop.f32.mrf.mxu2  ;;  %v4371_v47 = vpop.f32.mrf.mxu3 }
 0x266   : > { %v7887_v43 = vld [vmem:[%s9375_s19 + $0xf70] sm:$0xf0] }
 0x267   : > { %v8322_v54 = vld [vmem:[%s9375_s19 + $0x214] sm:$0xf]  ;;  %v7890_v55 = vor.u32 %v8746_v60, %v7887_v43  ;;  %4611 = vmatpush.bf16.msrb.mxu2 %v7634_v51  ;;  %v8319_v43 = vld [vmem:[%s9375_s19 + $0x1f4] sm:$0xf0] }
 0x268   : > { %v6191_v46 = vld [vmem:[%s9375_s19 + $0x230] sm:$0xf0] }
 0x269   : > { %v8634_v48 = vld [vmem:[%s9375_s19 + $0xbd4] sm:$0xf]  ;;  %v6194_v56 = vor.u32 %v8322_v54, %v6191_v46  ;;  %4624 = vmatpush.bf16.msrb.mxu3 %v7890_v55 }
 0x26a   : > { %v7439_v50 = vld [vmem:[%s9375_s19 + $0xbf0] sm:$0xf0] }
 0x26b   : > { %v8538_v52 = vld [vmem:[%s9375_s19 + $0x8d4] sm:$0xf]  ;;  %v7442_v63 = vor.u32 %v8634_v48, %v7439_v50  ;;  %4551 = vmatpush.bf16.msrb.mxu1 %v6194_v56  ;;  %v4333_v56 = vadd.f32 %v10305_v62, %v1438_v32  ;;  %v6901_v32 = vld [vmem:[%s9375_s19 + $0x798] sm:$0xf] }
 0x26c   : > { %v7055_v53 = vld [vmem:[%s9375_s19 + $0x8f0] sm:$0xf0] }
 0x26d   : > { %v8674_v57 = vld [vmem:[%s9375_s19 + $0xd14] sm:$0xf]  ;;  %v7058_v5 = vor.u32 %v8538_v52, %v7055_v53 }
 0x26e   : > { %v7599_v61 = vld [vmem:[%s9375_s19 + $0xd30] sm:$0xf0]  ;;  %4552 = vmatmul.bf16.vlgmr.msrb.gmra.mxu1 %v9655_v39 }
 0x26f   : > { %v8738_v0 = vld [vmem:[%s9375_s19 + $0xf14] sm:$0xf]  ;;  %v7602_v10 = vor.u32 %v8674_v57, %v7599_v61  ;;  %4596 = vmatpush.bf16.msra.mxu1 %v7442_v63  ;;  %4587 = vmatpush.bf16.msra.mxu0 %v7058_v5  ;;  %v6166_v57 = vor.u32 %v8319_v43, %v6165_v41  ;;  %v6133_v63 = vld [vmem:[%s9375_s19 + $0x198] sm:$0xf]  ;;  %v4345_v5 = vpop.f32.mrf.mxu1 }
 0x270   : > { %v7855_v3 = vld [vmem:[%s9375_s19 + $0xf30] sm:$0xf0] }
 0x271   : > { %v8626_v58 = vld [vmem:[%s9375_s19 + $0xb94] sm:$0xf]  ;;  %v7858_v45 = vor.u32 %v8738_v0, %v7855_v3  ;;  %4612 = vmatpush.bf16.msrb.mxu2 %v7602_v10  ;;  %v8311_v0 = vld [vmem:[%s9375_s19 + $0x1b4] sm:$0xf0] }
 0x272   : > { %v7407_v6 = vld [vmem:[%s9375_s19 + $0xbb0] sm:$0xf0] }
 0x273   : > { %v8530_v11 = vld [vmem:[%s9375_s19 + $0x894] sm:$0xf]  ;;  %v7410_v15 = vor.u32 %v8626_v58, %v7407_v6  ;;  %4625 = vmatpush.bf16.msrb.mxu3 %v7858_v45  ;;  %v6677_v45 = vld [vmem:[%s9375_s19 + $0x5d8] sm:$0xf] }
 0x274   : > { %v7023_v12 = vld [vmem:[%s9375_s19 + $0x8b0] sm:$0xf0] }
 0x275   : > { %v8666_v13 = vld [vmem:[%s9375_s19 + $0xcd4] sm:$0xf]  ;;  %v7026_v4 = vor.u32 %v8530_v11, %v7023_v12  ;;  %4597 = vmatpush.bf16.msra.mxu1 %v7410_v15  ;;  %v4346_v12 = vadd.f32 %v4345_v5, %v4333_v56  ;;  %v8511_v15 = vld [vmem:[%s9375_s19 + $0x7f4] sm:$0xf0] }
 0x276   : > { %v7567_v14 = vld [vmem:[%s9375_s19 + $0xcf0] sm:$0xf0]  ;;  %v8383_v56 = vld [vmem:[%s9375_s19 + $0x3f4] sm:$0xf0] }
 0x277   : > { %v8730_v59 = vld [vmem:[%s9375_s19 + $0xed4] sm:$0xf]  ;;  %v7570_v19 = vor.u32 %v8666_v13, %v7567_v14  ;;  %4588 = vmatpush.bf16.msra.mxu0 %v7026_v4  ;;  %v8447_v13 = vld [vmem:[%s9375_s19 + $0x5f4] sm:$0xf0]  ;;  %v4359_v4 = vadd.f32 %v4358_v42, %v4346_v12 }
 0x278   : > { %v7823_v16 = vld [vmem:[%s9375_s19 + $0xef0] sm:$0xf0]  ;;  %v6933_v14 = vld [vmem:[%s9375_s19 + $0x7d8] sm:$0xf] }
 0x279   : > { %v8618_v17 = vld [vmem:[%s9375_s19 + $0xb54] sm:$0xf]  ;;  %v7826_v24 = vor.u32 %v8730_v59, %v7823_v16  ;;  %4613 = vmatpush.bf16.msrb.mxu2 %v7570_v19  ;;  %v4360_v19 = vpop.f32.mrf.mxu2  ;;  %v6934_v27 = vor.u32 %v8511_v15, %v6933_v14  ;;  %v6069_v42 = vld [vmem:[%s9375_s19 + $0x118] sm:$0xf] }
 0x27a   : > { %v7375_v18 = vld [vmem:[%s9375_s19 + $0xb70] sm:$0xf0]  ;;  %v6581_v5 = vld [vmem:[%s9375_s19 + $0x518] sm:$0xf] }
 0x27b   : > { %v8522_v20 = vld [vmem:[%s9375_s19 + $0x854] sm:$0xf]  ;;  %v7378_v28 = vor.u32 %v8618_v17, %v7375_v18  ;;  %4626 = vmatpush.bf16.msrb.mxu3 %v7826_v24  ;;  %v6134_v17 = vor.u32 %v8311_v0, %v6133_v63  ;;  %v6101_v24 = vld [vmem:[%s9375_s19 + $0x158] sm:$0xf] }
 0x27c   : > { %v6991_v23 = vld [vmem:[%s9375_s19 + $0x870] sm:$0xf0]  ;;  %v8287_v63 = vld [vmem:[%s9375_s19 + $0xf4] sm:$0xf0] }
 0x27d   : > { %v8658_v25 = vld [vmem:[%s9375_s19 + $0xc94] sm:$0xf]  ;;  %v6994_v33 = vor.u32 %v8522_v20, %v6991_v23  ;;  %4598 = vmatpush.bf16.msra.mxu1 %v7378_v28  ;;  %v6678_v23 = vor.u32 %v8447_v13, %v6677_v45  ;;  %v8487_v12 = vld [vmem:[%s9375_s19 + $0x734] sm:$0xf0] }
 0x27e   : > { %v7535_v26 = vld [vmem:[%s9375_s19 + $0xcb0] sm:$0xf0]  ;;  %v6389_v13 = vld [vmem:[%s9375_s19 + $0x398] sm:$0xf] }
 0x27f   : > { %v8722_v29 = vld [vmem:[%s9375_s19 + $0xe94] sm:$0xf]  ;;  %v7538_v34 = vor.u32 %v8658_v25, %v7535_v26  ;;  %4589 = vmatpush.bf16.msra.mxu0 %v6994_v33  ;;  %v8303_v25 = vld [vmem:[%s9375_s19 + $0x174] sm:$0xf0]  ;;  %v4373_v26 = vpop.f32.mrf.mxu3  ;;  %v4372_v33 = vadd.f32 %v4371_v47, %v4359_v4 }
 0x280   : > { %v7791_v30 = vld [vmem:[%s9375_s19 + $0xeb0] sm:$0xf0]  ;;  %v8431_v47 = vld [vmem:[%s9375_s19 + $0x574] sm:$0xf0] }
 0x281   : > { %v8610_v36 = vld [vmem:[%s9375_s19 + $0xb14] sm:$0xf]  ;;  %v7794_v60 = vor.u32 %v8722_v29, %v7791_v30  ;;  %4614 = vmatpush.bf16.msrb.mxu2 %v7538_v34  ;;  %v6645_v29 = vld [vmem:[%s9375_s19 + $0x598] sm:$0xf] }
 0x282   : > { %v7343_v37 = vld [vmem:[%s9375_s19 + $0xb30] sm:$0xf0]  ;;  %v8439_v30 = vld [vmem:[%s9375_s19 + $0x5b4] sm:$0xf0] }
 0x283   : > { %v8514_v38 = vld [vmem:[%s9375_s19 + $0x814] sm:$0xf]  ;;  %v7346_v48 = vor.u32 %v8610_v36, %v7343_v37  ;;  %4627 = vmatpush.bf16.msrb.mxu3 %v7794_v60  ;;  %v8503_v36 = vld [vmem:[%s9375_s19 + $0x7b4] sm:$0xf0]  ;;  %v6646_v41 = vor.u32 %v8439_v30, %v6645_v29 }
 0x284   : > { %v6959_v40 = vld [vmem:[%s9375_s19 + $0x830] sm:$0xf0]  ;;  %v8295_v60 = vld [vmem:[%s9375_s19 + $0x134] sm:$0xf0]  ;;  %v6902_v43 = vor.u32 %v8503_v36, %v6901_v32 }
 0x285   : > { %v8650_v54 = vld [vmem:[%s9375_s19 + $0xc54] sm:$0xf]  ;;  %v6962_v52 = vor.u32 %v8514_v38, %v6959_v40  ;;  %4599 = vmatpush.bf16.msra.mxu1 %v7346_v48  ;;  %v6102_v38 = vor.u32 %v8303_v25, %v6101_v24  ;;  %v4347_v40 = vpop.f32.mrf.mxu1  ;;  %v6869_v48 = vld [vmem:[%s9375_s19 + $0x758] sm:$0xf] }
 0x286   : > { %v7503_v46 = vld [vmem:[%s9375_s19 + $0xc70] sm:$0xf0]  ;;  %v8375_v14 = vld [vmem:[%s9375_s19 + $0x3b4] sm:$0xf0] }
 0x287   : > { %v8714_v50 = vld [vmem:[%s9375_s19 + $0xe54] sm:$0xf]  ;;  %v7506_v61 = vor.u32 %v8650_v54, %v7503_v46  ;;  %4590 = vmatpush.bf16.msra.mxu0 %v6962_v52  ;;  %v6613_v46 = vld [vmem:[%s9375_s19 + $0x558] sm:$0xf]  ;;  %v6390_v19 = vor.u32 %v8375_v14, %v6389_v13 }
 0x288   : > { %v7759_v51 = vld [vmem:[%s9375_s19 + $0xe70] sm:$0xf0]  ;;  %v6357_v25 = vld [vmem:[%s9375_s19 + $0x358] sm:$0xf] }
 0x289   : > { %v8602_v53 = vld [vmem:[%s9375_s19 + $0xad4] sm:$0xf]  ;;  %v7762_v58 = vor.u32 %v8714_v50, %v7759_v51  ;;  %4615 = vmatpush.bf16.msrb.mxu2 %v7506_v61  ;;  %v8495_v50 = vld [vmem:[%s9375_s19 + $0x774] sm:$0xf0] }
 0x28a   : > { %v7311_v55 = vld [vmem:[%s9375_s19 + $0xaf0] sm:$0xf0]  ;;  %4591 = vmatmul.bf16.vlgmr.msra.gmra.mxu0 %v9650_v35  ;;  %v6037_v61 = vld [vmem:[%s9375_s19 + $0xd8] sm:$0xf]  ;;  %v6870_v0 = vor.u32 %v8495_v50, %v6869_v48 }
 0x28b   : > { %v8642_v3 = vld [vmem:[%s9375_s19 + $0xc14] sm:$0xf]  ;;  %v7314_v62 = vor.u32 %v8602_v53, %v7311_v55  ;;  %4635 = vmatpush.bf16.msrb.mxu0 %v6166_v57  ;;  %4628 = vmatpush.bf16.msrb.mxu3 %v7762_v58  ;;  %v6070_v53 = vor.u32 %v8295_v60, %v6069_v42  ;;  %v6421_v55 = vld [vmem:[%s9375_s19 + $0x3d8] sm:$0xf]  ;;  %v6614_v57 = vor.u32 %v8431_v47, %v6613_v46  ;;  %v4410_v47 = vpop.f32.mrf.mxu2 }
 0x28c   : > { %v7471_v6 = vld [vmem:[%s9375_s19 + $0xc30] sm:$0xf0]  ;;  %v8423_v58 = vld [vmem:[%s9375_s19 + $0x534] sm:$0xf0]  ;;  %v6038_v45 = vor.u32 %v8287_v63, %v6037_v61 }
 0x28d   : > { %v8706_v10 = vld [vmem:[%s9375_s19 + $0xe14] sm:$0xf]  ;;  %v7474_v18 = vor.u32 %v8642_v3, %v7471_v6  ;;  %4600 = vmatpush.bf16.msra.mxu1 %v7314_v62  ;;  %v4384_v6 = vpop.f32.mrf.mxu0  ;;  %v6582_v15 = vor.u32 %v8423_v58, %v6581_v5  ;;  %v8367_v26 = vld [vmem:[%s9375_s19 + $0x374] sm:$0xf0] }
 0x28e   : > { %v7727_v11 = vld [vmem:[%s9375_s19 + $0xe30] sm:$0xf0]  ;;  %v10382_v62 = vadd.f32 %v4384_v6, %v4372_v33  ;;  %v8271_v29 = vld [vmem:[%s9375_s19 + $0x74] sm:$0xf0] }
 0x28f   : > { %v8594_v59 = vld [vmem:[%s9375_s19 + $0xa94] sm:$0xf]  ;;  %v7730_v20 = vor.u32 %v8706_v10, %v7727_v11  ;;  %4636 = vmatpush.bf16.msrb.mxu0 %v6134_v17  ;;  %4616 = vmatpush.bf16.msrb.mxu2 %v7474_v18  ;;  %v6422_v10 = vor.u32 %v8383_v56, %v6421_v55  ;;  %v6837_v11 = vld [vmem:[%s9375_s19 + $0x718] sm:$0xf] }
 0x290   : > { %v7279_v16 = vld [vmem:[%s9375_s19 + $0xab0] sm:$0xf0]  ;;  %v6838_v4 = vor.u32 %v8487_v12, %v6837_v11  ;;  %v6549_v17 = vld [vmem:[%s9375_s19 + $0x4d8] sm:$0xf]  ;;  %v4397_v11 = vpop.f32.mrf.mxu1 }
 0x291   : > { %v7282_v28 = vor.u32 %v8594_v59, %v7279_v16  ;;  %v8586_v37 = vld [vmem:[%s9375_s19 + $0xa54] sm:$0xf]  ;;  %4629 = vmatpush.bf16.msrb.mxu3 %v7730_v20  ;;  %v6005_v59 = vld [vmem:[%s9375_s19 + $0x98] sm:$0xf] }
 0x292   : > { %v7247_v34 = vld [vmem:[%s9375_s19 + $0xa70] sm:$0xf0]  ;;  %4617 = vmatmul.bf16.vlgmr.msrb.gmra.mxu2 %v9672_v8  ;;  %v8279_v16 = vld [vmem:[%s9375_s19 + $0xb4] sm:$0xf0] }
 0x293   : > { %4661 = vmatpush.bf16.msra.mxu2 %v6678_v23  ;;  %4601 = vmatpush.bf16.msra.mxu1 %v7282_v28  ;;  %v7250_v54 = vor.u32 %v8586_v37, %v7247_v34  ;;  %v8578_v51 = vld [vmem:[%s9375_s19 + $0xa14] sm:$0xf]  ;;  %v8415_v18 = vld [vmem:[%s9375_s19 + $0x4f4] sm:$0xf0]  ;;  %v6006_v24 = vor.u32 %v8279_v16, %v6005_v59  ;;  %v6358_v37 = vor.u32 %v8367_v26, %v6357_v25 }
 0x294   : > { %v7215_v52 = vld [vmem:[%s9375_s19 + $0xa30] sm:$0xf0]  ;;  %4630 = vmatmul.bf16.vlgmr.msrb.gmra.mxu3 %v9674_v9  ;;  %4637 = vmatpush.bf16.msrb.mxu0 %v6102_v38  ;;  %v6805_v20 = vld [vmem:[%s9375_s19 + $0x6d8] sm:$0xf] }
 0x295   : > { %4674 = vmatpush.bf16.msra.mxu3 %v6934_v27  ;;  %v7218_v3 = vor.u32 %v8578_v51, %v7215_v52  ;;  %v8479_v23 = vld [vmem:[%s9375_s19 + $0x6f4] sm:$0xf0]  ;;  %v6550_v27 = vor.u32 %v8415_v18, %v6549_v17  ;;  %v4386_v36 = vpop.f32.mrf.mxu0 }
 0x296   : > { %v5973_v28 = vld [vmem:[%s9375_s19 + $0x58] sm:$0xf]  ;;  %v6806_v30 = vor.u32 %v8479_v23, %v6805_v20 }
 0x297   : > { %4662 = vmatpush.bf16.msra.mxu2 %v6646_v41  ;;  %4602 = vmatpush.bf16.msra.mxu1 %v7250_v54  ;;  %v6517_v32 = vld [vmem:[%s9375_s19 + $0x498] sm:$0xf]  ;;  %v5974_v40 = vor.u32 %v8271_v29, %v5973_v28 }
 0x298   : > { %4638 = vmatpush.bf16.msrb.mxu0 %v6070_v53  ;;  %v8407_v33 = vld [vmem:[%s9375_s19 + $0x4b4] sm:$0xf0]  ;;  %v4423_v53 = vpop.f32.mrf.mxu3 }
 0x299   : > { %4675 = vmatpush.bf16.msra.mxu3 %v6902_v43  ;;  %v6773_v34 = vld [vmem:[%s9375_s19 + $0x698] sm:$0xf]  ;;  %v6518_v60 = vor.u32 %v8407_v33, %v6517_v32 }
 0x29a   : > { %v8471_v38 = vld [vmem:[%s9375_s19 + $0x6b4] sm:$0xf0] }
 0x29b   : > { %4663 = vmatpush.bf16.msra.mxu2 %v6614_v57  ;;  %4603 = vmatpush.bf16.msra.mxu1 %v7218_v3  ;;  %v6325_v41 = vld [vmem:[%s9375_s19 + $0x318] sm:$0xf]  ;;  %v6774_v48 = vor.u32 %v8471_v38, %v6773_v34 }
 0x29c   : > { %4639 = vmatpush.bf16.msrb.mxu0 %v6038_v45  ;;  %v8359_v42 = vld [vmem:[%s9375_s19 + $0x334] sm:$0xf0] }
 0x29d   : > { %4676 = vmatpush.bf16.msra.mxu3 %v6870_v0  ;;  %v5941_v43 = vld [vmem:[%s9375_s19 + $0x18] sm:$0xf]  ;;  %v6326_v55 = vor.u32 %v8359_v42, %v6325_v41 }
 0x29e   : > { %4604 = vmatmul.bf16.vlgmr.msra.gmra.mxu1 %v9701_v49  ;;  %v8263_v54 = vld [vmem:[%s9375_s19 + $0x34] sm:$0xf0] }
 0x29f   : > { %4648 = vmatpush.bf16.msrb.mxu1 %v6422_v10  ;;  %4664 = vmatpush.bf16.msra.mxu2 %v6582_v15  ;;  %v7189_v46 = vld [vmem:[%s9375_s19 + $0x9d8] sm:$0xf]  ;;  %v5942_v61 = vor.u32 %v8263_v54, %v5941_v43  ;;  %v4398_v15 = vadd.f32 %v4397_v11, %v10382_v62  ;;  %v4412_v62 = vpop.f32.mrf.mxu2  ;;  %v4399_v43 = vpop.f32.mrf.mxu1 }
 0x2a0   : > { %4640 = vmatpush.bf16.msrb.mxu0 %v6006_v24  ;;  %v8575_v50 = vld [vmem:[%s9375_s19 + $0x9f4] sm:$0xf0]  ;;  %v4425_v32 = vpop.f32.mrf.mxu3  ;;  %v1439_v43 = vperm.slane %v10327_v31, 4 }
 0x2a1   : > { %4677 = vmatpush.bf16.msra.mxu3 %v6838_v4  ;;  %v6485_v51 = vld [vmem:[%s9375_s19 + $0x458] sm:$0xf]  ;;  %v7190_v3 = vor.u32 %v8575_v50, %v7189_v46  ;;  %v4411_v23 = vadd.f32 %v4410_v47, %v4398_v15 }
 0x2a2   : > { %v8399_v52 = vld [vmem:[%s9375_s19 + $0x474] sm:$0xf0] }
 0x2a3   : > { %4649 = vmatpush.bf16.msrb.mxu1 %v6390_v19  ;;  %4665 = vmatpush.bf16.msra.mxu2 %v6550_v27  ;;  %v6741_v56 = vld [vmem:[%s9375_s19 + $0x658] sm:$0xf]  ;;  %v6486_v5 = vor.u32 %v8399_v52, %v6485_v51 }
 0x2a4   : > { %v8463_v57 = vld [vmem:[%s9375_s19 + $0x674] sm:$0xf0]  ;;  %4641 = vmatpush.bf16.msrb.mxu0 %v5974_v40 }
 0x2a5   : > { %4678 = vmatpush.bf16.msra.mxu3 %v6806_v30  ;;  %v6293_v63 = vld [vmem:[%s9375_s19 + $0x2d8] sm:$0xf]  ;;  %v6742_v12 = vor.u32 %v8463_v57, %v6741_v56  ;;  %v10428_v30 = vadd.f32 %v4423_v53, %v4411_v23 }
 0x2a6   : > { %v8351_v0 = vld [vmem:[%s9375_s19 + $0x2f4] sm:$0xf0] }
 0x2a7   : > { %4650 = vmatpush.bf16.msrb.mxu1 %v6358_v37  ;;  %4666 = vmatpush.bf16.msra.mxu2 %v6518_v60  ;;  %v7157_v58 = vld [vmem:[%s9375_s19 + $0x998] sm:$0xf]  ;;  %v6294_v59 = vor.u32 %v8351_v0, %v6293_v63 }
 0x2a8   : > { %v8567_v6 = vld [vmem:[%s9375_s19 + $0x9b4] sm:$0xf0]  ;;  %4642 = vmatpush.bf16.msrb.mxu0 %v5942_v61 }
 0x2a9   : > { %v6453_v10 = vld [vmem:[%s9375_s19 + $0x418] sm:$0xf]  ;;  %4679 = vmatpush.bf16.msra.mxu3 %v6774_v48  ;;  %v7158_v24 = vor.u32 %v8567_v6, %v7157_v58 }
 0x2aa   : > { %v8391_v45 = vld [vmem:[%s9375_s19 + $0x434] sm:$0xf0] }
 0x2ab   : > { %v6709_v13 = vld [vmem:[%s9375_s19 + $0x618] sm:$0xf]  ;;  %4651 = vmatpush.bf16.msrb.mxu1 %v6326_v55  ;;  %4667 = vmatpush.bf16.msra.mxu2 %v6486_v5  ;;  %v6454_v25 = vor.u32 %v8391_v45, %v6453_v10  ;;  %v10453_v45 = vpop.f32.mrf.mxu0 }
 0x2ac   : > { %v8455_v14 = vld [vmem:[%s9375_s19 + $0x634] sm:$0xf0]  ;;  %4687 = vmatpush.bf16.msra.mxu0 %v7190_v3 }
 0x2ad   : > { %v7701_v16 = vld [vmem:[%s9375_s19 + $0xdd8] sm:$0xf]  ;;  %4680 = vmatpush.bf16.msra.mxu3 %v6742_v12  ;;  %v6710_v26 = vor.u32 %v8455_v14, %v6709_v13  ;;  %4643 = vmatmul.bf16.vlgmr.msrb.gmra.mxu0 %v9614_v44 }
 0x2ae   : > { %v8703_v4 = vld [vmem:[%s9375_s19 + $0xdf4] sm:$0xf0] }
 0x2af   : > { %v7957_v17 = vld [vmem:[%s9375_s19 + $0xfd8] sm:$0xf]  ;;  %v7702_v27 = vor.u32 %v8703_v4, %v7701_v16  ;;  %4652 = vmatpush.bf16.msrb.mxu1 %v6294_v59  ;;  %4668 = vmatpush.bf16.msra.mxu2 %v6454_v25 }
 0x2b0   : > { %v8767_v18 = vld [vmem:[%s9375_s19 + $0xff4] sm:$0xf0]  ;;  %4688 = vmatpush.bf16.msra.mxu0 %v7158_v24 }
 0x2b1   : > { %v6261_v19 = vld [vmem:[%s9375_s19 + $0x298] sm:$0xf]  ;;  %v7958_v33 = vor.u32 %v8767_v18, %v7957_v17  ;;  %4681 = vmatpush.bf16.msra.mxu3 %v6710_v26 }
 0x2b2   : > { %v8343_v20 = vld [vmem:[%s9375_s19 + $0x2b4] sm:$0xf0]  ;;  %4669 = vmatmul.bf16.vlgmr.msra.gmra.mxu2 %v9627_v1 }
 0x2b3   : > { %v7125_v28 = vld [vmem:[%s9375_s19 + $0x958] sm:$0xf]  ;;  %v6262_v36 = vor.u32 %v8343_v20, %v6261_v19  ;;  %4713 = vmatpush.bf16.msrb.mxu2 %v7702_v27 }
 0x2b4   : > { %v8559_v29 = vld [vmem:[%s9375_s19 + $0x974] sm:$0xf0]  ;;  %4682 = vmatmul.bf16.vlgmr.msra.gmra.mxu3 %v9629_v2 }
 0x2b5   : > { %v7669_v37 = vld [vmem:[%s9375_s19 + $0xd98] sm:$0xf]  ;;  %v7126_v60 = vor.u32 %v8559_v29, %v7125_v28  ;;  %4726 = vmatpush.bf16.msrb.mxu3 %v7958_v33  ;;  %4653 = vmatpush.bf16.msrb.mxu1 %v6262_v36 }
 0x2b6   : > { %v8695_v34 = vld [vmem:[%s9375_s19 + $0xdb4] sm:$0xf0] }
 0x2b7   : > { %v7925_v38 = vld [vmem:[%s9375_s19 + $0xf98] sm:$0xf]  ;;  %v7670_v54 = vor.u32 %v8695_v34, %v7669_v37  ;;  %4689 = vmatpush.bf16.msra.mxu0 %v7126_v60 }
 0x2b8   : > { %v8759_v40 = vld [vmem:[%s9375_s19 + $0xfb4] sm:$0xf0] }
 0x2b9   : > { %v6229_v41 = vld [vmem:[%s9375_s19 + $0x258] sm:$0xf]  ;;  %v7926_v48 = vor.u32 %v8759_v40, %v7925_v38  ;;  %4714 = vmatpush.bf16.msrb.mxu2 %v7670_v54  ;;  %v4438_v40 = vpop.f32.mrf.mxu0 }
 0x2ba   : > { %v8335_v42 = vld [vmem:[%s9375_s19 + $0x274] sm:$0xf0] }
 0x2bb   : > { %v7093_v46 = vld [vmem:[%s9375_s19 + $0x918] sm:$0xf]  ;;  %v6230_v50 = vor.u32 %v8335_v42, %v6229_v41  ;;  %4727 = vmatpush.bf16.msrb.mxu3 %v7926_v48 }
 0x2bc   : > { %v8551_v47 = vld [vmem:[%s9375_s19 + $0x934] sm:$0xf0] }
 0x2bd   : > { %v7637_v51 = vld [vmem:[%s9375_s19 + $0xd58] sm:$0xf]  ;;  %v7094_v61 = vor.u32 %v8551_v47, %v7093_v46  ;;  %4654 = vmatpush.bf16.msrb.mxu1 %v6230_v50 }
 0x2be   : > { %v8687_v52 = vld [vmem:[%s9375_s19 + $0xd74] sm:$0xf0] }
 0x2bf   : > { %v7893_v53 = vld [vmem:[%s9375_s19 + $0xf58] sm:$0xf]  ;;  %v7638_v3 = vor.u32 %v8687_v52, %v7637_v51  ;;  %4690 = vmatpush.bf16.msra.mxu0 %v7094_v61  ;;  %v8315_v52 = vld [vmem:[%s9375_s19 + $0x1dc] sm:$0xf]  ;;  %v4475_v61 = vpop.f32.mrf.mxu3 }
 0x2c0   : > { %v8751_v55 = vld [vmem:[%s9375_s19 + $0xf74] sm:$0xf0] }
 0x2c1   : > { %v6197_v56 = vld [vmem:[%s9375_s19 + $0x218] sm:$0xf]  ;;  %v7894_v6 = vor.u32 %v8751_v55, %v7893_v53  ;;  %4715 = vmatpush.bf16.msrb.mxu2 %v7638_v3  ;;  %v4462_v53 = vpop.f32.mrf.mxu2 }
 0x2c2   : > { %v8327_v57 = vld [vmem:[%s9375_s19 + $0x234] sm:$0xf0] }
 0x2c3   : > { %v7445_v63 = vld [vmem:[%s9375_s19 + $0xbd8] sm:$0xf]  ;;  %v6198_v10 = vor.u32 %v8327_v57, %v6197_v56  ;;  %4728 = vmatpush.bf16.msrb.mxu3 %v7894_v6  ;;  %v6167_v56 = vld [vmem:[%s9375_s19 + $0x1f8] sm:$0xf0] }
 0x2c4   : > { %v8639_v0 = vld [vmem:[%s9375_s19 + $0xbf4] sm:$0xf0] }
 0x2c5   : > { %v7061_v5 = vld [vmem:[%s9375_s19 + $0x8d8] sm:$0xf]  ;;  %v7446_v13 = vor.u32 %v8639_v0, %v7445_v63  ;;  %4655 = vmatpush.bf16.msrb.mxu1 %v6198_v10  ;;  %v4437_v10 = vadd.f32 %v10453_v45, %v1439_v43  ;;  %v8499_v43 = vld [vmem:[%s9375_s19 + $0x79c] sm:$0xf] }
 0x2c6   : > { %v8543_v58 = vld [vmem:[%s9375_s19 + $0x8f4] sm:$0xf0] }
 0x2c7   : > { %v7605_v11 = vld [vmem:[%s9375_s19 + $0xd18] sm:$0xf]  ;;  %v7062_v59 = vor.u32 %v8543_v58, %v7061_v5 }
 0x2c8   : > { %v8679_v12 = vld [vmem:[%s9375_s19 + $0xd34] sm:$0xf0]  ;;  %4656 = vmatmul.bf16.vlgmr.msrb.gmra.mxu1 %v9655_v39 }
 0x2c9   : > { %v7861_v14 = vld [vmem:[%s9375_s19 + $0xf18] sm:$0xf]  ;;  %v7606_v17 = vor.u32 %v8679_v12, %v7605_v11  ;;  %4700 = vmatpush.bf16.msra.mxu1 %v7446_v13  ;;  %4691 = vmatpush.bf16.msra.mxu0 %v7062_v59  ;;  %v6170_v11 = vor.u32 %v8315_v52, %v6167_v56  ;;  %v8307_v13 = vld [vmem:[%s9375_s19 + $0x19c] sm:$0xf]  ;;  %v4449_v59 = vpop.f32.mrf.mxu1 }
 0x2ca   : > { %v8743_v15 = vld [vmem:[%s9375_s19 + $0xf34] sm:$0xf0] }
 0x2cb   : > { %v7413_v16 = vld [vmem:[%s9375_s19 + $0xb98] sm:$0xf]  ;;  %v7862_v20 = vor.u32 %v8743_v15, %v7861_v14  ;;  %4716 = vmatpush.bf16.msrb.mxu2 %v7606_v17  ;;  %v6135_v14 = vld [vmem:[%s9375_s19 + $0x1b8] sm:$0xf0] }
 0x2cc   : > { %v8631_v4 = vld [vmem:[%s9375_s19 + $0xbb4] sm:$0xf0] }
 0x2cd   : > { %v7029_v18 = vld [vmem:[%s9375_s19 + $0x898] sm:$0xf]  ;;  %v7414_v25 = vor.u32 %v8631_v4, %v7413_v16  ;;  %4729 = vmatpush.bf16.msrb.mxu3 %v7862_v20  ;;  %v8443_v20 = vld [vmem:[%s9375_s19 + $0x5dc] sm:$0xf] }
 0x2ce   : > { %v8535_v19 = vld [vmem:[%s9375_s19 + $0x8b4] sm:$0xf0] }
 0x2cf   : > { %v7573_v23 = vld [vmem:[%s9375_s19 + $0xcd8] sm:$0xf]  ;;  %v7030_v27 = vor.u32 %v8535_v19, %v7029_v18  ;;  %4701 = vmatpush.bf16.msra.mxu1 %v7414_v25  ;;  %v4450_v19 = vadd.f32 %v4449_v59, %v4437_v10  ;;  %v6935_v25 = vld [vmem:[%s9375_s19 + $0x7f8] sm:$0xf0] }
 0x2d0   : > { %v8671_v24 = vld [vmem:[%s9375_s19 + $0xcf4] sm:$0xf0]  ;;  %v6423_v10 = vld [vmem:[%s9375_s19 + $0x3f8] sm:$0xf0] }
 0x2d1   : > { %v7829_v62 = vld [vmem:[%s9375_s19 + $0xed8] sm:$0xf]  ;;  %v7574_v32 = vor.u32 %v8671_v24, %v7573_v23  ;;  %4692 = vmatpush.bf16.msra.mxu0 %v7030_v27  ;;  %v6679_v23 = vld [vmem:[%s9375_s19 + $0x5f8] sm:$0xf0]  ;;  %v4463_v27 = vadd.f32 %v4462_v53, %v4450_v19 }
 0x2d2   : > { %v8735_v26 = vld [vmem:[%s9375_s19 + $0xef4] sm:$0xf0]  ;;  %v8507_v24 = vld [vmem:[%s9375_s19 + $0x7dc] sm:$0xf] }
 0x2d3   : > { %v7381_v28 = vld [vmem:[%s9375_s19 + $0xb58] sm:$0xf]  ;;  %v7830_v37 = vor.u32 %v8735_v26, %v7829_v62  ;;  %4717 = vmatpush.bf16.msrb.mxu2 %v7574_v32  ;;  %v4464_v32 = vpop.f32.mrf.mxu2  ;;  %v6938_v40 = vor.u32 %v8507_v24, %v6935_v25  ;;  %v8291_v53 = vld [vmem:[%s9375_s19 + $0x11c] sm:$0xf] }
 0x2d4   : > { %v8623_v29 = vld [vmem:[%s9375_s19 + $0xb74] sm:$0xf0]  ;;  %v8419_v59 = vld [vmem:[%s9375_s19 + $0x51c] sm:$0xf] }
 0x2d5   : > { %v6997_v33 = vld [vmem:[%s9375_s19 + $0x858] sm:$0xf]  ;;  %v7382_v41 = vor.u32 %v8623_v29, %v7381_v28  ;;  %4730 = vmatpush.bf16.msrb.mxu3 %v7830_v37  ;;  %v6138_v28 = vor.u32 %v8307_v13, %v6135_v14  ;;  %v8299_v37 = vld [vmem:[%s9375_s19 + $0x15c] sm:$0xf] }
 0x2d6   : > { %v8527_v36 = vld [vmem:[%s9375_s19 + $0x874] sm:$0xf0]  ;;  %v6039_v13 = vld [vmem:[%s9375_s19 + $0xf8] sm:$0xf0] }
 0x2d7   : > { %v7541_v34 = vld [vmem:[%s9375_s19 + $0xc98] sm:$0xf]  ;;  %v6998_v54 = vor.u32 %v8527_v36, %v6997_v33  ;;  %4702 = vmatpush.bf16.msra.mxu1 %v7382_v41  ;;  %v6682_v36 = vor.u32 %v8443_v20, %v6679_v23  ;;  %v6839_v19 = vld [vmem:[%s9375_s19 + $0x738] sm:$0xf0] }
 0x2d8   : > { %v8663_v38 = vld [vmem:[%s9375_s19 + $0xcb4] sm:$0xf0]  ;;  %v8371_v23 = vld [vmem:[%s9375_s19 + $0x39c] sm:$0xf] }
 0x2d9   : > { %v7797_v42 = vld [vmem:[%s9375_s19 + $0xe98] sm:$0xf]  ;;  %v7542_v48 = vor.u32 %v8663_v38, %v7541_v34  ;;  %4693 = vmatpush.bf16.msra.mxu0 %v6998_v54  ;;  %v6103_v34 = vld [vmem:[%s9375_s19 + $0x178] sm:$0xf0]  ;;  %v4477_v38 = vpop.f32.mrf.mxu3  ;;  %v4476_v54 = vadd.f32 %v4475_v61, %v4463_v27 }
 0x2da   : > { %v8727_v60 = vld [vmem:[%s9375_s19 + $0xeb4] sm:$0xf0]  ;;  %v6615_v61 = vld [vmem:[%s9375_s19 + $0x578] sm:$0xf0] }
 0x2db   : > { %v7349_v46 = vld [vmem:[%s9375_s19 + $0xb18] sm:$0xf]  ;;  %v7798_v55 = vor.u32 %v8727_v60, %v7797_v42  ;;  %4718 = vmatpush.bf16.msrb.mxu2 %v7542_v48  ;;  %v8435_v42 = vld [vmem:[%s9375_s19 + $0x59c] sm:$0xf] }
 0x2dc   : > { %v8615_v47 = vld [vmem:[%s9375_s19 + $0xb34] sm:$0xf0]  ;;  %v6647_v60 = vld [vmem:[%s9375_s19 + $0x5b8] sm:$0xf0] }
 0x2dd   : > { %v6965_v50 = vld [vmem:[%s9375_s19 + $0x818] sm:$0xf]  ;;  %v7350_v63 = vor.u32 %v8615_v47, %v7349_v46  ;;  %4731 = vmatpush.bf16.msrb.mxu3 %v7798_v55  ;;  %v6903_v46 = vld [vmem:[%s9375_s19 + $0x7b8] sm:$0xf0]  ;;  %v6650_v52 = vor.u32 %v8435_v42, %v6647_v60 }
 0x2de   : > { %v8519_v51 = vld [vmem:[%s9375_s19 + $0x834] sm:$0xf0]  ;;  %v6071_v55 = vld [vmem:[%s9375_s19 + $0x138] sm:$0xf0]  ;;  %v6906_v56 = vor.u32 %v8499_v43, %v6903_v46 }
 0x2df   : > { %v7509_v57 = vld [vmem:[%s9375_s19 + $0xc58] sm:$0xf]  ;;  %v6966_v5 = vor.u32 %v8519_v51, %v6965_v50  ;;  %4703 = vmatpush.bf16.msra.mxu1 %v7350_v63  ;;  %v6106_v50 = vor.u32 %v8299_v37, %v6103_v34  ;;  %v4451_v51 = vpop.f32.mrf.mxu1  ;;  %v8491_v63 = vld [vmem:[%s9375_s19 + $0x75c] sm:$0xf] }
 0x2e0   : > { %v8655_v31 = vld [vmem:[%s9375_s19 + $0xc74] sm:$0xf0]  ;;  %v6391_v24 = vld [vmem:[%s9375_s19 + $0x3b8] sm:$0xf0] }
 0x2e1   : > { %v7765_v0 = vld [vmem:[%s9375_s19 + $0xe58] sm:$0xf]  ;;  %v7510_v12 = vor.u32 %v8655_v31, %v7509_v57  ;;  %4694 = vmatpush.bf16.msra.mxu0 %v6966_v5  ;;  %v8427_v31 = vld [vmem:[%s9375_s19 + $0x55c] sm:$0xf]  ;;  %v6394_v32 = vor.u32 %v8371_v23, %v6391_v24 }
 0x2e2   : > { %v8719_v3 = vld [vmem:[%s9375_s19 + $0xe74] sm:$0xf0]  ;;  %v8363_v34 = vld [vmem:[%s9375_s19 + $0x35c] sm:$0xf] }
 0x2e3   : > { %v7317_v58 = vld [vmem:[%s9375_s19 + $0xad8] sm:$0xf]  ;;  %v7766_v16 = vor.u32 %v8719_v3, %v7765_v0  ;;  %4719 = vmatpush.bf16.msrb.mxu2 %v7510_v12  ;;  %v6871_v0 = vld [vmem:[%s9375_s19 + $0x778] sm:$0xf0] }
 0x2e4   : > { %v8607_v6 = vld [vmem:[%s9375_s19 + $0xaf4] sm:$0xf0]  ;;  %4695 = vmatmul.bf16.vlgmr.msra.gmra.mxu0 %v9650_v35  ;;  %v8283_v12 = vld [vmem:[%s9375_s19 + $0xdc] sm:$0xf]  ;;  %v6874_v14 = vor.u32 %v8491_v63, %v6871_v0 }
 0x2e5   : > { %v7477_v15 = vld [vmem:[%s9375_s19 + $0xc18] sm:$0xf]  ;;  %v7318_v45 = vor.u32 %v8607_v6, %v7317_v58  ;;  %4739 = vmatpush.bf16.msrb.mxu0 %v6170_v11  ;;  %4732 = vmatpush.bf16.msrb.mxu3 %v7766_v16  ;;  %v6074_v58 = vor.u32 %v8291_v53, %v6071_v55  ;;  %v8379_v6 = vld [vmem:[%s9375_s19 + $0x3dc] sm:$0xf]  ;;  %v6618_v11 = vor.u32 %v8427_v31, %v6615_v61  ;;  %v4514_v61 = vpop.f32.mrf.mxu2 }
 0x2e6   : > { %v8647_v4 = vld [vmem:[%s9375_s19 + $0xc34] sm:$0xf0]  ;;  %v6583_v16 = vld [vmem:[%s9375_s19 + $0x538] sm:$0xf0]  ;;  %v6042_v20 = vor.u32 %v8283_v12, %v6039_v13 }
 0x2e7   : > { %v7733_v17 = vld [vmem:[%s9375_s19 + $0xe18] sm:$0xf]  ;;  %v7478_v29 = vor.u32 %v8647_v4, %v7477_v15  ;;  %4704 = vmatpush.bf16.msra.mxu1 %v7318_v45  ;;  %v4488_v4 = vpop.f32.mrf.mxu0  ;;  %v6586_v25 = vor.u32 %v8419_v59, %v6583_v16  ;;  %v6359_v38 = vld [vmem:[%s9375_s19 + $0x378] sm:$0xf0] }
 0x2e8   : > { %v8711_v18 = vld [vmem:[%s9375_s19 + $0xe34] sm:$0xf0]  ;;  %v10527_v45 = vadd.f32 %v4488_v4, %v4476_v54  ;;  %v5975_v42 = vld [vmem:[%s9375_s19 + $0x78] sm:$0xf0] }
 0x2e9   : > { %v7285_v62 = vld [vmem:[%s9375_s19 + $0xa98] sm:$0xf]  ;;  %v7734_v33 = vor.u32 %v8711_v18, %v7733_v17  ;;  %4740 = vmatpush.bf16.msrb.mxu0 %v6138_v28  ;;  %4720 = vmatpush.bf16.msrb.mxu2 %v7478_v29  ;;  %v6426_v17 = vor.u32 %v8379_v6, %v6423_v10  ;;  %v8483_v18 = vld [vmem:[%s9375_s19 + $0x71c] sm:$0xf] }
 0x2ea   : > { %v8599_v26 = vld [vmem:[%s9375_s19 + $0xab4] sm:$0xf0]  ;;  %v6842_v27 = vor.u32 %v8483_v18, %v6839_v19  ;;  %v8411_v28 = vld [vmem:[%s9375_s19 + $0x4dc] sm:$0xf]  ;;  %v4501_v18 = vpop.f32.mrf.mxu1 }
 0x2eb   : > { %v7286_v41 = vor.u32 %v8599_v26, %v7285_v62  ;;  %v7253_v47 = vld [vmem:[%s9375_s19 + $0xa58] sm:$0xf]  ;;  %4733 = vmatpush.bf16.msrb.mxu3 %v7734_v33  ;;  %v8275_v62 = vld [vmem:[%s9375_s19 + $0x9c] sm:$0xf] }
 0x2ec   : > { %v8591_v48 = vld [vmem:[%s9375_s19 + $0xa74] sm:$0xf0]  ;;  %4721 = vmatmul.bf16.vlgmr.msrb.gmra.mxu2 %v9672_v8  ;;  %v6007_v26 = vld [vmem:[%s9375_s19 + $0xb8] sm:$0xf0] }
 0x2ed   : > { %4765 = vmatpush.bf16.msra.mxu2 %v6682_v36  ;;  %4705 = vmatpush.bf16.msra.mxu1 %v7286_v41  ;;  %v7254_v57 = vor.u32 %v8591_v48, %v7253_v47  ;;  %v7221_v3 = vld [vmem:[%s9375_s19 + $0xa18] sm:$0xf]  ;;  %v6551_v29 = vld [vmem:[%s9375_s19 + $0x4f8] sm:$0xf0]  ;;  %v6010_v37 = vor.u32 %v8275_v62, %v6007_v26  ;;  %v6362_v47 = vor.u32 %v8363_v34, %v6359_v38 }
 0x2ee   : > { %v8583_v5 = vld [vmem:[%s9375_s19 + $0xa34] sm:$0xf0]  ;;  %4734 = vmatmul.bf16.vlgmr.msrb.gmra.mxu3 %v9674_v9  ;;  %4741 = vmatpush.bf16.msrb.mxu0 %v6106_v50  ;;  %v8475_v33 = vld [vmem:[%s9375_s19 + $0x6dc] sm:$0xf] }
 0x2ef   : > { %4778 = vmatpush.bf16.msra.mxu3 %v6938_v40  ;;  %v7222_v15 = vor.u32 %v8583_v5, %v7221_v3  ;;  %v6807_v36 = vld [vmem:[%s9375_s19 + $0x6f8] sm:$0xf0]  ;;  %v6554_v40 = vor.u32 %v8411_v28, %v6551_v29  ;;  %v4490_v46 = vpop.f32.mrf.mxu0 }
 0x2f0   : > { %v8267_v41 = vld [vmem:[%s9375_s19 + $0x5c] sm:$0xf]  ;;  %v6810_v60 = vor.u32 %v8475_v33, %v6807_v36 }
 0x2f1   : > { %4766 = vmatpush.bf16.msra.mxu2 %v6650_v52  ;;  %4706 = vmatpush.bf16.msra.mxu1 %v7254_v57  ;;  %v8403_v43 = vld [vmem:[%s9375_s19 + $0x49c] sm:$0xf]  ;;  %v5978_v51 = vor.u32 %v8267_v41, %v5975_v42 }
 0x2f2   : > { %4742 = vmatpush.bf16.msrb.mxu0 %v6074_v58  ;;  %v6519_v54 = vld [vmem:[%s9375_s19 + $0x4b8] sm:$0xf0]  ;;  %v4527_v58 = vpop.f32.mrf.mxu3 }
 0x2f3   : > { %4779 = vmatpush.bf16.msra.mxu3 %v6906_v56  ;;  %v8467_v48 = vld [vmem:[%s9375_s19 + $0x69c] sm:$0xf]  ;;  %v6522_v55 = vor.u32 %v8403_v43, %v6519_v54 }
 0x2f4   : > { %v6775_v50 = vld [vmem:[%s9375_s19 + $0x6b8] sm:$0xf0] }
 0x2f5   : > { %4767 = vmatpush.bf16.msra.mxu2 %v6618_v11  ;;  %4707 = vmatpush.bf16.msra.mxu1 %v7222_v15  ;;  %v8355_v52 = vld [vmem:[%s9375_s19 + $0x31c] sm:$0xf]  ;;  %v6778_v63 = vor.u32 %v8467_v48, %v6775_v50 }
 0x2f6   : > { %4743 = vmatpush.bf16.msrb.mxu0 %v6042_v20  ;;  %v6327_v53 = vld [vmem:[%s9375_s19 + $0x338] sm:$0xf0] }
 0x2f7   : > { %4780 = vmatpush.bf16.msra.mxu3 %v6874_v14  ;;  %v8259_v56 = vld [vmem:[%s9375_s19 + $0x1c] sm:$0xf]  ;;  %v6330_v6 = vor.u32 %v8355_v52, %v6327_v53 }
 0x2f8   : > { %4708 = vmatmul.bf16.vlgmr.msra.gmra.mxu1 %v9701_v49  ;;  %v5943_v57 = vld [vmem:[%s9375_s19 + $0x38] sm:$0xf0] }
 0x2f9   : > { %4752 = vmatpush.bf16.msrb.mxu1 %v6426_v17  ;;  %4768 = vmatpush.bf16.msra.mxu2 %v6586_v25  ;;  %v8571_v31 = vld [vmem:[%s9375_s19 + $0x9dc] sm:$0xf]  ;;  %v5946_v12 = vor.u32 %v8259_v56, %v5943_v57  ;;  %v4502_v25 = vadd.f32 %v4501_v18, %v10527_v45  ;;  %v4516_v45 = vpop.f32.mrf.mxu2 }
 0x2fa   : > { %4744 = vmatpush.bf16.msrb.mxu0 %v6010_v37  ;;  %v7191_v0 = vld [vmem:[%s9375_s19 + $0x9f8] sm:$0xf0]  ;;  %v4529_v43 = vpop.f32.mrf.mxu3 }
 0x2fb   : > { %4781 = vmatpush.bf16.msra.mxu3 %v6842_v27  ;;  %v8395_v3 = vld [vmem:[%s9375_s19 + $0x45c] sm:$0xf]  ;;  %v7194_v15 = vor.u32 %v8571_v31, %v7191_v0  ;;  %v4515_v36 = vadd.f32 %v4514_v61, %v4502_v25 }
 0x2fc   : > { %v6487_v5 = vld [vmem:[%s9375_s19 + $0x478] sm:$0xf0] }
 0x2fd   : > { %4753 = vmatpush.bf16.msrb.mxu1 %v6394_v32  ;;  %4769 = vmatpush.bf16.msra.mxu2 %v6554_v40  ;;  %v8459_v10 = vld [vmem:[%s9375_s19 + $0x65c] sm:$0xf]  ;;  %v6490_v59 = vor.u32 %v8395_v3, %v6487_v5 }
 0x2fe   : > { %v6743_v11 = vld [vmem:[%s9375_s19 + $0x678] sm:$0xf0]  ;;  %4745 = vmatpush.bf16.msrb.mxu0 %v5978_v51 }
 0x2ff   : > { %4782 = vmatpush.bf16.msra.mxu3 %v6810_v60  ;;  %v8347_v13 = vld [vmem:[%s9375_s19 + $0x2dc] sm:$0xf]  ;;  %v6746_v19 = vor.u32 %v8459_v10, %v6743_v11  ;;  %v10573_v60 = vadd.f32 %v4527_v58, %v4515_v36 }
 0x300   : > { %v6295_v14 = vld [vmem:[%s9375_s19 + $0x2f8] sm:$0xf0] }
 0x301   : > { %4754 = vmatpush.bf16.msrb.mxu1 %v6362_v47  ;;  %4770 = vmatpush.bf16.msra.mxu2 %v6522_v55  ;;  %v8563_v16 = vld [vmem:[%s9375_s19 + $0x99c] sm:$0xf]  ;;  %v6298_v62 = vor.u32 %v8347_v13, %v6295_v14 }
 0x302   : > { %v7159_v4 = vld [vmem:[%s9375_s19 + $0x9b8] sm:$0xf0]  ;;  %4746 = vmatpush.bf16.msrb.mxu0 %v5946_v12 }
 0x303   : > { %v8387_v17 = vld [vmem:[%s9375_s19 + $0x41c] sm:$0xf]  ;;  %4783 = vmatpush.bf16.msra.mxu3 %v6778_v63  ;;  %v7162_v37 = vor.u32 %v8563_v16, %v7159_v4 }
 0x304   : > { %v6455_v20 = vld [vmem:[%s9375_s19 + $0x438] sm:$0xf0] }
 0x305   : > { %v8451_v23 = vld [vmem:[%s9375_s19 + $0x61c] sm:$0xf]  ;;  %4755 = vmatpush.bf16.msrb.mxu1 %v6330_v6  ;;  %4771 = vmatpush.bf16.msra.mxu2 %v6490_v59  ;;  %v6458_v34 = vor.u32 %v8387_v17, %v6455_v20  ;;  %v10598_v17 = vpop.f32.mrf.mxu0 }
 0x306   : > { %v6711_v24 = vld [vmem:[%s9375_s19 + $0x638] sm:$0xf0]  ;;  %4791 = vmatpush.bf16.msra.mxu0 %v7194_v15 }
 0x307   : > { %v8699_v26 = vld [vmem:[%s9375_s19 + $0xddc] sm:$0xf]  ;;  %4784 = vmatpush.bf16.msra.mxu3 %v6746_v19  ;;  %v6714_v38 = vor.u32 %v8451_v23, %v6711_v24  ;;  %4747 = vmatmul.bf16.vlgmr.msrb.gmra.mxu0 %v9614_v44  ;;  %v4503_v44 = vpop.f32.mrf.mxu1 }
 0x308   : > { %v7703_v27 = vld [vmem:[%s9375_s19 + $0xdf8] sm:$0xf0] }
 0x309   : > { %v8763_v28 = vld [vmem:[%s9375_s19 + $0xfdc] sm:$0xf]  ;;  %v7706_v40 = vor.u32 %v8699_v26, %v7703_v27  ;;  %4756 = vmatpush.bf16.msrb.mxu1 %v6298_v62  ;;  %4772 = vmatpush.bf16.msra.mxu2 %v6458_v34 }
 0x30a   : > { %v7959_v29 = vld [vmem:[%s9375_s19 + $0xff8] sm:$0xf0]  ;;  %4792 = vmatpush.bf16.msra.mxu0 %v7162_v37 }
 0x30b   : > { %v8339_v32 = vld [vmem:[%s9375_s19 + $0x29c] sm:$0xf]  ;;  %v7962_v54 = vor.u32 %v8763_v28, %v7959_v29  ;;  %4785 = vmatpush.bf16.msra.mxu3 %v6714_v38 }
 0x30c   : > { %v6263_v33 = vld [vmem:[%s9375_s19 + $0x2b8] sm:$0xf0]  ;;  %4773 = vmatmul.bf16.vlgmr.msra.gmra.mxu2 %v9627_v1 }
 0x30d   : > { %v8555_v41 = vld [vmem:[%s9375_s19 + $0x95c] sm:$0xf]  ;;  %v6266_v46 = vor.u32 %v8339_v32, %v6263_v33  ;;  %4817 = vmatpush.bf16.msrb.mxu2 %v7706_v40 }
 0x30e   : > { %v7127_v42 = vld [vmem:[%s9375_s19 + $0x978] sm:$0xf0]  ;;  %4786 = vmatmul.bf16.vlgmr.msra.gmra.mxu3 %v9629_v2 }
 0x30f   : > { %v8691_v47 = vld [vmem:[%s9375_s19 + $0xd9c] sm:$0xf]  ;;  %v7130_v55 = vor.u32 %v8555_v41, %v7127_v42  ;;  %4830 = vmatpush.bf16.msrb.mxu3 %v7962_v54  ;;  %4757 = vmatpush.bf16.msrb.mxu1 %v6266_v46 }
 0x310   : > { %v7671_v48 = vld [vmem:[%s9375_s19 + $0xdb8] sm:$0xf0] }
 0x311   : > { %v8755_v50 = vld [vmem:[%s9375_s19 + $0xf9c] sm:$0xf]  ;;  %v7674_v56 = vor.u32 %v8691_v47, %v7671_v48  ;;  %4793 = vmatpush.bf16.msra.mxu0 %v7130_v55  ;;  %v4542_v47 = vpop.f32.mrf.mxu0  ;;  %v10623_v55 = vld [vmem:[%s9377_s26] sm:$0xff] }
 0x312   : > { %v7927_v51 = vld [vmem:[%s9375_s19 + $0xfb8] sm:$0xf0]  ;;  %v1440_v44 = vperm.slane %v10623_v55, 5 }
 0x313   : > { %v8331_v52 = vld [vmem:[%s9375_s19 + $0x25c] sm:$0xf]  ;;  %v7930_v61 = vor.u32 %v8755_v50, %v7927_v51  ;;  %4818 = vmatpush.bf16.msrb.mxu2 %v7674_v56 }
 0x314   : > { %v6231_v53 = vld [vmem:[%s9375_s19 + $0x278] sm:$0xf0] }
 0x315   : > { %v8547_v57 = vld [vmem:[%s9375_s19 + $0x91c] sm:$0xf]  ;;  %v6234_v63 = vor.u32 %v8331_v52, %v6231_v53  ;;  %4831 = vmatpush.bf16.msrb.mxu3 %v7930_v61  ;;  %v4566_v61 = vpop.f32.mrf.mxu2 }
 0x316   : > { %v7095_v31 = vld [vmem:[%s9375_s19 + $0x938] sm:$0xf0] }
 0x317   : > { %v8683_v0 = vld [vmem:[%s9375_s19 + $0xd5c] sm:$0xf]  ;;  %v7098_v11 = vor.u32 %v8547_v57, %v7095_v31  ;;  %4758 = vmatpush.bf16.msrb.mxu1 %v6234_v63 }
 0x318   : > { %v7639_v3 = vld [vmem:[%s9375_s19 + $0xd78] sm:$0xf0] }
 0x319   : > { %v8747_v5 = vld [vmem:[%s9375_s19 + $0xf5c] sm:$0xf]  ;;  %v7642_v14 = vor.u32 %v8683_v0, %v7639_v3  ;;  %4794 = vmatpush.bf16.msra.mxu0 %v7098_v11 }
 0x31a   : > { %v7895_v58 = vld [vmem:[%s9375_s19 + $0xf78] sm:$0xf0] }
 0x31b   : > { %v8323_v6 = vld [vmem:[%s9375_s19 + $0x21c] sm:$0xf]  ;;  %v7898_v1 = vor.u32 %v8747_v5, %v7895_v58  ;;  %4819 = vmatpush.bf16.msrb.mxu2 %v7642_v14  ;;  %v4579_v5 = vpop.f32.mrf.mxu3  ;;  %v4541_v14 = vadd.f32 %v10598_v17, %v1440_v44  ;;  %v8770_v44 = vld [vmem:[%s10631_s27 + $0x10] sm:$0xff] }
 0x31c   : > { %v6199_v10 = vld [vmem:[%s9375_s19 + $0x238] sm:$0xf0] }
 0x31d   : > { %v8635_v12 = vld [vmem:[%s9375_s19 + $0xbdc] sm:$0xf]  ;;  %v6202_v16 = vor.u32 %v8323_v6, %v6199_v10  ;;  %4832 = vmatpush.bf16.msrb.mxu3 %v7898_v1  ;;  %v4553_v1 = vpop.f32.mrf.mxu1 }
 0x31e   : > { %v7447_v13 = vld [vmem:[%s9375_s19 + $0xbf8] sm:$0xf0] }
 0x31f   : > { %v8539_v15 = vld [vmem:[%s9375_s19 + $0x8dc] sm:$0xf]  ;;  %v7450_v18 = vor.u32 %v8635_v12, %v7447_v13  ;;  %4759 = vmatpush.bf16.msrb.mxu1 %v6202_v16 }
 0x320   : > { %v7063_v59 = vld [vmem:[%s9375_s19 + $0x8f8] sm:$0xf0] }
 0x321   : > { %v8675_v4 = vld [vmem:[%s9375_s19 + $0xd1c] sm:$0xf]  ;;  %v7066_v23 = vor.u32 %v8539_v15, %v7063_v59  ;;  %v8775_v15 = vld [vmem:[%s10631_s27 + $0x38] sm:$0xff] }
 0x322   : > { %v7607_v2 = vld [vmem:[%s9375_s19 + $0xd38] sm:$0xf0]  ;;  %4760 = vmatmul.bf16.vlgmr.msrb.gmra.mxu1 %v9655_v39 }
 0x323   : > { %v8739_v19 = vld [vmem:[%s9375_s19 + $0xf1c] sm:$0xf]  ;;  %v7610_v62 = vor.u32 %v8675_v4, %v7607_v2  ;;  %4804 = vmatpush.bf16.msra.mxu1 %v7450_v18  ;;  %4795 = vmatpush.bf16.msra.mxu0 %v7066_v23  ;;  %v4554_v18 = vadd.f32 %v4553_v1, %v4541_v14  ;;  %v8806_v1 = vld [vmem:[%s10631_s27 + $0x130] sm:$0xff] }
 0x324   : > { %v7863_v20 = vld [vmem:[%s9375_s19 + $0xf38] sm:$0xf0] }
 0x325   : > { %v8627_v24 = vld [vmem:[%s9375_s19 + $0xb9c] sm:$0xf]  ;;  %v7866_v28 = vor.u32 %v8739_v19, %v7863_v20  ;;  %4820 = vmatpush.bf16.msrb.mxu2 %v7610_v62  ;;  %v8774_v62 = vld [vmem:[%s10631_s27 + $0x30] sm:$0xff] }
 0x326   : > { %v7415_v25 = vld [vmem:[%s9375_s19 + $0xbb8] sm:$0xf0] }
 0x327   : > { %v8531_v26 = vld [vmem:[%s9375_s19 + $0x89c] sm:$0xf]  ;;  %v7418_v33 = vor.u32 %v8627_v24, %v7415_v25  ;;  %4833 = vmatpush.bf16.msrb.mxu3 %v7866_v28  ;;  %v4567_v25 = vadd.f32 %v4566_v61, %v4554_v18  ;;  %v4846_v18 = vmax.f32 %v10428_v30, 0.0 }
 0x328   : > { %v7031_v27 = vld [vmem:[%s9375_s19 + $0x8b8] sm:$0xf0] }
 0x329   : > { %v8667_v29 = vld [vmem:[%s9375_s19 + $0xcdc] sm:$0xf]  ;;  %v7034_v34 = vor.u32 %v8531_v26, %v7031_v27  ;;  %4805 = vmatpush.bf16.msra.mxu1 %v7418_v33  ;;  %v4568_v27 = vpop.f32.mrf.mxu2  ;;  %v8799_v33 = vld [vmem:[%s10631_s27 + $0xf8] sm:$0xff] }
 0x32a   : > { %v7575_v32 = vld [vmem:[%s9375_s19 + $0xcf8] sm:$0xf0]  ;;  %v8776_v27 = vld [vmem:[%s10631_s27 + $0x40] sm:$0xff] }
 0x32b   : > { %v8731_v36 = vld [vmem:[%s9375_s19 + $0xedc] sm:$0xf]  ;;  %v7578_v40 = vor.u32 %v8667_v29, %v7575_v32  ;;  %4796 = vmatpush.bf16.msra.mxu0 %v7034_v34  ;;  %v8791_v29 = vld [vmem:[%s10631_s27 + $0xb8] sm:$0xff]  ;;  %v4581_v32 = vpop.f32.mrf.mxu3 }
 0x32c   : > { %v7831_v37 = vld [vmem:[%s9375_s19 + $0xef8] sm:$0xf0] }
 0x32d   : > { %v8619_v45 = vld [vmem:[%s9375_s19 + $0xb5c] sm:$0xf]  ;;  %v7834_v43 = vor.u32 %v8731_v36, %v7831_v37  ;;  %4821 = vmatpush.bf16.msrb.mxu2 %v7578_v40  ;;  %v10651_v37 = vadd.f32 %v4579_v5, %v4567_v25  ;;  %v4555_v40 = vpop.f32.mrf.mxu1  ;;  %v4854_v25 = vpack.c.bf16 %v4846_v18, %v4846_v18 }
 0x32e   : > { %v7383_v38 = vld [vmem:[%s9375_s19 + $0xb78] sm:$0xf0]  ;;  %v8802_v40 = vld [vmem:[%s10631_s27 + $0x110] sm:$0xff] }
 0x32f   : > { %v8523_v41 = vld [vmem:[%s9375_s19 + $0x85c] sm:$0xf]  ;;  %v7386_v48 = vor.u32 %v8619_v45, %v7383_v38  ;;  %4834 = vmatpush.bf16.msrb.mxu3 %v7834_v43 }
 0x330   : > { %v6999_v42 = vld [vmem:[%s9375_s19 + $0x878] sm:$0xf0] }
 0x331   : > { %v8659_v54 = vld [vmem:[%s9375_s19 + $0xc9c] sm:$0xf]  ;;  %v7002_v51 = vor.u32 %v8523_v41, %v6999_v42  ;;  %4806 = vmatpush.bf16.msra.mxu1 %v7386_v48  ;;  %v8798_v41 = vld [vmem:[%s10631_s27 + $0xf0] sm:$0xff] }
 0x332   : > { %v7543_v46 = vld [vmem:[%s9375_s19 + $0xcb8] sm:$0xf0] }
 0x333   : > { %v8723_v50 = vld [vmem:[%s9375_s19 + $0xe9c] sm:$0xf]  ;;  %v7546_v56 = vor.u32 %v8659_v54, %v7543_v46  ;;  %4797 = vmatpush.bf16.msra.mxu0 %v7002_v51  ;;  %v8772_v46 = vld [vmem:[%s10631_s27 + $0x20] sm:$0xff]  ;;  %v8771_v51 = vld [vmem:[%s10631_s27 + $0x18] sm:$0xff]  ;;  %v10682_v5 = vpop.f32.mrf.mxu3 }
 0x334   : > { %v7799_v39 = vld [vmem:[%s9375_s19 + $0xeb8] sm:$0xf0] }
 0x335   : > { %v8611_v52 = vld [vmem:[%s9375_s19 + $0xb1c] sm:$0xf]  ;;  %v7802_v63 = vor.u32 %v8723_v50, %v7799_v39  ;;  %4822 = vmatpush.bf16.msrb.mxu2 %v7546_v56  ;;  %v10665_v39 = vpop.f32.mrf.mxu0  ;;  %v8787_v56 = vld [vmem:[%s10631_s27 + $0x98] sm:$0xff] }
 0x336   : > { %v7351_v53 = vld [vmem:[%s9375_s19 + $0xb38] sm:$0xf0] }
 0x337   : > { %v8515_v57 = vld [vmem:[%s9375_s19 + $0x81c] sm:$0xf]  ;;  %v7354_v58 = vor.u32 %v8611_v52, %v7351_v53  ;;  %4835 = vmatpush.bf16.msrb.mxu3 %v7802_v63  ;;  %v8796_v52 = vld [vmem:[%s10631_s27 + $0xe0] sm:$0xff]  ;;  %v8782_v53 = vld [vmem:[%s10631_s27 + $0x70] sm:$0xff] }
 0x338   : > { %v6967_v31 = vld [vmem:[%s9375_s19 + $0x838] sm:$0xf0] }
 0x339   : > { %v8651_v0 = vld [vmem:[%s9375_s19 + $0xc5c] sm:$0xf]  ;;  %v6970_v11 = vor.u32 %v8515_v57, %v6967_v31  ;;  %4807 = vmatpush.bf16.msra.mxu1 %v7354_v58  ;;  %v8795_v57 = vld [vmem:[%s10631_s27 + $0xd8] sm:$0xff]  ;;  %v8780_v58 = vld [vmem:[%s10631_s27 + $0x60] sm:$0xff] }
 0x33a   : > { %v7511_v3 = vld [vmem:[%s9375_s19 + $0xc78] sm:$0xf0] }
 0x33b   : > { %v8715_v6 = vld [vmem:[%s9375_s19 + $0xe5c] sm:$0xf]  ;;  %v7514_v59 = vor.u32 %v8651_v0, %v7511_v3  ;;  %4798 = vmatpush.bf16.msra.mxu0 %v6970_v11  ;;  %v8786_v0 = vld [vmem:[%s10631_s27 + $0x90] sm:$0xff]  ;;  %v10679_v3 = vpop.f32.mrf.mxu2  ;;  %v8807_v11 = vld [vmem:[%s10631_s27 + $0x138] sm:$0xff] }
 0x33c   : > { %v7767_v10 = vld [vmem:[%s9375_s19 + $0xe78] sm:$0xf0] }
 0x33d   : > { %v8603_v12 = vld [vmem:[%s9375_s19 + $0xadc] sm:$0xf]  ;;  %v7770_v16 = vor.u32 %v8715_v6, %v7767_v10  ;;  %4823 = vmatpush.bf16.msrb.mxu2 %v7514_v59  ;;  %v4594_v31 = vpop.f32.mrf.mxu0  ;;  %v8768_v6 = vld [vmem:[%s10631_s27] sm:$0xff]  ;;  %v4843_v10 = vmax.f32 %v10023_v7, 0.0  ;;  %v4845_v7 = vmax.f32 %v10280_v22, 0.0 }
 0x33e   : > { %v7319_v13 = vld [vmem:[%s9375_s19 + $0xaf8] sm:$0xf0]  ;;  %4799 = vmatmul.bf16.vlgmr.msra.gmra.mxu0 %v9650_v35  ;;  %v8790_v35 = vld [vmem:[%s10631_s27 + $0xb0] sm:$0xff] }
 0x33f   : > { %v8643_v4 = vld [vmem:[%s9375_s19 + $0xc1c] sm:$0xf]  ;;  %v7322_v19 = vor.u32 %v8603_v12, %v7319_v13  ;;  %5375 = vmatpush.bf16.msrb.mxu0 %v8775_v15  ;;  %4836 = vmatpush.bf16.msrb.mxu3 %v7770_v16  ;;  %v10689_v13 = vpop.f32.mrf.mxu1  ;;  %v8779_v15 = vld [vmem:[%s10631_s27 + $0x58] sm:$0xff]  ;;  %v4851_v59 = vpack.c.bf16 %v4843_v10, %v4843_v10  ;;  %v8784_v16 = vld [vmem:[%s10631_s27 + $0x80] sm:$0xff] }
 0x340   : > { %v7479_v2 = vld [vmem:[%s9375_s19 + $0xc38] sm:$0xf0] }
 0x341   : > { %v8707_v20 = vld [vmem:[%s9375_s19 + $0xe1c] sm:$0xf]  ;;  %v7482_v26 = vor.u32 %v8643_v4, %v7479_v2  ;;  %4808 = vmatpush.bf16.msra.mxu1 %v7322_v19  ;;  %v8792_v2 = vld [vmem:[%s10631_s27 + $0xc0] sm:$0xff]  ;;  %v4633_v19 = vpop.f32.mrf.mxu3 }
 0x342   : > { %v7735_v23 = vld [vmem:[%s9375_s19 + $0xe38] sm:$0xf0]  ;;  %v8831_v19 = vld [vmem:[%s10631_s27 + $0x1f8] sm:$0xff] }
 0x343   : > { %v8595_v24 = vld [vmem:[%s9375_s19 + $0xa9c] sm:$0xf]  ;;  %v7738_v28 = vor.u32 %v8707_v20, %v7735_v23  ;;  %5376 = vmatpush.bf16.msrb.mxu0 %v8774_v62  ;;  %4824 = vmatpush.bf16.msrb.mxu2 %v7482_v26  ;;  %v4620_v4 = vpop.f32.mrf.mxu2  ;;  %v8778_v20 = vld [vmem:[%s10631_s27 + $0x50] sm:$0xff]  ;;  %v8823_v23 = vld [vmem:[%s10631_s27 + $0x1b8] sm:$0xff] }
 0x344   : > { %v7287_v17 = vld [vmem:[%s9375_s19 + $0xab8] sm:$0xf0]  ;;  %v8822_v62 = vld [vmem:[%s10631_s27 + $0x1b0] sm:$0xff]  ;;  %v8804_v26 = vld [vmem:[%s10631_s27 + $0x120] sm:$0xff] }
 0x345   : > { %v7290_v36 = vor.u32 %v8595_v24, %v7287_v17  ;;  %v8587_v34 = vld [vmem:[%s9375_s19 + $0xa5c] sm:$0xf]  ;;  %4837 = vmatpush.bf16.msrb.mxu3 %v7738_v28  ;;  %v4853_v17 = vpack.c.bf16 %v4845_v7, %v4845_v7  ;;  %v4644_v32 = vpop.f32.mrf.mxu0 }
 0x346   : > { %v7255_v45 = vld [vmem:[%s9375_s19 + $0xa78] sm:$0xf0]  ;;  %4825 = vmatmul.bf16.vlgmr.msrb.gmra.mxu2 %v9672_v8  ;;  %v8783_v8 = vld [vmem:[%s10631_s27 + $0x78] sm:$0xff] }
 0x347   : > { %v8773_v38 = vld [vmem:[%s10631_s27 + $0x28] sm:$0xff]  ;;  %5401 = vmatpush.bf16.msra.mxu2 %v8791_v29  ;;  %4809 = vmatpush.bf16.msra.mxu1 %v7290_v36  ;;  %v7258_v42 = vor.u32 %v8587_v34, %v7255_v45  ;;  %v4607_v22 = vpop.f32.mrf.mxu1  ;;  %v4844_v29 = vmax.f32 %v10135_v21, 0.0  ;;  %v8803_v36 = vld [vmem:[%s10631_s27 + $0x118] sm:$0xff]  ;;  %v8820_v34 = vld [vmem:[%s10631_s27 + $0x1a0] sm:$0xff] }
 0x348   : > { %v8579_v43 = vld [vmem:[%s9375_s19 + $0xa1c] sm:$0xf]  ;;  %4838 = vmatmul.bf16.vlgmr.msrb.gmra.mxu3 %v9674_v9  ;;  %5377 = vmatpush.bf16.msrb.mxu0 %v8773_v38  ;;  %v8788_v9 = vld [vmem:[%s10631_s27 + $0xa0] sm:$0xff]  ;;  %v8814_v38 = vld [vmem:[%s10631_s27 + $0x170] sm:$0xff] }
 0x349   : > { %5414 = vmatpush.bf16.msra.mxu3 %v8799_v33  ;;  %v7223_v54 = vld [vmem:[%s9375_s19 + $0xa38] sm:$0xf0]  ;;  %v8815_v33 = vld [vmem:[%s10631_s27 + $0x178] sm:$0xff]  ;;  %v4852_v45 = vpack.c.bf16 %v4844_v29, %v4844_v29 }
 0x34a   : > { %v8789_v47 = vld [vmem:[%s10631_s27 + $0xa8] sm:$0xff]  ;;  %v7226_v50 = vor.u32 %v8579_v43, %v7223_v54  ;;  %v8819_v21 = vld [vmem:[%s10631_s27 + $0x198] sm:$0xff]  ;;  %v8818_v54 = vld [vmem:[%s10631_s27 + $0x190] sm:$0xff] }
 0x34b   : > { %5402 = vmatpush.bf16.msra.mxu2 %v8790_v35  ;;  %4810 = vmatpush.bf16.msra.mxu1 %v7258_v42  ;;  %v8797_v48 = vld [vmem:[%s10631_s27 + $0xe8] sm:$0xff]  ;;  %v4670_v43 = vpop.f32.mrf.mxu2 }
 0x34c   : > { %5378 = vmatpush.bf16.msrb.mxu0 %v8772_v46  ;;  %v8781_v61 = vld [vmem:[%s10631_s27 + $0x68] sm:$0xff]  ;;  %v4683_v46 = vpop.f32.mrf.mxu3 }
 0x34d   : > { %5415 = vmatpush.bf16.msra.mxu3 %v8798_v41  ;;  %v8769_v63 = vld [vmem:[%s10631_s27 + $0x8] sm:$0xff]  ;;  %v4646_v35 = vpop.f32.mrf.mxu0 }
 0x34e   : > { %v8785_v12 = vld [vmem:[%s10631_s27 + $0x88] sm:$0xff] }
 0x34f   : > { %5403 = vmatpush.bf16.msra.mxu2 %v8789_v47  ;;  %4811 = vmatpush.bf16.msra.mxu1 %v7226_v50  ;;  %v8793_v14 = vld [vmem:[%s10631_s27 + $0xc8] sm:$0xff]  ;;  %v8812_v47 = vld [vmem:[%s10631_s27 + $0x160] sm:$0xff]  ;;  %v4847_v50 = vmax.f32 %v10573_v60, 0.0  ;;  %v8810_v60 = vld [vmem:[%s10631_s27 + $0x150] sm:$0xff] }
 0x350   : > { %5379 = vmatpush.bf16.msrb.mxu0 %v8771_v51  ;;  %v8805_v24 = vld [vmem:[%s10631_s27 + $0x128] sm:$0xff]  ;;  %v4657_v51 = vpop.f32.mrf.mxu1 }
 0x351   : > { %5416 = vmatpush.bf16.msra.mxu3 %v8797_v48  ;;  %v8777_v30 = vld [vmem:[%s10631_s27 + $0x48] sm:$0xff]  ;;  %v8800_v48 = vld [vmem:[%s10631_s27 + $0x100] sm:$0xff] }
 0x352   : > { %4812 = vmatmul.bf16.vlgmr.msra.gmra.mxu1 %v9701_v49  ;;  %v8794_v49 = vld [vmem:[%s10631_s27 + $0xd0] sm:$0xff]  ;;  %v8821_v28 = vld [vmem:[%s10631_s27 + $0x1a8] sm:$0xff] }
 0x353   : > { %5388 = vmatpush.bf16.msrb.mxu1 %v8783_v8  ;;  %5404 = vmatpush.bf16.msra.mxu2 %v8788_v9  ;;  %v8813_v41 = vld [vmem:[%s10631_s27 + $0x168] sm:$0xff]  ;;  %v4593_v8 = vadd.f32 %v10665_v39, %v10651_v37 }
 0x354   : > { %5380 = vmatpush.bf16.msrb.mxu0 %v8770_v44  ;;  %v8801_v42 = vld [vmem:[%s10631_s27 + $0x108] sm:$0xff]  ;;  %v4855_v44 = vpack.c.bf16 %v4847_v50, %v4847_v50  ;;  %v4685_v31 = vpop.f32.mrf.mxu3 }
 0x355   : > { %5417 = vmatpush.bf16.msra.mxu3 %v8796_v52  ;;  %v8817_v9 = vld [vmem:[%s10631_s27 + $0x188] sm:$0xff]  ;;  %v8811_v52 = vld [vmem:[%s10631_s27 + $0x158] sm:$0xff] }
 0x356   : > { %v8809_v39 = vld [vmem:[%s10631_s27 + $0x148] sm:$0xff] }
 0x357   : > { %5389 = vmatpush.bf16.msrb.mxu1 %v8782_v53  ;;  %5405 = vmatpush.bf16.msra.mxu2 %v8787_v56  ;;  %v4606_v53 = vadd.f32 %v10689_v13, %v4593_v8  ;;  %v4672_v56 = vpop.f32.mrf.mxu2  ;;  %v8829_v22 = vld [vmem:[%s10631_s27 + $0x1e8] sm:$0xff] }
 0x358   : > { %5381 = vmatpush.bf16.msrb.mxu0 %v8769_v63  ;;  %v4659_v37 = vpop.f32.mrf.mxu1 }
 0x359   : > { %5418 = vmatpush.bf16.msra.mxu3 %v8795_v57  ;;  %v8816_v57 = vld [vmem:[%s10631_s27 + $0x180] sm:$0xff] }
 0x35b   : > { %5390 = vmatpush.bf16.msrb.mxu1 %v8781_v61  ;;  %5406 = vmatpush.bf16.msra.mxu2 %v8786_v0  ;;  %v4619_v61 = vadd.f32 %v10679_v3, %v4606_v53  ;;  %v1441_v0 = vperm.slane %v10623_v55, 6 }
 0x35c   : > { %5382 = vmatpush.bf16.msrb.mxu0 %v8768_v6 }
 0x35d   : > { %5419 = vmatpush.bf16.msra.mxu3 %v8794_v49  ;;  %v4632_v63 = vadd.f32 %v10682_v5, %v4619_v61  ;;  %v8808_v49 = vld [vmem:[%s10631_s27 + $0x140] sm:$0xff]  ;;  %v4645_v10 = vadd.f32 %v4644_v32, %v1441_v0 }
 0x35f   : > { %5391 = vmatpush.bf16.msrb.mxu1 %v8780_v58  ;;  %5407 = vmatpush.bf16.msra.mxu2 %v8785_v12  ;;  %v4848_v58 = vmax.f32 %v4632_v63, 0.0  ;;  %v4658_v12 = vadd.f32 %v4657_v51, %v4645_v10 }
 0x360   : > { %5427 = vmatpush.bf16.msra.mxu0 %v8807_v11 }
 0x361   : > { %5420 = vmatpush.bf16.msra.mxu3 %v8793_v14  ;;  %5383 = vmatmul.bf16.vlgmr.msrb.gmra.mxu0 %v4851_v59  ;;  %v4696_v6 = vpop.f32.mrf.mxu0  ;;  %v4856_v11 = vpack.c.bf16 %v4848_v58, %v4848_v58  ;;  %v4671_v13 = vadd.f32 %v4670_v43, %v4658_v12 }
 0x363   : > { %5392 = vmatpush.bf16.msrb.mxu1 %v8779_v15  ;;  %5408 = vmatpush.bf16.msra.mxu2 %v8784_v16  ;;  %v4684_v15 = vadd.f32 %v4683_v46, %v4671_v13 }
 0x364   : > { %5428 = vmatpush.bf16.msra.mxu0 %v8806_v1 }
 0x365   : > { %5421 = vmatpush.bf16.msra.mxu3 %v8792_v2  ;;  %v4697_v5 = vadd.f32 %v4696_v6, %v4684_v15 }
 0x366   : > { %5409 = vmatmul.bf16.vlgmr.msra.gmra.mxu2 %v4853_v17  ;;  %v8830_v17 = vld [vmem:[%s10631_s27 + $0x1f0] sm:$0xff] }
 0x367   : > { %5453 = vmatpush.bf16.msrb.mxu2 %v8823_v23  ;;  %5393 = vmatpush.bf16.msrb.mxu1 %v8778_v20 }
 0x368   : > { %5422 = vmatmul.bf16.vlgmr.msra.gmra.mxu3 %v4854_v25  ;;  %5429 = vmatpush.bf16.msra.mxu0 %v8805_v24 }
 0x369   : > { %v4698_v3 = vpop.f32.mrf.mxu0  ;;  %5466 = vmatpush.bf16.msrb.mxu3 %v8831_v19  ;;  %v5498_v19 = vld [vmem:[%s10860_s9 + $0x58] sm:$0xff] }
 0x36b   : > { %5454 = vmatpush.bf16.msrb.mxu2 %v8822_v62  ;;  %5394 = vmatpush.bf16.msrb.mxu1 %v8777_v30  ;;  %v8828_v30 = vld [vmem:[%s10631_s27 + $0x1e0] sm:$0xff]  ;;  %v8827_v62 = vld [vmem:[%s10631_s27 + $0x1d8] sm:$0xff] }
 0x36c   : > { %5430 = vmatpush.bf16.msra.mxu0 %v8804_v26 }
 0x36d   : > { %5467 = vmatpush.bf16.msrb.mxu3 %v8830_v17  ;;  %v5494_v17 = vld [vmem:[%s10860_s9 + $0x38] sm:$0xff] }
 0x36f   : > { %5455 = vmatpush.bf16.msrb.mxu2 %v8821_v28  ;;  %5395 = vmatpush.bf16.msrb.mxu1 %v8776_v27  ;;  %v4722_v14 = vpop.f32.mrf.mxu2  ;;  %v8826_v28 = vld [vmem:[%s10631_s27 + $0x1d0] sm:$0xff] }
 0x370   : > { %5431 = vmatpush.bf16.msra.mxu0 %v8803_v36 }
 0x371   : > { %v4735_v59 = vpop.f32.mrf.mxu3  ;;  %5468 = vmatpush.bf16.msrb.mxu3 %v8829_v22  ;;  %v5493_v22 = vld [vmem:[%s10860_s9 + $0x30] sm:$0xff] }
 0x372   : > { %5396 = vmatmul.bf16.vlgmr.msrb.gmra.mxu1 %v4852_v45 }
 0x373   : > { %5440 = vmatpush.bf16.msra.mxu1 %v8815_v33  ;;  %5456 = vmatpush.bf16.msrb.mxu2 %v8820_v34  ;;  %v8825_v33 = vld [vmem:[%s10631_s27 + $0x1c8] sm:$0xff]  ;;  %v8824_v34 = vld [vmem:[%s10631_s27 + $0x1c0] sm:$0xff] }
 0x374   : > { %5432 = vmatpush.bf16.msra.mxu0 %v8802_v40  ;;  %v1442_v40 = vperm.slane %v10623_v55, 7 }
 0x375   : > { %v4709_v1 = vpop.f32.mrf.mxu1  ;;  %5469 = vmatpush.bf16.msrb.mxu3 %v8828_v30  ;;  %v5491_v30 = vld [vmem:[%s10860_s9 + $0x20] sm:$0xff] }
 0x376   : > { %v4710_v16 = vadd.f32 %v4709_v1, %v4697_v5 }
 0x377   : > { %5441 = vmatpush.bf16.msra.mxu1 %v8814_v38  ;;  %5457 = vmatpush.bf16.msrb.mxu2 %v8819_v21  ;;  %v4724_v4 = vpop.f32.mrf.mxu2 }
 0x378   : > { %5433 = vmatpush.bf16.msra.mxu0 %v8801_v42  ;;  %v4723_v7 = vadd.f32 %v4722_v14, %v4710_v16  ;;  %v9179_v16 = vmov 0.0   ;;  %v5501_v4 = vld [vmem:[%s10860_s9 + $0x70] sm:$0xff] }
 0x379   : > { %v4737_v18 = vpop.f32.mrf.mxu3  ;;  %5470 = vmatpush.bf16.msrb.mxu3 %v8827_v62  ;;  %5542 = vst [vmem:[%s10746_s1] sm:$0xff] %v9179_v16  ;;  %v5490_v62 = vld [vmem:[%s10860_s9 + $0x18] sm:$0xff] }
 0x37a   : > { %v4736_v2 = vadd.f32 %v4735_v59, %v4723_v7  ;;  %v5502_v7 = vld [vmem:[%s10860_s9 + $0x78] sm:$0xff]  ;;  %v5499_v18 = vld [vmem:[%s10860_s9 + $0x60] sm:$0xff] }
 0x37b   : > { %5442 = vmatpush.bf16.msra.mxu1 %v8813_v41  ;;  %5458 = vmatpush.bf16.msrb.mxu2 %v8818_v54 }
 0x37c   : > { %5434 = vmatpush.bf16.msra.mxu0 %v8800_v48  ;;  %v4849_v20 = vmax.f32 %v4736_v2, 0.0  ;;  %v5500_v2 = vld [vmem:[%s10860_s9 + $0x68] sm:$0xff] }
 0x37d   : > { %v4711_v23 = vpop.f32.mrf.mxu1  ;;  %5471 = vmatpush.bf16.msrb.mxu3 %v8826_v28  ;;  %v5489_v28 = vld [vmem:[%s10860_s9 + $0x10] sm:$0xff] }
 0x37e   : > { %v4857_v24 = vpack.c.bf16 %v4849_v20, %v4849_v20  ;;  %v5497_v20 = vld [vmem:[%s10860_s9 + $0x50] sm:$0xff]  ;;  %v5496_v23 = vld [vmem:[%s10860_s9 + $0x48] sm:$0xff] }
 0x37f   : > { %5443 = vmatpush.bf16.msra.mxu1 %v8812_v47  ;;  %5459 = vmatpush.bf16.msrb.mxu2 %v8817_v9 }
 0x380   : > { %5435 = vmatmul.bf16.vlgmr.msra.gmra.mxu0 %v4855_v44 }
 0x381   : > { %5472 = vmatpush.bf16.msrb.mxu3 %v8825_v33  ;;  %5503 = vmatpush.msrb.mxu0 %v5502_v7 }
 0x383   : > { %5444 = vmatpush.bf16.msra.mxu1 %v8811_v52  ;;  %5460 = vmatpush.bf16.msrb.mxu2 %v8816_v57 }
 0x384   : > { %v4748_v25 = vpop.f32.mrf.mxu0  ;;  %5504 = vmatpush.msrb.mxu0 %v5501_v4 }
 0x385   : > { %5473 = vmatpush.bf16.msrb.mxu3 %v8824_v34  ;;  %v4749_v35 = vadd.f32 %v4748_v25, %v1442_v40  ;;  %v5492_v25 = vld [vmem:[%s10860_s9 + $0x28] sm:$0xff] }
 0x386   : > { %5461 = vmatmul.bf16.vlgmr.msrb.gmra.mxu2 %v4857_v24  ;;  %5505 = vmatpush.msrb.mxu0 %v5500_v2  ;;  %v5495_v24 = vld [vmem:[%s10860_s9 + $0x40] sm:$0xff] }
 0x387   : > { %5445 = vmatpush.bf16.msra.mxu1 %v8810_v60  ;;  %v8922_v60 = vld [vmem:[%s492_s30] ss:$0 sm:$0xff] }
 0x388   : > { %5506 = vmatpush.msrb.mxu0 %v5499_v18 }
 0x38a   : > { %5507 = vmatpush.msrb.mxu0 %v5498_v19 }
 0x38b   : > { %5446 = vmatpush.bf16.msra.mxu1 %v8809_v39 }
 0x38c   : > { %v4750_v26 = vpop.f32.mrf.mxu0  ;;  %5508 = vmatpush.msrb.mxu0 %v5497_v20 }
 0x38e   : > { %5509 = vmatpush.msrb.mxu0 %v5496_v23 }
 0x38f   : > { %5447 = vmatpush.bf16.msra.mxu1 %v8808_v49  ;;  %v4774_v27 = vpop.f32.mrf.mxu2 }
 0x390   : > { %5510 = vmatpush.msrb.mxu0 %v5495_v24 }
 0x391   : > { %v4787_v29 = vpop.f32.mrf.mxu3 }
 0x392   : > { %5448 = vmatmul.bf16.vlgmr.msra.gmra.mxu1 %v4856_v11  ;;  %5511 = vmatpush.msrb.mxu0 %v5494_v17 }
 0x394   : > { %5512 = vmatpush.msrb.mxu0 %v5493_v22 }
 0x396   : > { %5513 = vmatpush.msrb.mxu0 %v5492_v25 }
 0x397   : > { %v4776_v36 = vpop.f32.mrf.mxu2 }
 0x398   : > { %5514 = vmatpush.msrb.mxu0 %v5491_v30 }
 0x399   : > { %v4789_v45 = vpop.f32.mrf.mxu3 }
 0x39a   : > { %5515 = vmatpush.msrb.mxu0 %v5490_v62  ;;  %v5487_v45 = vld [vmem:[%s10860_s9] sm:$0xff] }
 0x39c   : > { %5516 = vmatpush.msrb.mxu0 %v5489_v28 }
 0x39f   : > { %v4761_v32 = vpop.f32.mrf.mxu1 }
 0x3a0   : > { %v4762_v41 = vadd.f32 %v4761_v32, %v4749_v35  ;;  %v5488_v32 = vld [vmem:[%s10860_s9 + $0x8] sm:$0xff] }
 0x3a1   : > { %5517 = vmatpush.msrb.mxu0 %v5488_v32 }
 0x3a2   : > { %v4775_v42 = vadd.f32 %v4774_v27, %v4762_v41 }
 0x3a3   : > { %5518 = vmatpush.msrb.mxu0 %v5487_v45 }
 0x3a4   : > { %v4788_v46 = vadd.f32 %v4787_v29, %v4775_v42 }
 0x3a7   : > { %v4763_v38 = vpop.f32.mrf.mxu1 }
 0x3bb   : > { %v4800_v21 = vpop.f32.mrf.mxu0 }
 0x3bc   : > { %v4801_v48 = vadd.f32 %v4800_v21, %v4788_v46  ;;  %v8923_v21 = vld [vmem:[#allocation10] ss:$0 sm:$0xff] }
 0x3c3   : > { %v4802_v43 = vpop.f32.mrf.mxu0 }
 0x3c9   : > { %v4826_v54 = vpop.f32.mrf.mxu2 }
 0x3cb   : > { %v4839_v47 = vpop.f32.mrf.mxu3 }
 0x3cf   : > { %v4813_v50 = vpop.f32.mrf.mxu1 }
 0x3d0   : > { %v4814_v8 = vadd.f32 %v4813_v50, %v4801_v48 }
 0x3d1   : > { %v4828_v9 = vpop.f32.mrf.mxu2 }
 0x3d2   : > { %v4827_v51 = vadd.f32 %v4826_v54, %v4814_v8 }
 0x3d3   : > { %v4841_v53 = vpop.f32.mrf.mxu3 }
 0x3d4   : > { %v4840_v52 = vadd.f32 %v4839_v47, %v4827_v51 }
 0x3d6   : > { %v4850_v44 = vmax.f32 %v4840_v52, 0.0 }
 0x3d7   : > { %v4815_v56 = vpop.f32.mrf.mxu1 }
 0x3d8   : > { %v4858_v57 = vpack.c.bf16 %v4850_v44, %v4850_v44 }
 0x3da   : > { %5474 = vmatmul.bf16.vlgmr.msrb.gmra.mxu3 %v4858_v57 }
 0x3de   : > { %v5384_v55 = vpop.f32.mrf.mxu0 }
 0x3df   : > { %v5385_v39 = vadd.f32 %v8922_v60, %v5384_v55 }
 0x3e6   : > { %v5386_v31 = vpop.f32.mrf.mxu0 }
 0x3e9   : > { %v5410_v61 = vpop.f32.mrf.mxu2 }
 0x3eb   : > { %v5423_v37 = vpop.f32.mrf.mxu3 }
 0x3ef   : > { %v5397_v63 = vpop.f32.mrf.mxu1 }
 0x3f0   : > { %v5398_v0 = vadd.f32 %v5397_v63, %v5385_v39 }
 0x3f1   : > { %v5412_v58 = vpop.f32.mrf.mxu2 }
 0x3f2   : > { %v5411_v49 = vadd.f32 %v5410_v61, %v5398_v0 }
 0x3f3   : > { %v5425_v6 = vpop.f32.mrf.mxu3 }
 0x3f4   : > { %v5424_v10 = vadd.f32 %v5423_v37, %v5411_v49 }
 0x3f7   : > { %v5399_v11 = vpop.f32.mrf.mxu1 }
 0x3fd   : > { %v5436_v12 = vpop.f32.mrf.mxu0 }
 0x3fe   : > { %v5437_v13 = vadd.f32 %v5436_v12, %v5424_v10 }
 0x405   : > { %v5438_v3 = vpop.f32.mrf.mxu0 }
 0x409   : > { %v5462_v5 = vpop.f32.mrf.mxu2 }
 0x40f   : > { %v5449_v14 = vpop.f32.mrf.mxu1 }
 0x410   : > { %v5450_v15 = vadd.f32 %v5449_v14, %v5437_v13 }
 0x411   : > { %v5464_v1 = vpop.f32.mrf.mxu2 }
 0x412   : > { %v5463_v26 = vadd.f32 %v5462_v5, %v5450_v15 }
 0x417   : > { %v5451_v59 = vpop.f32.mrf.mxu1 }
 0x45d   : > { %v5475_v27 = vpop.f32.mrf.mxu3 }
 0x45e   : > { %v5476_v29 = vadd.f32 %v5475_v27, %v5463_v26 }
 0x460   : > { %v5479_v33 = vmax.f32 %v5476_v29, 0.0 }
 0x462   : > { %v5480_v36 = vmul.f32 %v5479_v33, %v5479_v33  ;;  %5543 = vst.msk [vmem:[%s10746_s1] sm:$0xff] %vm797_vm0, %v5479_v33 }
 0x464   : > { %5482 = vrot.lane.b32.xlu0 %v5480_v36, %s9180_s17 }
 0x465   : > { %v5477_v34 = vpop.f32.mrf.mxu3 }
 0x4d6   : > { %v5483_v38 = vpop.permute.xlu0 %5482 }
 0x4d7   : > { %v5485_v40 = vsel %vm797_vm0, %v5479_v33, %v5483_v38 }
 0x4d8   : > { %5519 = vmatmul.f32.vlgmr.msrb.gmra.mxu0 %v5485_v40 }
 0x555   : > { %v5520_v35 = vpop.f32.mrf.mxu0 }
 0x556   : > { %v5526_v41 = vadd.f32 %v8923_v21, %v5520_v35 }
 0x558   : > { %v5528_v42 = vsel %vm5527_vm1, %v5526_v41, -inf }
 0x559   : > { %5529 = vmax.xlane.f32.xlu0 %v5528_v42 }
 0x5cc   : > { %v5530_v43 = vpop.xlane.xlu0 %5529 }
 0x5cd   : > { %v5531_v54 = vsub.f32 %v5526_v41, %v5530_v43 }
 0x5cf   : > { %v5532_v46 = vmul.f32 1.442695, %v5531_v54 }
 0x5d1   : > { %8924 = vpow2.f32 %v5532_v46 }
 0x5d7   : > { %v8925_v47 = vpop.eup %8924 }
 0x5d8   : > { %v5534_v48 = vsel %vm5527_vm1, %v8925_v47, 0.0 }
 0x5d9   : > { %5535 = vadd.xlane.f32.xlu1 %v5534_v48 }
 0x64c   : > { %v5536_v50 = vpop.xlane.xlu1 %5535 }
 0x64d   : > { %8926 = vrcp.f32 %v5536_v50 }
 0x64e   : > { %8928 = vlog2.f32 %v5536_v50 }
 0x653   : > { %v8927_v8 = vpop.eup %8926 }
 0x654   : > { %v5538_v51 = vmul.f32 %v8927_v8, %v8925_v47  ;;  %v8929_v9 = vpop.eup %8928 }
 0x655   : > { %v5540_v52 = vmul.f32 0.6931472, %v8929_v9 }
 0x656   : > { %5545 = vrot.lane.b32.xlu1 %v5538_v51, %s9180_s17 }
 0x657   : > { %v5541_v53 = vadd.f32 %v5540_v52, %v5530_v43 }
 0x6c8   : > { %v5546_v44 = vpop.permute.xlu1 %5545 }
 0x6c9   : > { %5549 = vst.msk [vmem:[%s10746_s1] sm:$0xff] %vm5548_vm2, %v5546_v44 }
 0x6ca   : > { %5551 = vst.msk [vmem:[%s10746_s1] sm:$0xff] %vm5550_vm3, %v5541_v53 }
 0x6cb PF: > { %s29_s14 = sadd.s32 1, %s9174_s14   ;;  %s10861_s25 = sld [smem:[#allocation16_spill]] }
 0x6cc   : > { %p26_p2 = scmp.ge.s32.totalorder %s29_s14, 4   ;;  %s10862_s11 = sld [smem:[#allocation19_spill]] }
 0x6cd   : > { %s10863_s28 = sld [smem:[#allocation18_spill]]  ;;  %s10864_s30 = smov %s9158_s10 }
 0x6ce   : > { %s10866_s12 = smov %s9170_s13 }
 0x6cf   :  { %28 = sbr.rel (!%p26_p2) target bundleno = 18 (0x12), region = 154 }
 0x6d1   : > { %s10865_s10 = smov %s10861_s25 }
 0x6d3   : > { %s10867_s13 = smov %s10863_s28 }
 0x6d4   :  { %5577 = vsyncpa [#allocation3], 1 }
 0x6d5   :  { %5579 = vsyncpa [#allocation3 + $0x1], 1 }
 0x6d6   :  { %5580 = vsyncpa [#allocation5], 1 }
 0x6d7   :  { %5582 = vsyncpa [#allocation5 + $0x1], 1 }
 0x6d8   :  { %5583 = vsyncpa [#allocation8], 1 }
 0x6d9   :  { %5585 = vsyncpa [#allocation8 + $0x1], 1 }
 0x6da   :  { %5586 = vsyncpa [#allocation11], 1 }

</bundles_post_ra>
